<compile_context>
chip_gen: v6e
topology: v6e:2x2x1
jax: 0.10.0
libtpu: 0.0.40
codegen_flags: <defaults>
</compile_context>

<pallas_src>
import functools

import jax
import jax.numpy as jnp
from jax.experimental import pallas as pl
from jax.experimental.pallas import tpu as pltpu

_NEG_BIG = -1e30


def _focus_attention_kernel(
    sf_ref, enc_out_ref, enc_hs_ref, mask_ref, cov_ref,
    wdf_ref, bdec_ref, wc_ref, v_ref,
    ctx_ref, att_ref, cov_out_ref,
    df_sc, m_sc, l_sc, ctx_sc,
    *, block_t, compute_dtype,
):
    j = pl.program_id(1)
    nt = pl.num_programs(1)
    cd = compute_dtype

    # ---- per-batch-block init (first T tile only) ----
    @pl.when(j == 0)
    def _init():
        # Fused decoder + focus projection: [s_t | this_focus] @ [[W_dec];[W_f]] + b_dec
        # Operands stay in their storage dtype; accumulate in f32 on the MXU.
        df_sc[...] = (
            jnp.dot(sf_ref[...], wdf_ref[...].astype(sf_ref.dtype),
                    preferred_element_type=jnp.float32)
            + bdec_ref[...].astype(jnp.float32))
        m_sc[...] = jnp.full_like(m_sc, _NEG_BIG)
        l_sc[...] = jnp.zeros_like(l_sc)
        ctx_sc[...] = jnp.zeros_like(ctx_sc)

    t0 = pl.multiple_of(j * block_t, block_t)
    cov_tile = cov_ref[:, pl.ds(t0, block_t)]                         # (bb, bt)

    # ---- additive attention features + tanh, in the compute dtype ----
    feat = jnp.tanh(
        enc_hs_ref[...].astype(cd)
        + df_sc[...].astype(cd)[:, None, :]
        + cov_tile.astype(cd)[:, :, None] * wc_ref[...].astype(cd)[None, :, :])
    bb, bt, d = feat.shape

    # ---- scores = V(feat) on the MXU (flash-style contraction, q = 1), masked ----
    v_b = jnp.broadcast_to(v_ref[...].astype(cd), (bb, 1, d))         # (bb, 1, D)
    s = jnp.einsum('bqd,btd->bqt', v_b, feat,
                   preferred_element_type=jnp.float32)[:, 0, :]       # (bb, bt)
    s = jnp.where(mask_ref[...].astype(jnp.float32) > 0.5, _NEG_BIG, s)
    # Stash raw masked scores in the VMEM-resident attention output row.
    att_ref[:, pl.ds(t0, block_t)] = s

    # ---- online softmax accumulation over T tiles ----
    m_prev = m_sc[...]
    m_new = jnp.maximum(m_prev, jnp.max(s, axis=-1, keepdims=True))   # (bb, 1)
    alpha = jnp.exp(m_prev - m_new)
    p = jnp.exp(s - m_new)                                            # (bb, bt) f32
    l_sc[...] = alpha * l_sc[...] + jnp.sum(p, axis=-1, keepdims=True)

    # Context contribution on the MXU; operands kept in the stream's storage dtype.
    ctx_upd = jnp.einsum(
        'bqt,btd->bqd', p.astype(enc_out_ref.dtype)[:, None, :], enc_out_ref[...],
        preferred_element_type=jnp.float32)[:, 0, :]
    ctx_sc[...] = alpha * ctx_sc[...] + ctx_upd
    m_sc[...] = m_new

    # ---- finalize after the last T tile ----
    @pl.when(j == nt - 1)
    def _finalize():
        inv_l = 1.0 / l_sc[...]
        ctx_ref[...] = (ctx_sc[...] * inv_l).astype(ctx_ref.dtype)
        att = jnp.exp(att_ref[...] - m_sc[...]) * inv_l               # (bb, T)
        att_ref[...] = att.astype(att_ref.dtype)
        cov_out_ref[...] = (cov_ref[...].astype(jnp.float32) + att).astype(cov_out_ref.dtype)


def prepare_attention_params(params):
    """Fuse [W_dec; W_f] once at model load time (keeps the concat off the
    per-decode-step critical path). Input: (w_dec, b_dec, w_c, w_f, v)."""
    w_dec, b_dec, w_c, w_f, v = params
    w_df = jnp.concatenate([w_dec, w_f], axis=0)          # (2D, D)
    return (w_df, b_dec, w_c, v)


def _vmem_capacity_bytes():
    try:
        cap = getattr(pltpu.get_tpu_info(), "vmem_capacity_bytes", None)
        if cap:
            return int(cap)
    except Exception:
        pass
    return 64 * 1024 * 1024   # conservative default (v7x per-TC)


def _choose_tiles(B, T, D, stream_itemsize, cd_itemsize, vmem_cap):
    """Largest tiles whose streamed buffers + compute temporaries fit the
    generation-appropriate budget (big on 128 MiB v5e/v6e, tight on 64 MiB v7x)."""
    # TODO(synk): for B == 8 on v7x one TC idles; splitting to bb=4 would break the
    # 8-sublane-aligned (bb, T) blocks, so we keep bb=8 there.
    bb = 8 if B % 8 == 0 else B
    budget = 56 * 1024 * 1024 if vmem_cap >= 100 * 1024 * 1024 else 16 * 1024 * 1024
    # 2 streams x 2 pipeline buffers + ~3x feat-sized compute temporaries
    per_t = bb * D * (4 * stream_itemsize + 3 * cd_itemsize)
    for cand in (4096, 2048, 1024, 512, 256, 128):
        if T % cand == 0 and per_t * cand <= budget:
            return bb, cand
    return bb, T


def focus_decoder_attention(s_t, encoder_out, encoder_hs_features, enc_padding_mask,
                            coverage, this_focus, params, *, block_b=None, block_t=None,
                            compute_dtype=None, extra_stream_buffers=False):
    """Pallas wrapper. Returns (context, att_dist, new_coverage).

    `params` is either the raw 5-tuple (w_dec, b_dec, w_c, w_f, v) or the
    pre-fused 4-tuple from prepare_attention_params (preferred: fuse once).
    For best HBM bandwidth, store/stream encoder_out and encoder_hs_features as
    bf16 (cast once upstream); compute then also runs in bf16 on bf16-capable parts.
    """
    B, T, D = encoder_out.shape
    if len(params) == 5:
        params = prepare_attention_params(params)   # per-call fallback
    w_df, b_dec, w_c, v = params

    sf = jnp.concatenate([s_t, this_focus], axis=-1)          # (B, 2D)

    if compute_dtype is None:
        streams_bf16 = (encoder_out.dtype == jnp.bfloat16
                        and encoder_hs_features.dtype == jnp.bfloat16)
        compute_dtype = jnp.bfloat16 if streams_bf16 else jnp.float32

    stream_itemsize = jnp.dtype(encoder_out.dtype).itemsize
    cd_itemsize = jnp.dtype(compute_dtype).itemsize
    vmem_cap = _vmem_capacity_bytes()
    auto_b, auto_t = _choose_tiles(B, T, D, stream_itemsize, cd_itemsize, vmem_cap)
    bb = block_b if block_b is not None else auto_b
    bt = block_t if block_t is not None else auto_t
    if B % bb != 0 or T % bt != 0:
        raise ValueError(f"block sizes ({bb},{bt}) must divide (B,T)=({B},{T})")
    nb, ntile = B // bb, T // bt

    kernel = functools.partial(_focus_attention_kernel, block_t=bt,
                               compute_dtype=compute_dtype)

    def stream_spec():
        if extra_stream_buffers:
            # Deeper pipelining to hide the j==0 / j==nt-1 bubbles (128 MiB parts).
            return pl.BlockSpec((bb, bt, D), lambda i, j: (i, j, 0),
                                pipeline_mode=pl.Buffered(3))
        return pl.BlockSpec((bb, bt, D), lambda i, j: (i, j, 0))

    grid_spec = pltpu.PrefetchScalarGridSpec(
        num_scalar_prefetch=0,
        grid=(nb, ntile),
        in_specs=[
            pl.BlockSpec((bb, 2 * D), lambda i, j: (i, 0)),        # [s_t | focus]
            stream_spec(),                                         # encoder_out (streamed)
            stream_spec(),                                         # encoder_hs_features (streamed)
            pl.BlockSpec((bb, bt), lambda i, j: (i, j)),           # padding mask
            pl.BlockSpec((bb, T), lambda i, j: (i, 0)),            # coverage row (resident)
            pl.BlockSpec((2 * D, D), lambda i, j: (0, 0)),         # fused [W_dec; W_f] (resident)
            pl.BlockSpec((1, D), lambda i, j: (0, 0)),             # b_dec
            pl.BlockSpec((1, D), lambda i, j: (0, 0)),             # W_c
            pl.BlockSpec((1, D), lambda i, j: (0, 0)),             # V
        ],
        out_specs=(
            pl.BlockSpec((bb, D), lambda i, j: (i, 0)),            # context
            pl.BlockSpec((bb, T), lambda i, j: (i, 0)),            # att_dist (also score stash)
            pl.BlockSpec((bb, T), lambda i, j: (i, 0)),            # updated coverage
        ),
        scratch_shapes=[
            pltpu.VMEM((bb, D), jnp.float32),    # fused decoder+focus features
            pltpu.VMEM((bb, 1), jnp.float32),    # running max m
            pltpu.VMEM((bb, 1), jnp.float32),    # running denom l
            pltpu.VMEM((bb, D), jnp.float32),    # unnormalized context accumulator
        ],
    )

    out_shapes = (
        jax.ShapeDtypeStruct((B, D), jnp.float32),   # context
        jax.ShapeDtypeStruct((B, T), jnp.float32),   # att_dist
        jax.ShapeDtypeStruct((B, T), jnp.float32),   # coverage (updated)
    )

    # VMEM budget: streamed inputs (double-buffered) + compute temporaries +
    # resident rows/weights + outputs + scratch, with headroom; capped below
    # the chip's physical VMEM (generation-aware).
    n_buf = 3 if extra_stream_buffers else 2
    est = (2 * n_buf * bb * bt * D * stream_itemsize     # 2 streams x n_buf buffers
           + 3 * bb * bt * D * cd_itemsize               # feat + add/tanh temporaries
           + 2 * bb * bt * 4                             # mask blocks
           + 2 * bb * T * 4                              # coverage row
           + 2 * bb * 2 * D * 4                          # [s_t | focus] block
           + 2 * (2 * D * D + 3 * D) * 4                 # resident weights
           + 2 * (bb * D + 2 * bb * T) * 4               # outputs
           + (2 * bb * D + 2 * bb) * 4)                  # scratch accumulators
    vmem_limit = int(min(max(32 * 1024 * 1024, int(1.4 * est)),
                         max(vmem_cap - 8 * 1024 * 1024, 32 * 1024 * 1024)))

    return pl.pallas_call(
        kernel,
        out_shape=out_shapes,
        grid_spec=grid_spec,
        compiler_params=pltpu.CompilerParams(
            dimension_semantics=("parallel", "arbitrary"),
            vmem_limit_bytes=vmem_limit),
    )(sf, encoder_out, encoder_hs_features, enc_padding_mask, coverage,
      w_df, b_dec, w_c, v)


def _reference(s_t, encoder_out, enc_hs, mask, coverage, this_focus, params):
    """Pure-JAX replica of the PyTorch forward (align_type=None, is_coverage, is_focus)."""
    w_dec, b_dec, w_c, w_f, v = params
    dec_feat = s_t @ w_dec + b_dec
    focus_feat = this_focus @ w_f
    cov_feat = coverage[:, :, None] * w_c[None, :, :]
    feat = jnp.tanh(enc_hs + dec_feat[:, None, :] + cov_feat + focus_feat[:, None, :])
    scores = jnp.sum(feat * v[None, :, :], axis=-1)
    scores = jnp.where(mask > 0.5, -jnp.inf, scores)
    att = jax.nn.softmax(scores, axis=1)
    ctx = jnp.einsum('bt,btd->bd', att, encoder_out)
    return ctx, att, coverage + att


if __name__ == "__main__":
    B, hidden_size, T = 16, 64, 256
    D = 2 * hidden_size  # 128

    key = jax.random.PRNGKey(0)
    ks = jax.random.split(key, 10)

    # Inputs
    s_t = jax.random.normal(ks[0], (B, D), jnp.float32)
    encoder_out = jax.random.normal(ks[1], (B, T, D), jnp.float32)
    encoder_hs_features = jax.random.normal(ks[2], (B, T, D), jnp.float32)
    coverage = jax.random.uniform(ks[3], (B, T), jnp.float32)
    this_focus = jax.random.normal(ks[4], (B, D), jnp.float32)
    # padding mask: 1.0 == padded. Pad the tail of batch 1 and the ENTIRE first
    # T tile of batch 2 (exercises the fully-masked-tile online-softmax path).
    enc_padding_mask = jnp.zeros((B, T), jnp.float32)
    enc_padding_mask = enc_padding_mask.at[1, T - 7:].set(1.0)
    enc_padding_mask = enc_padding_mask.at[2, :128].set(1.0)

    # Parameters (shapes from the module's __init__, stored as weight.T):
    #   decode_projection: Linear(D, D, bias=True)   -> w_dec (D, D), b_dec (1, D)
    #   W_c:               Linear(1, D, bias=False)  -> w_c   (1, D)
    #   W_f:               Linear(D, D, bias=False)  -> w_f   (D, D)
    #   V:                 Linear(D, 1, bias=False)  -> v     (1, D)
    # (encoder_projection exists in __init__ but is unused in forward.)
    scale = 1.0 / jnp.sqrt(jnp.float32(D))
    w_dec = jax.random.normal(ks[5], (D, D), jnp.float32) * scale
    b_dec = jax.random.normal(ks[6], (1, D), jnp.float32) * scale
    w_c = jax.random.normal(ks[7], (1, D), jnp.float32) * scale
    w_f = jax.random.normal(ks[8], (D, D), jnp.float32) * scale
    v = jax.random.normal(ks[9], (1, D), jnp.float32) * scale
    params = (w_dec, b_dec, w_c, w_f, v)

    # Hoist the weight fusion out of the per-step path (done once at model load).
    fused_params = prepare_attention_params(params)

    # ---- Run 1: f32 streams, f32 compute; tight tolerance vs reference ----
    ctx, att, cov_new = focus_decoder_attention(
        s_t, encoder_out, encoder_hs_features, enc_padding_mask,
        coverage, this_focus, fused_params, block_b=8, block_t=128)
    jax.block_until_ready((ctx, att, cov_new))

    ctx_r, att_r, cov_r = _reference(
        s_t, encoder_out, encoder_hs_features, enc_padding_mask,
        coverage, this_focus, params)
    assert jnp.allclose(ctx, ctx_r, atol=2e-4, rtol=2e-4)
    assert jnp.allclose(att, att_r, atol=2e-4, rtol=2e-4)
    assert jnp.allclose(cov_new, cov_r, atol=2e-4, rtol=2e-4)

    # ---- Run 2: bf16-streamed encoder tensors (recommended HBM layout);
    #      bf16 feature/tanh + bf16 MXU operands; looser tolerance ----
    enc_out_bf16 = encoder_out.astype(jnp.bfloat16)
    enc_hs_bf16 = encoder_hs_features.astype(jnp.bfloat16)
    ctx_b, att_b, cov_b = focus_decoder_attention(
        s_t, enc_out_bf16, enc_hs_bf16, enc_padding_mask,
        coverage, this_focus, fused_params, block_b=8, block_t=128)
    jax.block_until_ready((ctx_b, att_b, cov_b))

    ctx_rb, att_rb, cov_rb = _reference(
        s_t, enc_out_bf16.astype(jnp.float32), enc_hs_bf16.astype(jnp.float32),
        enc_padding_mask, coverage, this_focus, params)
    assert jnp.allclose(ctx_b, ctx_rb, atol=2e-2, rtol=2e-2)
    assert jnp.allclose(att_b, att_rb, atol=2e-2, rtol=2e-2)
    assert jnp.allclose(cov_b, cov_rb, atol=2e-2, rtol=2e-2)

    print("KERNEL_OK")
</pallas_src>

<mosaic_0001>
module attributes {stable_mosaic.version = 11 : i64} {
  func.func @_focus_attention_kernel(%arg0: i32, %arg1: i32, %arg2: memref<8x256xf32, #tpu.memory_space<vmem>>, %arg3: memref<8x128x128xf32, #tpu.memory_space<vmem>>, %arg4: memref<8x128x128xf32, #tpu.memory_space<vmem>>, %arg5: memref<8x128xf32, #tpu.memory_space<vmem>>, %arg6: memref<8x256xf32, #tpu.memory_space<vmem>>, %arg7: memref<256x128xf32, #tpu.memory_space<vmem>>, %arg8: memref<1x128xf32, #tpu.memory_space<vmem>>, %arg9: memref<1x128xf32, #tpu.memory_space<vmem>>, %arg10: memref<1x128xf32, #tpu.memory_space<vmem>>, %arg11: memref<8x128xf32, #tpu.memory_space<vmem>>, %arg12: memref<8x256xf32, #tpu.memory_space<vmem>>, %arg13: memref<8x256xf32, #tpu.memory_space<vmem>>, %arg14: memref<8x128xf32, #tpu.memory_space<vmem>>, %arg15: memref<8x1xf32, #tpu.memory_space<vmem>>, %arg16: memref<8x1xf32, #tpu.memory_space<vmem>>, %arg17: memref<8x128xf32, #tpu.memory_space<vmem>>) attributes {dimension_semantics = [#tpu.dimension_semantics<parallel>, #tpu.dimension_semantics<arbitrary>], iteration_bounds = array<i64: 2, 2>, scalar_prefetch = 0 : i64, scratch_operands = 4 : i64, tpu.core_type = #tpu.core_type<tc>, window_params = [{transform_indices = @transform_0, window_bounds = array<i64: 8, 256>}, {transform_indices = @transform_1, window_bounds = array<i64: 8, 128, 128>}, {transform_indices = @transform_2, window_bounds = array<i64: 8, 128, 128>}, {transform_indices = @transform_3, window_bounds = array<i64: 8, 128>}, {transform_indices = @transform_4, window_bounds = array<i64: 8, 256>}, {pipeline_mode = #tpu.pipeline_mode<synchronous>, transform_indices = @transform_5, window_bounds = array<i64: 256, 128>}, {pipeline_mode = #tpu.pipeline_mode<synchronous>, transform_indices = @transform_6, window_bounds = array<i64: 1, 128>}, {pipeline_mode = #tpu.pipeline_mode<synchronous>, transform_indices = @transform_7, window_bounds = array<i64: 1, 128>}, {pipeline_mode = #tpu.pipeline_mode<synchronous>, transform_indices = @transform_8, window_bounds = array<i64: 1, 128>}, {transform_indices = @transform_9, window_bounds = array<i64: 8, 128>}, {transform_indices = @transform_10, window_bounds = array<i64: 8, 256>}, {transform_indices = @transform_11, window_bounds = array<i64: 8, 256>}]} {
    %c0_i32 = arith.constant 0 : i32
    %0 = arith.cmpi eq, %arg1, %c0_i32 : i32
    %1 = arith.extui %0 : i1 to i32
    %c0_i32_0 = arith.constant 0 : i32
    %2 = arith.cmpi ne, %1, %c0_i32_0 : i32
    scf.if %2 {
      %c0_34 = arith.constant 0 : index
      %c0_35 = arith.constant 0 : index
      %60 = vector.load %arg2[%c0_34, %c0_35] : memref<8x256xf32, #tpu.memory_space<vmem>>, vector<8x256xf32>
      %c0_36 = arith.constant 0 : index
      %c0_37 = arith.constant 0 : index
      %61 = vector.load %arg7[%c0_36, %c0_37] : memref<256x128xf32, #tpu.memory_space<vmem>>, vector<256x128xf32>
      %cst_38 = arith.constant dense<0.000000e+00> : vector<8x128xf32>
      %62 = tpu.matmul %60, %61, %cst_38 {dimension_numbers = #tpu.dot_dimension_numbers<[1], [0], [0], [1], [0, 0, 1, 1], [], []>} : vector<8x256xf32>, vector<256x128xf32>, vector<8x128xf32> -> vector<8x128xf32>
      %c0_39 = arith.constant 0 : index
      %c0_40 = arith.constant 0 : index
      %63 = vector.load %arg8[%c0_39, %c0_40] : memref<1x128xf32, #tpu.memory_space<vmem>>, vector<1x128xf32>
      %64 = vector.broadcast %63 : vector<1x128xf32> to vector<8x128xf32>
      %65 = arith.addf %62, %64 : vector<8x128xf32>
      %c0_41 = arith.constant 0 : index
      %c0_42 = arith.constant 0 : index
      %66 = vector.load %arg14[%c0_41, %c0_42] : memref<8x128xf32, #tpu.memory_space<vmem>>, vector<8x128xf32>
      tpu.vector_store %arg14[%c0_41, %c0_42], %65 {strides = array<i32>} : memref<8x128xf32, #tpu.memory_space<vmem>>, vector<8x128xf32>,
      %cst_43 = arith.constant -1.000000e+30 : f32
      %67 = vector.broadcast %cst_43 : f32 to vector<8x1xf32>
      %c0_44 = arith.constant 0 : index
      %c0_45 = arith.constant 0 : index
      %68 = vector.load %arg15[%c0_44, %c0_45] : memref<8x1xf32, #tpu.memory_space<vmem>>, vector<8x1xf32>
      tpu.vector_store %arg15[%c0_44, %c0_45], %67 {strides = array<i32>} : memref<8x1xf32, #tpu.memory_space<vmem>>, vector<8x1xf32>,
      %cst_46 = arith.constant 0.000000e+00 : f32
      %69 = vector.broadcast %cst_46 : f32 to vector<8x1xf32>
      %c0_47 = arith.constant 0 : index
      %c0_48 = arith.constant 0 : index
      %70 = vector.load %arg16[%c0_47, %c0_48] : memref<8x1xf32, #tpu.memory_space<vmem>>, vector<8x1xf32>
      tpu.vector_store %arg16[%c0_47, %c0_48], %69 {strides = array<i32>} : memref<8x1xf32, #tpu.memory_space<vmem>>, vector<8x1xf32>,
      %cst_49 = arith.constant 0.000000e+00 : f32
      %71 = vector.broadcast %cst_49 : f32 to vector<8x128xf32>
      %c0_50 = arith.constant 0 : index
      %c0_51 = arith.constant 0 : index
      %72 = vector.load %arg17[%c0_50, %c0_51] : memref<8x128xf32, #tpu.memory_space<vmem>>, vector<8x128xf32>
      tpu.vector_store %arg17[%c0_50, %c0_51], %71 {strides = array<i32>} : memref<8x128xf32, #tpu.memory_space<vmem>>, vector<8x128xf32>,
    } else {
    }
    %c128_i32 = arith.constant 128 : i32
    %3 = arith.muli %arg1, %c128_i32 : i32
    %4 = tpu.assume_multiple %3, 128 : i32
    %c0 = arith.constant 0 : index
    %5 = arith.index_cast %4 : i32 to index
    %6 = vector.load %arg6[%c0, %5] : memref<8x256xf32, #tpu.memory_space<vmem>>, vector<8x128xf32>
    %c0_1 = arith.constant 0 : index
    %c0_2 = arith.constant 0 : index
    %c0_3 = arith.constant 0 : index
    %7 = vector.load %arg4[%c0_1, %c0_2, %c0_3] : memref<8x128x128xf32, #tpu.memory_space<vmem>>, vector<8x128x128xf32>
    %c0_4 = arith.constant 0 : index
    %c0_5 = arith.constant 0 : index
    %8 = vector.load %arg14[%c0_4, %c0_5] : memref<8x128xf32, #tpu.memory_space<vmem>>, vector<8x128xf32>
    %9 = vector.shape_cast %8 : vector<8x128xf32> to vector<8x1x128xf32>
    %10 = vector.broadcast %9 : vector<8x1x128xf32> to vector<8x128x128xf32>
    %11 = arith.addf %7, %10 : vector<8x128x128xf32>
    %12 = vector.shape_cast %6 : vector<8x128xf32> to vector<8x128x1xf32>
    %c0_6 = arith.constant 0 : index
    %c0_7 = arith.constant 0 : index
    %13 = vector.load %arg9[%c0_6, %c0_7] : memref<1x128xf32, #tpu.memory_space<vmem>>, vector<1x128xf32>
    %14 = vector.shape_cast %13 : vector<1x128xf32> to vector<1x1x128xf32>
    %15 = vector.broadcast %12 : vector<8x128x1xf32> to vector<8x128x128xf32>
    %16 = vector.broadcast %14 : vector<1x1x128xf32> to vector<8x128x128xf32>
    %17 = arith.mulf %15, %16 : vector<8x128x128xf32>
    %18 = arith.addf %11, %17 : vector<8x128x128xf32>
    %19 = math.tanh %18 : vector<8x128x128xf32>
    %c0_8 = arith.constant 0 : index
    %c0_9 = arith.constant 0 : index
    %20 = vector.load %arg10[%c0_8, %c0_9] : memref<1x128xf32, #tpu.memory_space<vmem>>, vector<1x128xf32>
    %21 = vector.shape_cast %20 : vector<1x128xf32> to vector<1x1x128xf32>
    %22 = vector.broadcast %21 : vector<1x1x128xf32> to vector<8x1x128xf32>
    "tpu.trace_start"() <{level = 10 : i32, message = "bqd,btd->bqt"}> : () -> ()
    %cst = arith.constant dense<0.000000e+00> : vector<8x1x128xf32>
    %23 = tpu.matmul %22, %19, %cst {dimension_numbers = #tpu.dot_dimension_numbers<[2], [2], [1], [1], [0, 0, 0, 1, 1, 1], [0], [0]>} : vector<8x1x128xf32>, vector<8x128x128xf32>, vector<8x1x128xf32> -> vector<8x1x128xf32>
    "tpu.trace_stop"() : () -> ()
    %24 = vector.shape_cast %23 : vector<8x1x128xf32> to vector<8x128xf32>
    %c0_10 = arith.constant 0 : index
    %c0_11 = arith.constant 0 : index
    %25 = vector.load %arg5[%c0_10, %c0_11] : memref<8x128xf32, #tpu.memory_space<vmem>>, vector<8x128xf32>
    %cst_12 = arith.constant 5.000000e-01 : f32
    %26 = vector.broadcast %cst_12 : f32 to vector<8x128xf32>
    %27 = arith.cmpf ogt, %25, %26 : vector<8x128xf32>
    %cst_13 = arith.constant -1.000000e+30 : f32
    %28 = vector.broadcast %cst_13 : f32 to vector<8x128xf32>
    %29 = arith.select %27, %28, %24 : vector<8x128xi1>, vector<8x128xf32>
    %c0_14 = arith.constant 0 : index
    %30 = arith.index_cast %4 : i32 to index
    %31 = vector.load %arg12[%c0_14, %30] : memref<8x256xf32, #tpu.memory_space<vmem>>, vector<8x128xf32>
    tpu.vector_store %arg12[%c0_14, %30], %29 {strides = array<i32>} : memref<8x256xf32, #tpu.memory_space<vmem>>, vector<8x128xf32>,
    %c0_15 = arith.constant 0 : index
    %c0_16 = arith.constant 0 : index
    %32 = vector.load %arg15[%c0_15, %c0_16] : memref<8x1xf32, #tpu.memory_space<vmem>>, vector<8x1xf32>
    %cst_17 = arith.constant dense<0xFF800000> : vector<8xf32>
    %33 = vector.multi_reduction <maximumf>, %29, %cst_17 [1] : vector<8x128xf32> to vector<8xf32>
    %34 = vector.shape_cast %33 : vector<8xf32> to vector<8x1xf32>
    %35 = arith.maximumf %32, %34 : vector<8x1xf32>
    %36 = arith.subf %32, %35 : vector<8x1xf32>
    %37 = math.exp %36 : vector<8x1xf32>
    %38 = vector.broadcast %35 : vector<8x1xf32> to vector<8x128xf32>
    %39 = arith.subf %29, %38 : vector<8x128xf32>
    %40 = math.exp %39 : vector<8x128xf32>
    %c0_18 = arith.constant 0 : index
    %c0_19 = arith.constant 0 : index
    %41 = vector.load %arg16[%c0_18, %c0_19] : memref<8x1xf32, #tpu.memory_space<vmem>>, vector<8x1xf32>
    %42 = arith.mulf %37, %41 : vector<8x1xf32>
    %cst_20 = arith.constant dense<0.000000e+00> : vector<8xf32>
    %43 = vector.multi_reduction <add>, %40, %cst_20 [1] : vector<8x128xf32> to vector<8xf32>
    %44 = vector.shape_cast %43 : vector<8xf32> to vector<8x1xf32>
    %45 = arith.addf %42, %44 : vector<8x1xf32>
    %c0_21 = arith.constant 0 : index
    %c0_22 = arith.constant 0 : index
    %46 = vector.load %arg16[%c0_21, %c0_22] : memref<8x1xf32, #tpu.memory_space<vmem>>, vector<8x1xf32>
    tpu.vector_store %arg16[%c0_21, %c0_22], %45 {strides = array<i32>} : memref<8x1xf32, #tpu.memory_space<vmem>>, vector<8x1xf32>,
    %47 = vector.shape_cast %40 : vector<8x128xf32> to vector<8x1x128xf32>
    %c0_23 = arith.constant 0 : index
    %c0_24 = arith.constant 0 : index
    %c0_25 = arith.constant 0 : index
    %48 = vector.load %arg3[%c0_23, %c0_24, %c0_25] : memref<8x128x128xf32, #tpu.memory_space<vmem>>, vector<8x128x128xf32>
    "tpu.trace_start"() <{level = 10 : i32, message = "bqt,btd->bqd"}> : () -> ()
    %cst_26 = arith.constant dense<0.000000e+00> : vector<8x1x128xf32>
    %49 = tpu.matmul %47, %48, %cst_26 {dimension_numbers = #tpu.dot_dimension_numbers<[2], [1], [1], [2], [0, 0, 0, 1, 1, 2], [0], [0]>} : vector<8x1x128xf32>, vector<8x128x128xf32>, vector<8x1x128xf32> -> vector<8x1x128xf32>
    "tpu.trace_stop"() : () -> ()
    %50 = vector.shape_cast %49 : vector<8x1x128xf32> to vector<8x128xf32>
    %c0_27 = arith.constant 0 : index
    %c0_28 = arith.constant 0 : index
    %51 = vector.load %arg17[%c0_27, %c0_28] : memref<8x128xf32, #tpu.memory_space<vmem>>, vector<8x128xf32>
    %52 = vector.broadcast %37 : vector<8x1xf32> to vector<8x128xf32>
    %53 = arith.mulf %52, %51 : vector<8x128xf32>
    %54 = arith.addf %53, %50 : vector<8x128xf32>
    %c0_29 = arith.constant 0 : index
    %c0_30 = arith.constant 0 : index
    %55 = vector.load %arg17[%c0_29, %c0_30] : memref<8x128xf32, #tpu.memory_space<vmem>>, vector<8x128xf32>
    tpu.vector_store %arg17[%c0_29, %c0_30], %54 {strides = array<i32>} : memref<8x128xf32, #tpu.memory_space<vmem>>, vector<8x128xf32>,
    %c0_31 = arith.constant 0 : index
    %c0_32 = arith.constant 0 : index
    %56 = vector.load %arg15[%c0_31, %c0_32] : memref<8x1xf32, #tpu.memory_space<vmem>>, vector<8x1xf32>
    tpu.vector_store %arg15[%c0_31, %c0_32], %35 {strides = array<i32>} : memref<8x1xf32, #tpu.memory_space<vmem>>, vector<8x1xf32>,
    %c1_i32 = arith.constant 1 : i32
    %57 = arith.cmpi eq, %arg1, %c1_i32 : i32
    %58 = arith.extui %57 : i1 to i32
    %c0_i32_33 = arith.constant 0 : i32
    %59 = arith.cmpi ne, %58, %c0_i32_33 : i32
    scf.if %59 {
      %c0_34 = arith.constant 0 : index
      %c0_35 = arith.constant 0 : index
      %60 = vector.load %arg16[%c0_34, %c0_35] : memref<8x1xf32, #tpu.memory_space<vmem>>, vector<8x1xf32>
      %cst_36 = arith.constant 1.000000e+00 : f32
      %61 = vector.broadcast %cst_36 : f32 to vector<8x1xf32>
      %62 = arith.divf %61, %60 : vector<8x1xf32>
      %c0_37 = arith.constant 0 : index
      %c0_38 = arith.constant 0 : index
      %63 = vector.load %arg17[%c0_37, %c0_38] : memref<8x128xf32, #tpu.memory_space<vmem>>, vector<8x128xf32>
      %64 = vector.broadcast %62 : vector<8x1xf32> to vector<8x128xf32>
      %65 = arith.mulf %63, %64 : vector<8x128xf32>
      %c0_39 = arith.constant 0 : index
      %c0_40 = arith.constant 0 : index
      %66 = vector.load %arg11[%c0_39, %c0_40] : memref<8x128xf32, #tpu.memory_space<vmem>>, vector<8x128xf32>
      tpu.vector_store %arg11[%c0_39, %c0_40], %65 {strides = array<i32>} : memref<8x128xf32, #tpu.memory_space<vmem>>, vector<8x128xf32>,
      %c0_41 = arith.constant 0 : index
      %c0_42 = arith.constant 0 : index
      %67 = vector.load %arg12[%c0_41, %c0_42] : memref<8x256xf32, #tpu.memory_space<vmem>>, vector<8x256xf32>
      %c0_43 = arith.constant 0 : index
      %c0_44 = arith.constant 0 : index
      %68 = vector.load %arg15[%c0_43, %c0_44] : memref<8x1xf32, #tpu.memory_space<vmem>>, vector<8x1xf32>
      %69 = vector.broadcast %68 : vector<8x1xf32> to vector<8x256xf32>
      %70 = arith.subf %67, %69 : vector<8x256xf32>
      %71 = math.exp %70 : vector<8x256xf32>
      %72 = vector.broadcast %62 : vector<8x1xf32> to vector<8x256xf32>
      %73 = arith.mulf %71, %72 : vector<8x256xf32>
      %c0_45 = arith.constant 0 : index
      %c0_46 = arith.constant 0 : index
      %74 = vector.load %arg12[%c0_45, %c0_46] : memref<8x256xf32, #tpu.memory_space<vmem>>, vector<8x256xf32>
      tpu.vector_store %arg12[%c0_45, %c0_46], %73 {strides = array<i32>} : memref<8x256xf32, #tpu.memory_space<vmem>>, vector<8x256xf32>,
      %c0_47 = arith.constant 0 : index
      %c0_48 = arith.constant 0 : index
      %75 = vector.load %arg6[%c0_47, %c0_48] : memref<8x256xf32, #tpu.memory_space<vmem>>, vector<8x256xf32>
      %76 = arith.addf %75, %73 : vector<8x256xf32>
      %c0_49 = arith.constant 0 : index
      %c0_50 = arith.constant 0 : index
      %77 = vector.load %arg13[%c0_49, %c0_50] : memref<8x256xf32, #tpu.memory_space<vmem>>, vector<8x256xf32>
      tpu.vector_store %arg13[%c0_49, %c0_50], %76 {strides = array<i32>} : memref<8x256xf32, #tpu.memory_space<vmem>>, vector<8x256xf32>,
    } else {
    }
    return
  }
  func.func @transform_0(%arg0: i32, %arg1: i32) -> (i32, i32) {
    %c0_i32 = arith.constant 0 : i32
    %c0_i32_0 = arith.constant 0 : i32
    return %arg0, %c0_i32 : i32, i32
  }
  func.func @transform_1(%arg0: i32, %arg1: i32) -> (i32, i32, i32) {
    %c0_i32 = arith.constant 0 : i32
    %c0_i32_0 = arith.constant 0 : i32
    return %arg0, %arg1, %c0_i32 : i32, i32, i32
  }
  func.func @transform_2(%arg0: i32, %arg1: i32) -> (i32, i32, i32) {
    %c0_i32 = arith.constant 0 : i32
    %c0_i32_0 = arith.constant 0 : i32
    return %arg0, %arg1, %c0_i32 : i32, i32, i32
  }
  func.func @transform_3(%arg0: i32, %arg1: i32) -> (i32, i32) {
    %c0_i32 = arith.constant 0 : i32
    return %arg0, %arg1 : i32, i32
  }
  func.func @transform_4(%arg0: i32, %arg1: i32) -> (i32, i32) {
    %c0_i32 = arith.constant 0 : i32
    %c0_i32_0 = arith.constant 0 : i32
    return %arg0, %c0_i32 : i32, i32
  }
  func.func @transform_5(%arg0: i32, %arg1: i32) -> (i32, i32) {
    %c0_i32 = arith.constant 0 : i32
    %c0_i32_0 = arith.constant 0 : i32
    %c0_i32_1 = arith.constant 0 : i32
    return %c0_i32, %c0_i32_0 : i32, i32
  }
  func.func @transform_6(%arg0: i32, %arg1: i32) -> (i32, i32) {
    %c0_i32 = arith.constant 0 : i32
    %c0_i32_0 = arith.constant 0 : i32
    %c0_i32_1 = arith.constant 0 : i32
    return %c0_i32, %c0_i32_0 : i32, i32
  }
  func.func @transform_7(%arg0: i32, %arg1: i32) -> (i32, i32) {
    %c0_i32 = arith.constant 0 : i32
    %c0_i32_0 = arith.constant 0 : i32
    %c0_i32_1 = arith.constant 0 : i32
    return %c0_i32, %c0_i32_0 : i32, i32
  }
  func.func @transform_8(%arg0: i32, %arg1: i32) -> (i32, i32) {
    %c0_i32 = arith.constant 0 : i32
    %c0_i32_0 = arith.constant 0 : i32
    %c0_i32_1 = arith.constant 0 : i32
    return %c0_i32, %c0_i32_0 : i32, i32
  }
  func.func @transform_9(%arg0: i32, %arg1: i32) -> (i32, i32) {
    %c0_i32 = arith.constant 0 : i32
    %c0_i32_0 = arith.constant 0 : i32
    return %arg0, %c0_i32 : i32, i32
  }
  func.func @transform_10(%arg0: i32, %arg1: i32) -> (i32, i32) {
    %c0_i32 = arith.constant 0 : i32
    %c0_i32_0 = arith.constant 0 : i32
    return %arg0, %c0_i32 : i32, i32
  }
  func.func @transform_11(%arg0: i32, %arg1: i32) -> (i32, i32) {
    %c0_i32 = arith.constant 0 : i32
    %c0_i32_0 = arith.constant 0 : i32
    return %arg0, %c0_i32 : i32, i32
  }
}

</mosaic_0001>

<bundles_post_ra>
// kernel: tpu_custom_call.1
= control target key start
LH: loop header
LB: loop body
LE: loop exit
PB: predicated region body
PF: predicated region fallthrough
CT: control target
= control target key end

     0   :  { %s7258_s0 = inlined_call_operand.hbm [shape: f32[16,256], index: 0, kind: input, shape index: {}]   ;;  %s7259_s1 = inlined_call_operand.hbm [shape: f32[16,256,128], index: 1, kind: input, shape index: {}]   ;;  %s7260_s2 = inlined_call_operand.hbm [shape: f32[16,256,128], index: 2, kind: input, shape index: {}]   ;;  %s7261_s3 = inlined_call_operand.hbm [shape: f32[16,256], index: 3, kind: input, shape index: {}]   ;;  %s7262_s4 = inlined_call_operand.hbm [shape: f32[16,256], index: 4, kind: input, shape index: {}]   ;;  %s7263_s5 = inlined_call_operand.hbm [shape: f32[256,128], index: 5, kind: input, shape index: {}]   ;;  %s7264_s6 = inlined_call_operand.hbm [shape: f32[1,128], index: 6, kind: input, shape index: {}]   ;;  %s7265_s7 = inlined_call_operand.hbm [shape: f32[1,128], index: 7, kind: input, shape index: {}]   ;;  %s7266_s8 = inlined_call_operand.hbm [shape: f32[1,128], index: 8, kind: input, shape index: {}]   ;;  %s7267_s9 = inlined_call_operand.hbm [shape: f32[16,128], index: 9, kind: output, shape index: {0}]   ;;  %s7268_s10 = inlined_call_operand.hbm [shape: f32[16,256], index: 10, kind: output, shape index: {1}]   ;;  %s7269_s11 = inlined_call_operand.hbm [shape: f32[16,256], index: 11, kind: output, shape index: {2}]  }
   0x1   :  { %7294 = sst [smem:[#allocation52_spill]] %s7258_s0 }
   0x2   :  { %7295 = sst [smem:[#allocation53_spill]] %s7259_s1 }
   0x3   :  { %7296 = sst [smem:[#allocation54_spill]] %s7263_s5 }
   0x4   :  { %7297 = sst [smem:[#allocation55_spill]] %s7264_s6 }
   0x5   :  { %7298 = sst [smem:[#allocation56_spill]] %s7265_s7 }
   0x6   :  { %7299 = sst [smem:[#allocation57_spill]] %s7266_s8 }
   0x7   :  { %7300 = sst [smem:[#allocation58_spill]] %s7267_s9 }
   0x8   :  { %7301 = sst [smem:[#allocation59_spill]] %s7268_s10 }
   0x9   :  { %7302 = sst [smem:[#allocation60_spill]] %s7269_s11 }
   0xa   :  { %17 = vsyncpa [#allocation7], 0 }
   0xb   :  { %19 = vsyncpa [#allocation7 + $0x1], 0 }
   0xc   :  { %20 = vsyncpa [#allocation10], 0 }
   0xd   :  { %22 = vsyncpa [#allocation10 + $0x1], 0 }
   0xe   :  { %23 = vsyncpa [#allocation13], 0 }
   0xf   :  { %25 = vsyncpa [#allocation13 + $0x1], 0 }
  0x10   :  { %26 = vsyncpa [#allocation16], 0 }
  0x11   :  { %27 = vsyncpa [#allocation19], 0 }
  0x12   :  { %28 = vsyncpa [#allocation8], 0 }
  0x13   :  { %30 = vsyncpa [#allocation8 + $0x1], 0 }
  0x14   :  { %31 = vsyncpa [#allocation23], 0 }
  0x15   :  { %33 = vsyncpa [#allocation23 + $0x1], 0  ;;  %s5740_s17 = smov 0   ;;  %s5742_s18 = smov 0  }
  0x16   :  { %s5744_s19 = smov 0   ;;  %s5746_s20 = smov 0  }
  0x17   :  { %s5748_s21 = smov 0   ;;  %s5750_s22 = smov 0  }
  0x18   :  { %s5752_s23 = smov 0   ;;  %s5754_s24 = smov 0  }
  0x19   :  { %s5756_s25 = smov 0   ;;  %s5758_s26 = smov 0  }
  0x1a   :  { %s5760_s27 = smov 0  }
  0x1b LB: > { %7303 = sst [smem:[#allocation39_spill]] %s5611_s18  ;;  %s5796_s28 = sadd.s32 4294967295, %s5647_s27   ;;  %s5647_s27 = sphi %s5760_s27, %s39_s27   ;;  %s5643_s26 = sphi %s5758_s26, %s7370_s26   ;;  %s5639_s25 = sphi %s5756_s25, %s7369_s25   ;;  %s5635_s24 = sphi %s5754_s24, %s7368_s24   ;;  %s5631_s23 = sphi %s5752_s23, %s7367_s23   ;;  %s5627_s22 = sphi %s5750_s22, %s7360_s22   ;;  %s5623_s21 = sphi %s5748_s21, %s7366_s21   ;;  %s5619_s20 = sphi %s5746_s20, %s7365_s20   ;;  %s5615_s19 = sphi %s5744_s19, %s7364_s19   ;;  %s5611_s18 = sphi %s5742_s18, %s7363_s18   ;;  %s5607_s17 = sphi %s5740_s17, %s7357_s17  }
  0x1c   : > { %7304 = sst [smem:[#allocation40_spill]] %s5619_s20  ;;  %s48_s30 = sadd.s32 1, %s5639_s25 }
  0x1d   : > { %7305 = sst [smem:[#allocation41_spill]] %s5627_s22  ;;  %s51_s12 = sadd.s32 1, %s5643_s26 }
  0x1e   : > { %7306 = sst [smem:[#allocation42_spill]] %s5631_s23  ;;  %p49_p0 = scmp.ge.s32.totalorder %s48_s30, 2 }
  0x1f   : > { %7307 = sst [smem:[#allocation43_spill]] %s5635_s24  ;;  %s58_s13 = sadd.s32 1, %s5627_s22 }
  0x20   : > { %7308 = sst [smem:[#allocation44_spill]] %s5796_s28  ;;  %p65_p1 = scmp.ne.s32.totalorder %s5627_s22, %s5623_s21 }
  0x21   : > { %p66_p2 = scmp.eq.s32.totalorder %s5647_s27, 0  ;;  %s7372_s30 = smov (%p49_p0, %s48_s30), 0 }
  0x22   : > { %7309 = sst [smem:[#allocation45_spill]] %s7372_s30  ;;  %s7374_s12 = smov (!%p49_p0, %s51_s12), %s5643_s26 }
  0x23   : > { %p5813_p3 = por %p66_p2, %p65_p1  ;;  %p7276_p4 = scmp.ne.s32.totalorder %s5623_s21, %s5619_s20 }
  0x24   : > { %p53_p5 = scmp.ge.s32.totalorder %s7374_s12, 2  ;;  %p7281_p6 = scmp.eq.s32.totalorder %s5796_s28, 0 }
  0x25   : > { %s82_s15 = ssub.s32 %s5639_s25, %s7372_s30  ;;  %s86_s16 = sadd.s32 1, %s5615_s19 }
  0x26   : > { %s7376_s12 = smov (%p53_p5, %s7374_s12), 0  ;;  %p5830_p7 = por %p7281_p6, %p7276_p4 }
  0x27   : > { %7311 = sst [smem:[#allocation46_spill]] %s7376_s12  ;;  %p93_p8 = scmp.ne.s32.totalorder %s5615_s19, %s5611_s18 }
  0x28   : > { %s7312_s29 = scalar_select %p5830_p7, 1, 0 }
  0x29   : > { %s55_s11 = ssub.s32 %s5643_s26, %s7376_s12  ;;  %p99_p9 = scmp.ne.s32.totalorder %s5611_s18, %s5607_s17 }
  0x2a   : > { %p56_p10 = scmp.eq.s32.totalorder %s55_s11, 0  ;;  %s83_s30 = sor.u32 %s82_s15, %s55_s11 }
  0x2b   : > { %p84_p11 = scmp.eq.s32.totalorder %s83_s30, 0  ;;  %p5842_p12 = por %p93_p8, %p66_p2 }
  0x2c   : > { %s5847_s10 = scalar_select %p56_p10, %s5627_s22, %s58_s13  }
  0x2d   : > { %s5850_s24 = scalar_select %p84_p11, %s5615_s19, %s86_s16  }
  0x2e   : > { %7314 = sst [smem:[#allocation47_spill]] %s5847_s10  ;;  %p5854_p13 = por %p99_p9, %p7281_p6 }
  0x2f   : > { %7315 = sst [smem:[#allocation48_spill]] %s5850_s24  ;;  %p289_p0 = scmp.eq.s32.totalorder %s5796_s28, 3 }
  0x30   : > { %s7316_s23 = scalar_select %p5854_p13, 1, 0 }
  0x31   : > { %s7318_s17 = sadd.s32 4294967294, %s5647_s27   ;;  %p3871_p4 = scmp.ge.s32.totalorder %s5647_s27, 1 }
  0x32   : > { %7317 = sst [smem:[#allocation49_spill]] %s7316_s23  ;;  %p295_p5 = scmp.eq.s32.totalorder %s7318_s17, 3 }
  0x33   : > { %p5865_p7 = por %p289_p0, %p65_p1  ;;  %p354_p2 = scmp.lt.s32.totalorder %s5647_s27, 5 }
  0x34   : > { %p7321_p8 = scmp.ne.s32.totalorder %s5623_s21, %s5619_s20  ;;  %s5649_s15 = smov [#allocation15]  }
  0x35   : > { %s7319_s11 = scalar_select %p5865_p7, 1, 0 }
  0x36   : > { %p5873_p10 = por %p295_p5, %p7321_p8  ;;  %p5877_p11 = pnand %p3871_p4, %p354_p2 }
  0x37   : > { %7320 = sst [smem:[#allocation50_spill]] %s7319_s11  ;;  %s366_s16 = sshll.u32 %s5649_s15, 4  ;;  %s367_s16 = int_to_ptr.vmem [resolvable:$true] %s366_s16 }
  0x38   : > { %s7322_s30 = scalar_select %p5873_p10, 1, 0 }
  0x39   : > { %s7324_s13 = scalar_select %p5877_p11, 1, 0 }
  0x3a   : > { %7323 = sst [smem:[#allocation51_spill]] %s7322_s30  ;;  %p4849_p9 = pneg %p5877_p11 }
  0x3b   : > { %s5650_s12 = smov [#allocation18]   ;;  %s5651_s24 = smov [#allocation17]  }
  0x3c   : > { %p5885_p1 = pnand %p4849_p9, %p7281_p6  ;;  %s391_s10 = sshll.u32 %s5650_s12, 4  ;;  %s392_s10 = int_to_ptr.vmem [resolvable:$true] %s391_s10 }
  0x3d   : > { %s380_s30 = sshll.u32 %s5651_s24, 4  ;;  %s5280_s20 = scalar_lea.vmem %s367_s16, 4096  ;;  %s381_s30 = int_to_ptr.vmem [resolvable:$true] %s380_s30 }
  0x3e   : > { %p5271_p4 = pneg %p5885_p1  ;;  %p5281_p0 = scmp.ne.s32.totalorder %s367_s16, %s5280_s20 }
  0x3f   : > { %p5288_p8 = scmp.lt.s32.totalorder %s367_s16, %s367_s16  ;;  %p5289_p9 = scmp.lt.s32.totalorder %s5280_s20, %s5280_s20 }
  0x40   : > { %p5283_p5 = pnand %p5281_p0, %p5271_p4 }
  0x41   : > { %p5290_p6 = por %p5289_p9, %p5288_p8 }
  0x42   : > { %p5284_p2 = pneg %p5283_p5 }
  0x44   : > { %p5291_p10 = pnand %p5290_p6, %p5284_p2 }
  0x46   : > { %5294 = shalt.err (!%p5291_p10)
}
  0x47   : > { %s5652_s15 = smov 128   ;;  %s5653_s12 = smov 8  }
  0x48   : > { %s7326_s5 = sld [smem:[#allocation54_spill]]  ;;  %s5306_s23 = scalar_lea.vmem %s392_s10, 16 }
  0x49   : > { %p5307_p7 = scmp.ne.s32.totalorder %s392_s10, %s5306_s23  ;;  %s5313_s18 = scalar_lea.vmem %s392_s10, 32 }
  0x4a   : > { %p5314_p13 = scmp.lt.s32.totalorder %s392_s10, %s392_s10  ;;  %p5315_p8 = scmp.lt.s32.totalorder %s5313_s18, %s5306_s23 }
  0x4b   : > { %p5309_p0 = pnand %p5307_p7, %p5271_p4 }
  0x4c   : > { %p5316_p6 = por %p5315_p8, %p5314_p13 }
  0x4d   : > { %p5310_p5 = pneg %p5309_p0 }
  0x4e   : > { %4852 = dma.hbm_to_vmem [thread:$0]  (!%p5885_p1), %s7326_s5, 4096, %s367_s16, [#allocation16], %s5652_s15, %s5652_s15, %s5653_s12  }
  0x4f   : > { %p5317_p10 = pnand %p5316_p6, %p5310_p5 }
  0x51   : > { %5320 = shalt.err (!%p5317_p10)
}
  0x52   : > { %s7327_s7 = sld [smem:[#allocation56_spill]]  ;;  %s5332_s11 = scalar_lea.vmem %s381_s30, 16 }
  0x53   : > { %p5333_p2 = scmp.ne.s32.totalorder %s381_s30, %s5332_s11  ;;  %s5339_s16 = scalar_lea.vmem %s381_s30, 32 }
  0x54   : > { %p5340_p0 = scmp.lt.s32.totalorder %s381_s30, %s381_s30  ;;  %p5341_p11 = scmp.lt.s32.totalorder %s5339_s16, %s5332_s11 }
  0x55   : > { %p5335_p7 = pnand %p5333_p2, %p5271_p4 }
  0x56   : > { %p5342_p13 = por %p5341_p11, %p5340_p0 }
  0x57   : > { %p5336_p9 = pneg %p5335_p7 }
  0x58   : > { %4858 = dma.hbm_to_vmem [thread:$0]  (!%p5885_p1), %s7327_s7, 16, %s392_s10, [#allocation19]  }
  0x59   : > { %p5343_p5 = pnand %p5342_p13, %p5336_p9 }
  0x5b   : > { %5346 = shalt.err (!%p5343_p5)
}
  0x5c   : > { %s7328_s6 = sld [smem:[#allocation55_spill]]  ;;  %s5654_s10 = smov [#allocation20]  }
  0x5d   : > { %s402_s28 = sshll.u32 %s5654_s10, 4  ;;  %s403_s28 = int_to_ptr.vmem [resolvable:$true] %s402_s28 }
  0x5e   : > { %s5358_s15 = scalar_lea.vmem %s403_s28, 16  ;;  %s5365_s12 = scalar_lea.vmem %s403_s28, 32 }
  0x5f   : > { %p5359_p8 = scmp.ne.s32.totalorder %s403_s28, %s5358_s15  ;;  %p5366_p11 = scmp.lt.s32.totalorder %s403_s28, %s403_s28 }
  0x60   : > { %p5367_p2 = scmp.lt.s32.totalorder %s5365_s12, %s5358_s15 }
  0x61   : > { %p5361_p6 = pnand %p5359_p8, %p5271_p4 }
  0x62   : > { %4855 = dma.hbm_to_vmem [thread:$0]  (!%p5885_p1), %s7328_s6, 16, %s381_s30, [#allocation16]  }
  0x63   : > { %p5362_p10 = pneg %p5361_p6  ;;  %p5368_p7 = por %p5367_p2, %p5366_p11 }
  0x65   : > { %p5369_p9 = pnand %p5368_p7, %p5362_p10 }
  0x67   : > { %5372 = shalt.err (!%p5369_p9)
}
  0x68   : > { %s7329_s8 = sld [smem:[#allocation57_spill]]  ;;  %p3876_p0 = scmp.ge.s32.totalorder %s5647_s27, 4 }
  0x69   : > { %s413_s30 = sand.u32 (!%p3876_p0), 1, %s5627_s22   ;;  %s5926_s11 = sshll.u32 (!%p3876_p0), %s5643_s26, 8 }
  0x6a   : > { %409 = sbr.rel (%p3876_p0) target bundleno = 180 (0xb4), region = 32  ;;  %s5928_s16 = sshll.u32 (!%p3876_p0), %s413_s30, 4 }
  0x6b   : > { %s7330_s0 = sld [smem:[#allocation52_spill]] (!%p3876_p0)  ;;  %s417_s10 = scalar_lea.vmem (!%p3876_p0), [#allocation6], %s5928_s16 }
  0x6c   : > { %s425_s15 = sshll.u32 (!%p3876_p0), %s417_s10, 4  ;;  %s5655_s24 = smov (!%p3876_p0), [#allocation6]   ;;  %s426_s15 = int_to_ptr.vmem [resolvable:$true] %s425_s15 }
  0x6d   : > { %s5385_s12 = scalar_lea.vmem (!%p3876_p0), %s426_s15, 256  ;;  %s5389_s20 = sshll.u32 (!%p3876_p0), %s5655_s24, 4  ;;  %s5390_s20 = int_to_ptr.vmem [resolvable:$false] %s5389_s20 }
  0x6e   : > { %4861 = dma.hbm_to_vmem [thread:$0]  (!%p5885_p1), %s7329_s8, 16, %s403_s28, [#allocation19]  }
  0x6f   : > { %s414_s28 = scalar_lea.sflag [#allocation7], %s413_s30  ;;  %p5386_p1 = scmp.ne.s32.totalorder %s426_s15, %s5385_s12 }
  0x70   : > { %s5391_s5 = scalar_lea.vmem %s5390_s20, 512  ;;  %p5392_p5 = scmp.lt.s32.totalorder %s426_s15, %s5390_s20 }
  0x71   : > { %s423_s17 = scalar_lea.hbm %s7330_s0, %s5926_s11  ;;  %p5387_p4 = pnand %p5386_p1, %p5813_p3 }
  0x72   : > { %p5393_p8 = scmp.lt.s32.totalorder %s5391_s5, %s5385_s12 }
  0x73   : > { %p5388_p13 = pneg %p5387_p4 }
  0x74   : > { %p5394_p6 = por %p5393_p8, %p5392_p5 }
  0x76   : > { %p5395_p10 = pnand %p5394_p6, %p5388_p13 }
  0x78   : > { %5398 = shalt.err (!%p5395_p10)
}
  0x79   : > { %4811 = dma.hbm_to_vmem [thread:$0]  (%p5813_p3), %s423_s17, 256, %s426_s15, %s414_s28  }
  0x7a   : > { %s7292_s30 = sand.u32 1, %s5615_s19   ;;  %s3882_s5 = sshll.u32 %s5639_s25, 4 }
  0x7b   : > { %s5943_s23 = sshll.u32 %s7292_s30, 10  ;;  %s443_s10 = sadd.s32 %s5926_s11, %s3882_s5 }
  0x7c   : > { %s436_s17 = scalar_lea.vmem [#allocation9], %s5943_s23  ;;  %s3884_s28 = sshll.u32 %s443_s10, 7 }
  0x7d   : > { %s458_s15 = sshll.u32 %s436_s17, 4  ;;  %s5656_s24 = smov 4096   ;;  %s459_s15 = int_to_ptr.vmem [resolvable:$true] %s458_s15 }
  0x7e   : > { %s4812_s12 = scalar_select %p5842_p12, [#allocation0], [#allocation29] }
  0x7f   : > { %4813 = sst [smem:[#allocation26]] (%p5842_p12), %s5656_s24  ;;  %s5657_s18 = smov 2048  }
  0x80   : > { %s450_s20 = sld [smem:[%s4812_s12]]   ;;  %s5658_s30 = smov 16  }
  0x81   : > { %4814 = sst [smem:[#allocation26 + $0x1]] (%p5842_p12), %s5657_s18  ;;  %s5659_s5 = smov 128  }
  0x82   : > { %4815 = sst [smem:[#allocation26 + $0x2]] (%p5842_p12), %s5658_s30  ;;  %s5660_s6 = smov 8  }
  0x83   : > { %4816 = sst [smem:[#allocation26 + $0x3]] (%p5842_p12), %s5659_s5  ;;  %s7332_s7 = sand.u32 1, %s5647_s27  }
  0x84   : > { %s7331_s1 = sld [smem:[#allocation53_spill]]  ;;  %s433_s18 = scalar_lea.sflag [#allocation10], %s7332_s7 }
  0x85   : > { %4817 = sst [smem:[#allocation26 + $0x4]] (%p5842_p12), %s5659_s5  ;;  %s5661_s8 = smov 131072  }
  0x86   : > { %4818 = sst [smem:[#allocation26 + $0x5]] (%p5842_p12), %s5660_s6  ;;  %s3885_s12 = sshll.u32 %s450_s20, 26 }
  0x87   : > { %s3886_s24 = sadd.s32 134217728, %s3885_s12 }
  0x8a   : > { %s445_s0 = scalar_lea.hbm %s7331_s1, %s3884_s28 }
  0x8b   : > { %4819 = dma.general (%p5842_p12), %s445_s0, 16384, %s459_s15, %s433_s18, %s5661_s8, [#allocation26], %s3886_s24, 0  }
  0x8c   : > { %s494_s5 = scalar_lea.hbm %s7260_s2, %s3884_s28  ;;  %s485_s20 = scalar_lea.vmem [#allocation11], %s5943_s23 }
  0x8d   : > { %s4820_s6 = scalar_select %p5842_p12, [#allocation0], [#allocation30] }
  0x8e   : > { %s507_s17 = sshll.u32 %s485_s20, 4  ;;  %s5662_s0 = smov 4096   ;;  %s508_s17 = int_to_ptr.vmem [resolvable:$true] %s507_s17 }
  0x8f   : > { %s499_s7 = sld [smem:[%s4820_s6]]   ;;  %s5663_s8 = smov 2048  }
  0x90   : > { %4821 = sst [smem:[#allocation28]] (%p5842_p12), %s5662_s0  ;;  %s5664_s22 = smov 16  }
  0x91   : > { %4822 = sst [smem:[#allocation28 + $0x1]] (%p5842_p12), %s5663_s8  ;;  %s5665_s15 = smov 128  }
  0x92   : > { %4823 = sst [smem:[#allocation28 + $0x2]] (%p5842_p12), %s5664_s22  ;;  %s5666_s23 = smov 8  }
  0x93   : > { %4824 = sst [smem:[#allocation28 + $0x3]] (%p5842_p12), %s5665_s15  ;;  %s5667_s12 = smov 131072  }
  0x94   : > { %4825 = sst [smem:[#allocation28 + $0x4]] (%p5842_p12), %s5665_s15  ;;  %s7333_s24 = sand.u32 1, %s5615_s19  }
  0x95   : > { %s3892_s28 = sshll.u32 %s499_s7, 26  ;;  %4826 = sst [smem:[#allocation28 + $0x5]] (%p5842_p12), %s5666_s23 }
  0x96   : > { %s3893_s10 = sadd.s32 134217728, %s3892_s28  ;;  %s3894_s30 = sshll.u32 %s7333_s24, 3 }
  0x97   : > { %4827 = dma.general (%p5842_p12), %s494_s5, 16384, %s508_s17, %s433_s18, %s5667_s12, [#allocation28], %s3893_s10, 0  }
  0x98   : > { %s3895_s6 = sshll.u32 %s5643_s26, 1  ;;  %s534_s0 = scalar_lea.vmem [#allocation12], %s3894_s30 }
  0x99   : > { %s539_s20 = sadd.s32 %s5639_s25, %s3895_s6  ;;  %s543_s8 = sshll.u32 %s534_s0, 4  ;;  %s544_s8 = int_to_ptr.vmem [resolvable:$true] %s543_s8 }
  0x9a   : > { %s3896_s22 = sshll.u32 %s539_s20, 7  ;;  %s7334_s23 = sand.u32 1, %s5647_s27  }
  0x9b   : > { %s541_s28 = scalar_lea.hbm %s7261_s3, %s3896_s22  ;;  %s5998_s1 = scalar_lea.sflag [#allocation13], %s7334_s23 }
  0x9c   : > { %s5411_s18 = scalar_lea.vmem %s544_s8, 128  ;;  %s5668_s5 = smov [#allocation12]  }
  0x9d   : > { %p5412_p11 = scmp.ne.s32.totalorder %s544_s8, %s5411_s18  ;;  %s5415_s17 = sshll.u32 %s5668_s5, 4  ;;  %s5416_s17 = int_to_ptr.vmem [resolvable:$false] %s5415_s17 }
  0x9e   : > { %s5417_s10 = scalar_lea.vmem %s5416_s17, 256  ;;  %p5418_p9 = scmp.lt.s32.totalorder %s544_s8, %s5416_s17 }
  0x9f   : > { %p5413_p2 = pnand %p5412_p11, %p5842_p12  ;;  %p5419_p0 = scmp.lt.s32.totalorder %s5417_s10, %s5411_s18 }
  0xa1   : > { %p5414_p7 = pneg %p5413_p2  ;;  %p5420_p1 = por %p5419_p0, %p5418_p9 }
  0xa3   : > { %p5421_p4 = pnand %p5420_p1, %p5414_p7 }
  0xa5   : > { %5424 = shalt.err (!%p5421_p4)
}
  0xa6   : > { %4828 = dma.hbm_to_vmem [thread:$0]  (%p5842_p12), %s541_s28, 128, %s544_s8, %s5998_s1  }
  0xa7   : > { %s560_s30 = scalar_lea.hbm %s7262_s4, %s5926_s11  ;;  %s554_s6 = scalar_lea.vmem [#allocation14], %s5928_s16 }
  0xa8   : > { %s562_s20 = sshll.u32 %s554_s6, 4  ;;  %s5669_s22 = smov [#allocation14]   ;;  %s563_s20 = int_to_ptr.vmem [resolvable:$true] %s562_s20 }
  0xa9   : > { %s5437_s0 = scalar_lea.vmem %s563_s20, 256  ;;  %s5441_s7 = sshll.u32 %s5669_s22, 4  ;;  %s5442_s7 = int_to_ptr.vmem [resolvable:$false] %s5441_s7 }
  0xaa   : > { %p5438_p13 = scmp.ne.s32.totalorder %s563_s20, %s5437_s0  ;;  %s5443_s9 = scalar_lea.vmem %s5442_s7, 512 }
  0xab   : > { %p5444_p6 = scmp.lt.s32.totalorder %s563_s20, %s5442_s7  ;;  %p5445_p10 = scmp.lt.s32.totalorder %s5443_s9, %s5437_s0 }
  0xac   : > { %p5439_p5 = pnand %p5438_p13, %p5813_p3 }
  0xad   : > { %p5446_p11 = por %p5445_p10, %p5444_p6 }
  0xae   : > { %p5440_p8 = pneg %p5439_p5 }
  0xb0   : > { %p5447_p12 = pnand %p5446_p11, %p5440_p8 }
  0xb2   : > { %5450 = shalt.err (!%p5447_p12)
}
  0xb3   : > { %4829 = dma.hbm_to_vmem [thread:$0]  (%p5813_p3), %s560_s30, 256, %s563_s20, %s5998_s1  }
  0xb4 PF: > { %p7335_p2 = scmp.ne.s32.totalorder %s7324_s13, 0 }
  0xb5   : > { %s6018_s11 = sand.u32 (!%p7335_p2), 1, %s5623_s21   ;;  %p7336_p7 = scmp.ne.s32.totalorder (!%p7335_p2), %s7312_s29, 0 }
  0xb6   : > { %571 = sbr.rel (%p7335_p2) target bundleno = 1872 (0x750), region = 56  ;;  %s6021_s16 = sshll.u32 (!%p7335_p2), %s6018_s11, 4 }
  0xb7   : > { %s574_s8 = scalar_lea.sflag (!%p7335_p2), [#allocation7], %s6018_s11  ;;  %s577_s15 = scalar_lea.vmem (!%p7335_p2), [#allocation6], %s6021_s16 }
  0xbb   : > { %5574 = dma.done.wait (%p7336_p7), %s574_s8, 256  }
  0xbc   : > { %5576 = vsyncadd (%p7336_p7), %s574_s8, 4294967040  ;;  %s7337_s1 = sld [smem:[#allocation44_spill]] }
  0xbd   : > { %s7338_s14 = sld [smem:[#allocation39_spill]] }
  0xbe   : > { %s7339_s13 = sld [smem:[#allocation49_spill]] }
  0xc2   : > { %s6030_s28 = sand.u32 1, %s7337_s1  }
  0xc3   : > { %s584_s23 = sand.u32 1, %s7338_s14   ;;  %s583_s5 = scalar_lea.sflag [#allocation10], %s6030_s28 }
  0xc4   : > { %s3902_s18 = sshll.u32 %s584_s23, 10  ;;  %p7340_p3 = scmp.ne.s32.totalorder %s7339_s13, 0 }
  0xc5   : > { %s6034_s17 = scalar_lea.vmem [#allocation9], %s3902_s18 }
  0xc6   : > { %5578 = dma.done.wait (%p7340_p3), %s583_s5, 32768  }
  0xc7   : > { %5580 = vsyncadd (%p7340_p3), %s583_s5, 4294934528  ;;  %s6040_s10 = sshll.u32 %s584_s23, 3  ;;  %s6042_s12 = scalar_lea.vmem [#allocation11], %s3902_s18 }
  0xc8   : > { %s601_s24 = scalar_lea.sflag [#allocation13], %s6030_s28  ;;  %s604_s30 = scalar_lea.vmem [#allocation12], %s6040_s10 }
  0xc9   : > { %5582 = dma.done.wait (%p7340_p3), %s601_s24, 128  }
  0xca   : > { %5584 = vsyncadd (%p7340_p3), %s601_s24, 4294967168  ;;  %s6051_s6 = scalar_lea.vmem [#allocation14], %s6021_s16 }
  0xcb   : > { %5586 = dma.done.wait (%p7336_p7), %s601_s24, 256  }
  0xcc   : > { %5588 = vsyncadd (%p7336_p7), %s601_s24, 4294967040  ;;  %p7341_p9 = scmp.eq.s32.totalorder %s7337_s1, 0 }
  0xce   : > { %5590 = dma.done.wait (%p7341_p9), [#allocation16], 4112   ;;  %p7342_p0 = pmov %p7341_p9 }
  0xd0   : > { %5592 = vsyncadd (%p7342_p0), [#allocation16], 4294963184  ;;  %p7343_p1 = pmov %p7342_p0 }
  0xd1   : > { %p7344_p4 = pmov %p7342_p0 }
  0xd2   : > { %5594 = dma.done.wait (%p7343_p1), [#allocation19], 32  }
  0xd3   : > { %5596 = vsyncadd (%p7344_p4), [#allocation19], 4294967264  ;;  %s3910_s20 = sshll.u32 %s6018_s11, 3  ;;  %s6069_s29 = scalar_lea.vmem [#allocation22], %s6021_s16 }
  0xd4   : > { %s6066_s0 = scalar_lea.vmem [#allocation21], %s3910_s20  ;;  %s6072_s22 = scalar_lea.vmem [#allocation24], %s6021_s16 }
  0xd5   : > { %s7345_s7 = sld [smem:[#allocation42_spill]] }
  0xdb   : > { %p3913_p13 = scmp.ne.s32.totalorder %s7345_s7, 0 }
  0xdd   : > { %705 = sbr.rel (%p3913_p13) target bundleno = 459 (0x1cb), region = 96 }
  0xe2   : > { %v739_v0 = vld [vmem:[#allocation15 + $0xf8] sm:$0xff]  ;;  %v738_v2 = vld [vmem:[#allocation15 + $0xf0] sm:$0xff]  ;;  %v737_v4 = vld [vmem:[#allocation15 + $0xe8] sm:$0xff]  ;;  %vm818_vm0 = vcmask 7168   ;;  %v5670_v34 = vmov -1e+30  }
  0xe3   : > { %v723_v1 = vld [vmem:[#allocation15 + $0x78] sm:$0xff]  ;;  %3936 = vmatprep.subr.mxu0 %v739_v0  ;;  %v722_v3 = vld [vmem:[#allocation15 + $0x70] sm:$0xff]  ;;  %v721_v5 = vld [vmem:[#allocation15 + $0x68] sm:$0xff]  ;;  %819 = vst.msk [vmem:[#allocation3] sm:$0xff] %vm818_vm0, %v5670_v34  ;;  %v5671_v35 = vmov 0.0  }
  0xe4   : > { %3937 = vmatpush3.msra.mxu0 %v723_v1  ;;  %v736_v6 = vld [vmem:[#allocation15 + $0xe0] sm:$0xff]  ;;  %v735_v8 = vld [vmem:[#allocation15 + $0xd8] sm:$0xff]  ;;  %v734_v10 = vld [vmem:[#allocation15 + $0xd0] sm:$0xff]  ;;  %820 = vst.msk [vmem:[#allocation4] sm:$0xff] %vm818_vm0, %v5671_v35 }
  0xe5   : > { %3938 = vmatprep.subr.mxu0 %v738_v2  ;;  %v720_v7 = vld [vmem:[#allocation15 + $0x60] sm:$0xff]  ;;  %v719_v9 = vld [vmem:[#allocation15 + $0x58] sm:$0xff]  ;;  %v718_v11 = vld [vmem:[#allocation15 + $0x50] sm:$0xff]  ;;  %821 = vst [vmem:[#allocation5] sm:$0xff] %v5671_v35 }
  0xe6   : > { %3939 = vmatpush3.msra.mxu0 %v722_v3  ;;  %v733_v12 = vld [vmem:[#allocation15 + $0xc8] sm:$0xff]  ;;  %v732_v15 = vld [vmem:[#allocation15 + $0xc0] sm:$0xff]  ;;  %v731_v17 = vld [vmem:[#allocation15 + $0xb8] sm:$0xff] }
  0xe7   : > { %3940 = vmatprep.subr.mxu0 %v737_v4  ;;  %v707_v13 = vld [vmem:[%s577_s15 + $0x8] sm:$0xff]  ;;  %v716_v16 = vld [vmem:[#allocation15 + $0x40] sm:$0xff]  ;;  %v730_v19 = vld [vmem:[#allocation15 + $0xb0] sm:$0xff] }
  0xe8   : > { %3941 = vmatpush3.msra.mxu0 %v721_v5  ;;  %v717_v14 = vld [vmem:[#allocation15 + $0x48] sm:$0xff]  ;;  %811 = vmatprep.mubr.f32.mxu0 %v707_v13  ;;  %v715_v18 = vld [vmem:[#allocation15 + $0x38] sm:$0xff]  ;;  %v714_v20 = vld [vmem:[#allocation15 + $0x30] sm:$0xff] }
  0xe9   : > { %3942 = vmatprep.subr.mxu0 %v736_v6  ;;  %v729_v21 = vld [vmem:[#allocation15 + $0xa8] sm:$0xff]  ;;  %v728_v23 = vld [vmem:[#allocation15 + $0xa0] sm:$0xff]  ;;  %v727_v25 = vld [vmem:[#allocation15 + $0x98] sm:$0xff] }
  0xea   : > { %3943 = vmatpush3.msra.mxu0 %v720_v7  ;;  %v713_v22 = vld [vmem:[#allocation15 + $0x28] sm:$0xff]  ;;  %v712_v24 = vld [vmem:[#allocation15 + $0x20] sm:$0xff]  ;;  %v711_v26 = vld [vmem:[#allocation15 + $0x18] sm:$0xff] }
  0xeb   : > { %3944 = vmatprep.subr.mxu0 %v735_v8  ;;  %v726_v27 = vld [vmem:[#allocation15 + $0x90] sm:$0xff]  ;;  %v725_v29 = vld [vmem:[#allocation15 + $0x88] sm:$0xff]  ;;  %v724_v31 = vld [vmem:[#allocation15 + $0x80] sm:$0xff] }
  0xec   : > { %3945 = vmatpush3.msra.mxu0 %v719_v9  ;;  %v710_v28 = vld [vmem:[#allocation15 + $0x10] sm:$0xff]  ;;  %v709_v30 = vld [vmem:[#allocation15 + $0x8] sm:$0xff]  ;;  %v708_v32 = vld [vmem:[#allocation15] sm:$0xff] }
  0xed   : > { %3946 = vmatprep.subr.mxu0 %v734_v10  ;;  %v706_v33 = vld [vmem:[%s577_s15] sm:$0xff] }
  0xee   : > { %3947 = vmatpush3.msra.mxu0 %v718_v11  ;;  %v3914_v37 = vld [vmem:[#allocation17] ss:$0 sm:$0xff] }
  0xef   : > { %3948 = vmatprep.subr.mxu0 %v733_v12 }
  0xf0   : > { %3949 = vmatpush3.msra.mxu0 %v717_v14 }
  0xf1   : > { %3950 = vmatprep.subr.mxu0 %v732_v15 }
  0xf2   : > { %3951 = vmatpush3.msra.mxu0 %v716_v16 }
  0xf3   : > { %3952 = vmatprep.subr.mxu0 %v731_v17 }
  0xf4   : > { %3953 = vmatpush3.msra.mxu0 %v715_v18 }
  0xf5   : > { %3954 = vmatprep.subr.mxu0 %v730_v19 }
  0xf6   : > { %3955 = vmatpush3.msra.mxu0 %v714_v20 }
  0xf7   : > { %3956 = vmatprep.subr.mxu0 %v729_v21 }
  0xf8   : > { %3957 = vmatpush3.msra.mxu0 %v713_v22 }
  0xf9   : > { %3958 = vmatprep.subr.mxu0 %v728_v23 }
  0xfa   : > { %3959 = vmatpush3.msra.mxu0 %v712_v24 }
  0xfb   : > { %3960 = vmatprep.subr.mxu0 %v727_v25 }
  0xfc   : > { %3961 = vmatpush3.msra.mxu0 %v711_v26 }
  0xfd   : > { %3962 = vmatprep.subr.mxu0 %v726_v27 }
  0xfe   : > { %3963 = vmatpush3.msra.mxu0 %v710_v28 }
  0xff   : > { %3964 = vmatprep.subr.mxu0 %v725_v29 }
 0x100   : > { %3965 = vmatpush3.msra.mxu0 %v709_v30 }
 0x101   : > { %3966 = vmatprep.subr.mxu0 %v724_v31 }
 0x102   : > { %3967 = vmatpush3.msra.mxu0 %v708_v32 }
 0x103   : > { %812 = vmatmul.mubr.f32.vlgmr.msra.gmra.mxu0 %v706_v33 }
 0x1c3   : > { %v3968_v36 = vpop.f32.mrf.mxu0 }
 0x1c5   : > { %v3969_v38 = vpop.f32.mrf.mxu0 }
 0x1c6   : > { %v3970_v39 = vadd.f32 %v3969_v38, %v3968_v36 }
 0x1c8   : > { %v814_v40 = vadd.f32 %v3970_v39, %v3914_v37 }
 0x1ca   : > { %817 = vst [vmem:[#allocation2] sm:$0xff] %v814_v40 }
 0x1cb PF: > { %s7346_s9 = sld [smem:[#allocation42_spill]]  ;;  %v962_v41 = vlaneseq  ;;  %v5672_v48 = vmov 0.0   ;;  %vm5673_vm1 = vmmov 0   ;;  %v5674_v53 = vmov 1966171168   ;;  %v843_v62 = vld [vmem:[%s6042_s12 + $0x78] sm:$0xff] }
 0x1cc   : > { %4243 = vmatprep.subr.mxu0 %v5672_v48  ;;  %4278 = vmatprep.subr.mxu1 %v5672_v48  ;;  %v960_v54 = vunpack.c.l.s4 %v5674_v53  ;;  %v842_v63 = vld [vmem:[%s6042_s12 + $0x70] sm:$0xff]  ;;  %v859_v6 = vld [vmem:[%s6042_s12 + $0xf8] sm:$0xff]  ;;  %v841_v14 = vld [vmem:[%s6042_s12 + $0x68] sm:$0xff]  ;;  %vm2674_vm2 = vcmask 1041409   ;;  %vm2677_vm3 = vcmask 1042434   ;;  %vm2680_vm4 = vcmask 1043459  }
 0x1cd   : > { %v6083_v42 = vshrl.u32 %v962_v41, 7  ;;  %4275 = vmatprep.mubr.msk.f32.mxu0 %vm5673_vm1, %v5672_v48  ;;  %4310 = vmatprep.mubr.msk.f32.mxu1 %vm5673_vm1, %v5672_v48  ;;  %v6151_v0 = vld [vmem:[#allocation18] ss:$0 sm:$0xff]  ;;  %v857_v17 = vld [vmem:[%s6042_s12 + $0xe8] sm:$0xff]  ;;  %v840_v26 = vld [vmem:[%s6042_s12 + $0x60] sm:$0xff]  ;;  %vm2683_vm5 = vcmask 1044484  }
 0x1ce   : > { %v961_v55 = vunpack.c.0.s8 %v960_v54  ;;  %v858_v7 = vld [vmem:[%s6042_s12 + $0xf0] sm:$0xff]  ;;  %v856_v29 = vld [vmem:[%s6042_s12 + $0xe0] sm:$0xff]  ;;  %v839_v38 = vld [vmem:[%s6042_s12 + $0x58] sm:$0xff]  ;;  %vm2686_vm6 = vcmask 1045509   ;;  %vm2689_vm7 = vcmask 1046534   ;;  %vm2692_vm8 = vcmask 1047559  }
 0x1cf   : > { %v6091_v44 = vsub.s32 0, %v6083_v42  ;;  %v1244_v45 = vsub.s32 1, %v6083_v42  ;;  %v1311_v49 = vsub.s32 2, %v6083_v42  ;;  %v1378_v50 = vsub.s32 3, %v6083_v42  ;;  %v855_v41 = vld [vmem:[%s6042_s12 + $0xd8] sm:$0xff] }
 0x1d0   : > { %v6130_v56 = vsub.s32 %v961_v55, %v6083_v42  ;;  %v1445_v21 = vsub.s32 4, %v6083_v42  ;;  %v1512_v22 = vsub.s32 5, %v6083_v42  ;;  %v854_v55 = vld [vmem:[%s6042_s12 + $0xd0] sm:$0xff]  ;;  %vm2719_vm10 = vcmask 7168  }
 0x1d1   : > { %s3915_s16 = sshll.u32 %s7346_s9, 7  ;;  %v5268_v57 = vld.sshfl [vmem:[#allocation2] sm:$0xff pattern:$0x75316420]  ;;  %p3919_p5 = scmp.ne.s32.totalorder %s7346_s9, 1 }
 0x1d2   : > { %s6080_s8 = sshra.s32 %s3915_s16, 7  ;;  %v6137_v58 = vrot.slane %v5268_v57, %v6130_v56  ;;  %v973_v59 = vcombine.high %v5268_v57, %v5268_v57 }
 0x1d3   : > { %s3916_s15 = sshll.u32 %s6080_s8, 3 }
 0x1d4   : > { %s826_s1 = scalar_lea.vmem %s6051_s6, %s3916_s15 [#allocation14]  ;;  %v6143_v60 = vrot.slane %v6137_v58, %v6091_v44  ;;  %v6146_v61 = vrot.slane %v973_v59, %v6130_v56  ;;  %s2697_s14 = scalar_lea.vmem %s6069_s29, %s3916_s15 [#allocation22] }
 0x1d5   : > { %v6088_v43 = vld [vmem:[%s826_s1] sm:$0xff] }
 0x1d6   : > { %v1178_v46 = vrot.slane %v6088_v43, %v6091_v44  ;;  %v1245_v47 = vrot.slane %v6088_v43, %v1244_v45  ;;  %v6102_v51 = vrot.slane %v6088_v43, %v1311_v49  ;;  %v6105_v52 = vrot.slane %v6088_v43, %v1378_v50 }
 0x1d7   : > { %v1062_v1 = vadd.f32 %v6143_v60, %v843_v62  ;;  %v1061_v2 = vadd.f32 %v6143_v60, %v842_v63  ;;  %v6158_v3 = vrot.slane %v6146_v61, %v6091_v44  ;;  %v1060_v20 = vadd.f32 %v6143_v60, %v841_v14 }
 0x1d8   : > { %1240 = vbcast.lane.b32.xlu0 %v1178_v46, 376  ;;  %1236 = vbcast.lane.b32.xlu1 %v1178_v46, 368  ;;  %v1059_v32 = vadd.f32 %v6143_v60, %v840_v26  ;;  %v6186_v33 = vrot.slane %v6088_v43, %v1445_v21  ;;  %v6189_v34 = vrot.slane %v6088_v43, %v1512_v22  ;;  %v852_v21 = vld [vmem:[%s6042_s12 + $0xc0] sm:$0xff] }
 0x1d9   : > { %v1078_v12 = vadd.f32 %v6158_v3, %v859_v6  ;;  %v1077_v13 = vadd.f32 %v6158_v3, %v858_v7  ;;  %v1076_v25 = vadd.f32 %v6158_v3, %v857_v17  ;;  %v1075_v37 = vadd.f32 %v6158_v3, %v856_v29  ;;  %v836_v17 = vld [vmem:[%s6042_s12 + $0x40] sm:$0xff]  ;;  %v835_v29 = vld [vmem:[%s6042_s12 + $0x38] sm:$0xff] }
 0x1dc   : > { %1307 = vbcast.lane.b32.xlu0 %v1245_v47, 376  ;;  %1303 = vbcast.lane.b32.xlu1 %v1245_v47, 368 }
 0x1e0   : > { %1232 = vbcast.lane.b32.xlu0 %v1178_v46, 360  ;;  %1299 = vbcast.lane.b32.xlu1 %v1245_v47, 360 }
 0x1e4   : > { %1228 = vbcast.lane.b32.xlu0 %v1178_v46, 352  ;;  %1295 = vbcast.lane.b32.xlu1 %v1245_v47, 352 }
 0x1e8   : > { %1224 = vbcast.lane.b32.xlu0 %v1178_v46, 344  ;;  %1291 = vbcast.lane.b32.xlu1 %v1245_v47, 344 }
 0x1ec   : > { %1220 = vbcast.lane.b32.xlu0 %v1178_v46, 336  ;;  %1287 = vbcast.lane.b32.xlu1 %v1245_v47, 336 }
 0x1f0   : > { %1216 = vbcast.lane.b32.xlu0 %v1178_v46, 328  ;;  %1283 = vbcast.lane.b32.xlu1 %v1245_v47, 328 }
 0x1f4   : > { %1212 = vbcast.lane.b32.xlu0 %v1178_v46, 320  ;;  %1279 = vbcast.lane.b32.xlu1 %v1245_v47, 320 }
 0x1f8   : > { %1208 = vbcast.lane.b32.xlu0 %v1178_v46, 312  ;;  %1275 = vbcast.lane.b32.xlu1 %v1245_v47, 312 }
 0x1fc   : > { %1204 = vbcast.lane.b32.xlu0 %v1178_v46, 304  ;;  %1271 = vbcast.lane.b32.xlu1 %v1245_v47, 304 }
 0x200   : > { %1200 = vbcast.lane.b32.xlu0 %v1178_v46, 296  ;;  %1267 = vbcast.lane.b32.xlu1 %v1245_v47, 296 }
 0x204   : > { %1196 = vbcast.lane.b32.xlu0 %v1178_v46, 288  ;;  %1263 = vbcast.lane.b32.xlu1 %v1245_v47, 288 }
 0x208   : > { %1192 = vbcast.lane.b32.xlu0 %v1178_v46, 280  ;;  %1259 = vbcast.lane.b32.xlu1 %v1245_v47, 280 }
 0x20c   : > { %1188 = vbcast.lane.b32.xlu0 %v1178_v46, 272  ;;  %1255 = vbcast.lane.b32.xlu1 %v1245_v47, 272 }
 0x210   : > { %1184 = vbcast.lane.b32.xlu0 %v1178_v46, 264  ;;  %1251 = vbcast.lane.b32.xlu1 %v1245_v47, 264 }
 0x214   : > { %1180 = vbcast.lane.b32.xlu0 %v1178_v46, 256  ;;  %1247 = vbcast.lane.b32.xlu1 %v1245_v47, 256  ;;  %v1058_v47 = vadd.f32 %v6143_v60, %v839_v38 }
 0x218   : > { %1374 = vbcast.lane.b32.xlu0 %v6102_v51, 376  ;;  %1441 = vbcast.lane.b32.xlu1 %v6105_v52, 376 }
 0x21c   : > { %1370 = vbcast.lane.b32.xlu0 %v6102_v51, 368  ;;  %1437 = vbcast.lane.b32.xlu1 %v6105_v52, 368 }
 0x220   : > { %1366 = vbcast.lane.b32.xlu0 %v6102_v51, 360  ;;  %1433 = vbcast.lane.b32.xlu1 %v6105_v52, 360 }
 0x224   : > { %1362 = vbcast.lane.b32.xlu0 %v6102_v51, 352  ;;  %1429 = vbcast.lane.b32.xlu1 %v6105_v52, 352 }
 0x228   : > { %1358 = vbcast.lane.b32.xlu0 %v6102_v51, 344  ;;  %1425 = vbcast.lane.b32.xlu1 %v6105_v52, 344 }
 0x22c   : > { %1354 = vbcast.lane.b32.xlu0 %v6102_v51, 336  ;;  %1421 = vbcast.lane.b32.xlu1 %v6105_v52, 336 }
 0x230   : > { %1350 = vbcast.lane.b32.xlu0 %v6102_v51, 328  ;;  %1417 = vbcast.lane.b32.xlu1 %v6105_v52, 328 }
 0x234   : > { %1346 = vbcast.lane.b32.xlu0 %v6102_v51, 320  ;;  %1413 = vbcast.lane.b32.xlu1 %v6105_v52, 320 }
 0x238   : > { %1342 = vbcast.lane.b32.xlu0 %v6102_v51, 312  ;;  %1409 = vbcast.lane.b32.xlu1 %v6105_v52, 312 }
 0x23c   : > { %1338 = vbcast.lane.b32.xlu0 %v6102_v51, 304  ;;  %1405 = vbcast.lane.b32.xlu1 %v6105_v52, 304 }
 0x240   : > { %1334 = vbcast.lane.b32.xlu0 %v6102_v51, 296  ;;  %1401 = vbcast.lane.b32.xlu1 %v6105_v52, 296 }
 0x244   : > { %1330 = vbcast.lane.b32.xlu0 %v6102_v51, 288  ;;  %1397 = vbcast.lane.b32.xlu1 %v6105_v52, 288 }
 0x248   : > { %1326 = vbcast.lane.b32.xlu0 %v6102_v51, 280  ;;  %1393 = vbcast.lane.b32.xlu1 %v6105_v52, 280 }
 0x24a   : > { %v1241_v4 = vpop.permute.xlu0 %1240  ;;  %v1237_v5 = vpop.permute.xlu1 %1236 }
 0x24b   : > { %v1733_v8 = vmul.f32 %v6151_v0, %v1241_v4  ;;  %v1732_v9 = vmul.f32 %v6151_v0, %v1237_v5  ;;  %v1073_v4 = vadd.f32 %v6158_v3, %v854_v55  ;;  %v837_v5 = vld [vmem:[%s6042_s12 + $0x48] sm:$0xff] }
 0x24c   : > { %1322 = vbcast.lane.b32.xlu0 %v6102_v51, 272  ;;  %1389 = vbcast.lane.b32.xlu1 %v6105_v52, 272 }
 0x24d   : > { %v1861_v10 = vadd.f32 %v1733_v8, %v1062_v1  ;;  %v1860_v11 = vadd.f32 %v1732_v9, %v1061_v2  ;;  %v853_v9 = vld [vmem:[%s6042_s12 + $0xc8] sm:$0xff] }
 0x24e   : > { %v1308_v15 = vpop.permute.xlu0 %1307  ;;  %v1304_v16 = vpop.permute.xlu1 %1303 }
 0x24f   : > { %4997 = vtanh.f32 %v1861_v10  ;;  %v1749_v18 = vmul.f32 %v6151_v0, %v1308_v15  ;;  %v1748_v19 = vmul.f32 %v6151_v0, %v1304_v16  ;;  %v1072_v16 = vadd.f32 %v6158_v3, %v853_v9 }
 0x250   : > { %1318 = vbcast.lane.b32.xlu0 %v6102_v51, 264  ;;  %1385 = vbcast.lane.b32.xlu1 %v6105_v52, 264  ;;  %4999 = vtanh.f32 %v1860_v11 }
 0x251   : > { %v1877_v23 = vadd.f32 %v1749_v18, %v1078_v12  ;;  %v1876_v24 = vadd.f32 %v1748_v19, %v1077_v13  ;;  %v1056_v13 = vadd.f32 %v6143_v60, %v837_v5  ;;  %v849_v5 = vld [vmem:[%s6042_s12 + $0xa8] sm:$0xff] }
 0x252   : > { %v1233_v27 = vpop.permute.xlu0 %1232  ;;  %v1300_v28 = vpop.permute.xlu1 %1299 }
 0x253   : > { %5001 = vtanh.f32 %v1877_v23  ;;  %v1731_v30 = vmul.f32 %v6151_v0, %v1233_v27  ;;  %v1747_v31 = vmul.f32 %v6151_v0, %v1300_v28  ;;  %v1071_v28 = vadd.f32 %v6158_v3, %v852_v21 }
 0x254   : > { %1314 = vbcast.lane.b32.xlu0 %v6102_v51, 256  ;;  %1381 = vbcast.lane.b32.xlu1 %v6105_v52, 256  ;;  %5003 = vtanh.f32 %v1876_v24  ;;  %v1074_v51 = vadd.f32 %v6158_v3, %v855_v41  ;;  %v838_v52 = vld [vmem:[%s6042_s12 + $0x50] sm:$0xff] }
 0x255   : > { %v1859_v35 = vadd.f32 %v1731_v30, %v1060_v20  ;;  %v1875_v36 = vadd.f32 %v1747_v31, %v1076_v25  ;;  %v1057_v63 = vadd.f32 %v6143_v60, %v838_v52  ;;  %v1055_v25 = vadd.f32 %v6143_v60, %v836_v17  ;;  %v848_v17 = vld [vmem:[%s6042_s12 + $0xa0] sm:$0xff] }
 0x256   : > { %v1229_v39 = vpop.permute.xlu0 %1228  ;;  %v1296_v40 = vpop.permute.xlu1 %1295 }
 0x257   : > { %5005 = vtanh.f32 %v1859_v35  ;;  %v1730_v45 = vmul.f32 %v6151_v0, %v1229_v39  ;;  %v1746_v46 = vmul.f32 %v6151_v0, %v1296_v40  ;;  %v851_v35 = vld [vmem:[%s6042_s12 + $0xb8] sm:$0xff]  ;;  %v1054_v39 = vadd.f32 %v6143_v60, %v835_v29 }
 0x258   : > { %1508 = vbcast.lane.b32.xlu0 %v6186_v33, 376  ;;  %1575 = vbcast.lane.b32.xlu1 %v6189_v34, 376  ;;  %5007 = vtanh.f32 %v1875_v36  ;;  %v847_v29 = vld [vmem:[%s6042_s12 + $0x98] sm:$0xff] }
 0x259   : > { %v1858_v49 = vadd.f32 %v1730_v45, %v1059_v32  ;;  %v1874_v50 = vadd.f32 %v1746_v46, %v1075_v37  ;;  %v1070_v45 = vadd.f32 %v6158_v3, %v851_v35  ;;  %v834_v46 = vld [vmem:[%s6042_s12 + $0x30] sm:$0xff] }
 0x25a   : > { %v1225_v53 = vpop.permute.xlu0 %1224  ;;  %v1292_v54 = vpop.permute.xlu1 %1291  ;;  %v1053_v55 = vadd.f32 %v6143_v60, %v834_v46  ;;  %v846_v46 = vld [vmem:[%s6042_s12 + $0x90] sm:$0xff] }
 0x25b   : > { %5009 = vtanh.f32 %v1858_v49  ;;  %v1729_v57 = vmul.f32 %v6151_v0, %v1225_v53  ;;  %v1745_v59 = vmul.f32 %v6151_v0, %v1292_v54 }
 0x25c   : > { %v4998_v62 = vpop.eup %4997  ;;  %1504 = vbcast.lane.b32.xlu0 %v6186_v33, 368  ;;  %1571 = vbcast.lane.b32.xlu1 %v6189_v34, 368  ;;  %5011 = vtanh.f32 %v1874_v50 }
 0x25d   : > { %v1857_v1 = vadd.f32 %v1729_v57, %v1058_v47  ;;  %4244 = vmatpush3.xpose.msra.mxu0 %v4998_v62  ;;  %v1873_v2 = vadd.f32 %v1745_v59, %v1074_v51  ;;  %v5000_v6 = vpop.eup %4999  ;;  %v850_v51 = vld [vmem:[%s6042_s12 + $0xb0] sm:$0xff] }
 0x25e   : > { %v1221_v7 = vpop.permute.xlu0 %1220  ;;  %4245 = vmatprep.subr.mxu0 %v5672_v48  ;;  %v1288_v8 = vpop.permute.xlu1 %1287  ;;  %v1069_v62 = vadd.f32 %v6158_v3, %v850_v51 }
 0x25f   : > { %5013 = vtanh.f32 %v1857_v1  ;;  %v1728_v10 = vmul.f32 %v6151_v0, %v1221_v7  ;;  %v1744_v11 = vmul.f32 %v6151_v0, %v1288_v8 }
 0x260   : > { %v5002_v12 = vpop.eup %5001  ;;  %1500 = vbcast.lane.b32.xlu0 %v6186_v33, 360  ;;  %1567 = vbcast.lane.b32.xlu1 %v6189_v34, 360  ;;  %5015 = vtanh.f32 %v1873_v2 }
 0x261   : > { %v1856_v14 = vadd.f32 %v1728_v10, %v1057_v63  ;;  %4246 = vmatpush3.xpose.msra.mxu0 %v5000_v6  ;;  %4279 = vmatpush3.xpose.msra.mxu1 %v5002_v12  ;;  %v1872_v15 = vadd.f32 %v1744_v11, %v1073_v4  ;;  %v5004_v18 = vpop.eup %5003  ;;  %v833_v63 = vld [vmem:[%s6042_s12 + $0x28] sm:$0xff]  ;;  %v1068_v12 = vadd.f32 %v6158_v3, %v849_v5 }
 0x262   : > { %v1217_v19 = vpop.permute.xlu0 %1216  ;;  %4247 = vmatprep.subr.mxu0 %v5672_v48  ;;  %4280 = vmatprep.subr.mxu1 %v5672_v48  ;;  %v1284_v20 = vpop.permute.xlu1 %1283  ;;  %v1052_v9 = vadd.f32 %v6143_v60, %v833_v63 }
 0x263   : > { %5017 = vtanh.f32 %v1856_v14  ;;  %v1727_v22 = vmul.f32 %v6151_v0, %v1217_v19  ;;  %v1743_v23 = vmul.f32 %v6151_v0, %v1284_v20 }
 0x264   : > { %v5006_v24 = vpop.eup %5005  ;;  %1496 = vbcast.lane.b32.xlu0 %v6186_v33, 352  ;;  %1563 = vbcast.lane.b32.xlu1 %v6189_v34, 352  ;;  %5019 = vtanh.f32 %v1872_v15 }
 0x265   : > { %v1855_v26 = vadd.f32 %v1727_v22, %v1056_v13  ;;  %4248 = vmatpush3.xpose.msra.mxu0 %v5006_v24  ;;  %4281 = vmatpush3.xpose.msra.mxu1 %v5004_v18  ;;  %v1871_v27 = vadd.f32 %v1743_v23, %v1072_v16  ;;  %v5008_v30 = vpop.eup %5007  ;;  %v832_v13 = vld [vmem:[%s6042_s12 + $0x20] sm:$0xff]  ;;  %v1067_v24 = vadd.f32 %v6158_v3, %v848_v17 }
 0x266   : > { %v1213_v31 = vpop.permute.xlu0 %1212  ;;  %4249 = vmatprep.subr.mxu0 %v5672_v48  ;;  %4282 = vmatprep.subr.mxu1 %v5672_v48  ;;  %v1280_v32 = vpop.permute.xlu1 %1279  ;;  %v1051_v21 = vadd.f32 %v6143_v60, %v832_v13 }
 0x267   : > { %5021 = vtanh.f32 %v1855_v26  ;;  %v1726_v36 = vmul.f32 %v6151_v0, %v1213_v31  ;;  %v1742_v37 = vmul.f32 %v6151_v0, %v1280_v32 }
 0x268   : > { %v5010_v38 = vpop.eup %5009  ;;  %1492 = vbcast.lane.b32.xlu0 %v6186_v33, 344  ;;  %1559 = vbcast.lane.b32.xlu1 %v6189_v34, 344  ;;  %5023 = vtanh.f32 %v1871_v27 }
 0x269   : > { %v1854_v40 = vadd.f32 %v1726_v36, %v1055_v25  ;;  %4250 = vmatpush3.xpose.msra.mxu0 %v5010_v38  ;;  %4283 = vmatpush3.xpose.msra.mxu1 %v5008_v30  ;;  %v1870_v41 = vadd.f32 %v1742_v37, %v1071_v28  ;;  %v5012_v47 = vpop.eup %5011  ;;  %v831_v25 = vld [vmem:[%s6042_s12 + $0x18] sm:$0xff]  ;;  %v1066_v38 = vadd.f32 %v6158_v3, %v847_v29 }
 0x26a   : > { %v1209_v49 = vpop.permute.xlu0 %1208  ;;  %4251 = vmatprep.subr.mxu0 %v5672_v48  ;;  %4284 = vmatprep.subr.mxu1 %v5672_v48  ;;  %v1276_v50 = vpop.permute.xlu1 %1275  ;;  %v1050_v35 = vadd.f32 %v6143_v60, %v831_v25 }
 0x26b   : > { %5025 = vtanh.f32 %v1854_v40  ;;  %v1725_v52 = vmul.f32 %v6151_v0, %v1209_v49  ;;  %v1741_v53 = vmul.f32 %v6151_v0, %v1276_v50 }
 0x26c   : > { %v5014_v54 = vpop.eup %5013  ;;  %1488 = vbcast.lane.b32.xlu0 %v6186_v33, 336  ;;  %1555 = vbcast.lane.b32.xlu1 %v6189_v34, 336  ;;  %5027 = vtanh.f32 %v1870_v41 }
 0x26d   : > { %v1853_v57 = vadd.f32 %v1725_v52, %v1054_v39  ;;  %4252 = vmatpush3.xpose.msra.mxu0 %v5014_v54  ;;  %4285 = vmatpush3.xpose.msra.mxu1 %v5012_v47  ;;  %v1869_v59 = vadd.f32 %v1741_v53, %v1070_v45  ;;  %v5016_v1 = vpop.eup %5015  ;;  %v830_v39 = vld [vmem:[%s6042_s12 + $0x10] sm:$0xff]  ;;  %v1065_v54 = vadd.f32 %v6158_v3, %v846_v46 }
 0x26e   : > { %v1205_v2 = vpop.permute.xlu0 %1204  ;;  %4253 = vmatprep.subr.mxu0 %v5672_v48  ;;  %4286 = vmatprep.subr.mxu1 %v5672_v48  ;;  %v1272_v4 = vpop.permute.xlu1 %1271  ;;  %v1049_v51 = vadd.f32 %v6143_v60, %v830_v39  ;;  %v890_v39 = vld [vmem:[%s6042_s12 + $0x1f0] sm:$0xff] }
 0x26f   : > { %5029 = vtanh.f32 %v1853_v57  ;;  %v1724_v6 = vmul.f32 %v6151_v0, %v1205_v2  ;;  %v1740_v7 = vmul.f32 %v6151_v0, %v1272_v4  ;;  %v845_v57 = vld [vmem:[%s6042_s12 + $0x88] sm:$0xff] }
 0x270   : > { %v5018_v8 = vpop.eup %5017  ;;  %1484 = vbcast.lane.b32.xlu0 %v6186_v33, 328  ;;  %1551 = vbcast.lane.b32.xlu1 %v6189_v34, 328  ;;  %5031 = vtanh.f32 %v1869_v59 }
 0x271   : > { %v1852_v10 = vadd.f32 %v1724_v6, %v1053_v55  ;;  %4254 = vmatpush3.xpose.msra.mxu0 %v5018_v8  ;;  %4287 = vmatpush3.xpose.msra.mxu1 %v5016_v1  ;;  %v1868_v11 = vadd.f32 %v1740_v7, %v1069_v62  ;;  %v5020_v14 = vpop.eup %5019  ;;  %v829_v55 = vld [vmem:[%s6042_s12 + $0x8] sm:$0xff]  ;;  %v1064_v6 = vadd.f32 %v6158_v3, %v845_v57 }
 0x272   : > { %v1201_v15 = vpop.permute.xlu0 %1200  ;;  %4255 = vmatprep.subr.mxu0 %v5672_v48  ;;  %4288 = vmatprep.subr.mxu1 %v5672_v48  ;;  %v1268_v16 = vpop.permute.xlu1 %1267  ;;  %v1048_v5 = vadd.f32 %v6143_v60, %v829_v55  ;;  %v1003_v7 = vcombine.high %v6137_v58, %v6137_v58  ;;  %v889_v55 = vld [vmem:[%s6042_s12 + $0x1e8] sm:$0xff] }
 0x273   : > { %5033 = vtanh.f32 %v1852_v10  ;;  %v1723_v18 = vmul.f32 %v6151_v0, %v1201_v15  ;;  %v1739_v19 = vmul.f32 %v6151_v0, %v1268_v16  ;;  %v828_v10 = vld [vmem:[%s6042_s12] sm:$0xff] }
 0x274   : > { %v5022_v20 = vpop.eup %5021  ;;  %1480 = vbcast.lane.b32.xlu0 %v6186_v33, 320  ;;  %1547 = vbcast.lane.b32.xlu1 %v6189_v34, 320  ;;  %5035 = vtanh.f32 %v1868_v11  ;;  %v844_v11 = vld [vmem:[%s6042_s12 + $0x80] sm:$0xff] }
 0x275   : > { %v1851_v22 = vadd.f32 %v1723_v18, %v1052_v9  ;;  %4256 = vmatpush3.xpose.msra.mxu0 %v5022_v20  ;;  %4289 = vmatpush3.xpose.msra.mxu1 %v5020_v14  ;;  %v1867_v23 = vadd.f32 %v1739_v19, %v1068_v12  ;;  %v5024_v26 = vpop.eup %5023  ;;  %v1005_v12 = vcombine.high %v6146_v61, %v6146_v61 }
 0x276   : > { %v1197_v27 = vpop.permute.xlu0 %1196  ;;  %4257 = vmatprep.subr.mxu0 %v5672_v48  ;;  %4290 = vmatprep.subr.mxu1 %v5672_v48  ;;  %v1264_v28 = vpop.permute.xlu1 %1263  ;;  %v1047_v18 = vadd.f32 %v6143_v60, %v828_v10  ;;  %v1063_v61 = vadd.f32 %v6158_v3, %v844_v11  ;;  %v6312_v19 = vrot.slane %v1003_v7, %v6091_v44  ;;  %v891_v3 = vld [vmem:[%s6042_s12 + $0x1f8] sm:$0xff]  ;;  %v872_v7 = vld [vmem:[%s6042_s12 + $0x160] sm:$0xff] }
 0x277   : > { %5037 = vtanh.f32 %v1851_v22  ;;  %v1722_v30 = vmul.f32 %v6151_v0, %v1197_v27  ;;  %v1738_v31 = vmul.f32 %v6151_v0, %v1264_v28  ;;  %v875_v22 = vld [vmem:[%s6042_s12 + $0x178] sm:$0xff]  ;;  %v888_v11 = vld [vmem:[%s6042_s12 + $0x1e0] sm:$0xff] }
 0x278   : > { %v5026_v32 = vpop.eup %5025  ;;  %1476 = vbcast.lane.b32.xlu0 %v6186_v33, 312  ;;  %1543 = vbcast.lane.b32.xlu1 %v6189_v34, 312  ;;  %5039 = vtanh.f32 %v1867_v23  ;;  %v6316_v23 = vrot.slane %v1005_v12, %v6091_v44  ;;  %v1094_v29 = vadd.f32 %v6312_v19, %v875_v22 }
 0x279   : > { %v1850_v36 = vadd.f32 %v1722_v30, %v1051_v21  ;;  %4258 = vmatpush3.xpose.msra.mxu0 %v5026_v32  ;;  %4291 = vmatpush3.xpose.msra.mxu1 %v5024_v26  ;;  %v1866_v37 = vadd.f32 %v1738_v31, %v1067_v24  ;;  %v5028_v40 = vpop.eup %5027 }
 0x27a   : > { %v1193_v41 = vpop.permute.xlu0 %1192  ;;  %4259 = vmatprep.subr.mxu0 %v5672_v48  ;;  %4292 = vmatprep.subr.mxu1 %v5672_v48  ;;  %v1260_v45 = vpop.permute.xlu1 %1259  ;;  %v1110_v32 = vadd.f32 %v6316_v23, %v891_v3 }
 0x27b   : > { %5041 = vtanh.f32 %v1850_v36  ;;  %v1721_v47 = vmul.f32 %v6151_v0, %v1193_v41  ;;  %v1737_v49 = vmul.f32 %v6151_v0, %v1260_v45 }
 0x27c   : > { %v5030_v50 = vpop.eup %5029  ;;  %1472 = vbcast.lane.b32.xlu0 %v6186_v33, 304  ;;  %1539 = vbcast.lane.b32.xlu1 %v6189_v34, 304  ;;  %5043 = vtanh.f32 %v1866_v37 }
 0x27d   : > { %v1849_v52 = vadd.f32 %v1721_v47, %v1050_v35  ;;  %4260 = vmatpush3.xpose.msra.mxu0 %v5030_v50  ;;  %4293 = vmatpush3.xpose.msra.mxu1 %v5028_v40  ;;  %v1865_v53 = vadd.f32 %v1737_v49, %v1066_v38  ;;  %v5032_v59 = vpop.eup %5031  ;;  %v874_v35 = vld [vmem:[%s6042_s12 + $0x170] sm:$0xff]  ;;  %v1109_v50 = vadd.f32 %v6316_v23, %v890_v39 }
 0x27e   : > { %v1189_v62 = vpop.permute.xlu0 %1188  ;;  %4261 = vmatprep.subr.mxu0 %v5672_v48  ;;  %4294 = vmatprep.subr.mxu1 %v5672_v48  ;;  %v1256_v63 = vpop.permute.xlu1 %1255  ;;  %v1093_v46 = vadd.f32 %v6312_v19, %v874_v35 }
 0x27f   : > { %5045 = vtanh.f32 %v1849_v52  ;;  %v1720_v1 = vmul.f32 %v6151_v0, %v1189_v62  ;;  %v1736_v2 = vmul.f32 %v6151_v0, %v1256_v63 }
 0x280   : > { %v5034_v4 = vpop.eup %5033  ;;  %1468 = vbcast.lane.b32.xlu0 %v6186_v33, 296  ;;  %1535 = vbcast.lane.b32.xlu1 %v6189_v34, 296  ;;  %5047 = vtanh.f32 %v1865_v53 }
 0x281   : > { %v1848_v8 = vadd.f32 %v1720_v1, %v1049_v51  ;;  %4262 = vmatpush3.xpose.msra.mxu0 %v5034_v4  ;;  %4295 = vmatpush3.xpose.msra.mxu1 %v5032_v59  ;;  %v1864_v9 = vadd.f32 %v1736_v2, %v1065_v54  ;;  %v5036_v13 = vpop.eup %5035  ;;  %v873_v51 = vld [vmem:[%s6042_s12 + $0x168] sm:$0xff]  ;;  %v1579_v1 = vsub.s32 6, %v6083_v42  ;;  %v1646_v2 = vsub.s32 7, %v6083_v42 }
 0x282   : > { %v1185_v14 = vpop.permute.xlu0 %1184  ;;  %4263 = vmatprep.subr.mxu0 %v5672_v48  ;;  %4296 = vmatprep.subr.mxu1 %v5672_v48  ;;  %v1252_v15 = vpop.permute.xlu1 %1251  ;;  %v1092_v63 = vadd.f32 %v6312_v19, %v873_v51 }
 0x283   : > { %5049 = vtanh.f32 %v1848_v8  ;;  %v1719_v58 = vmul.f32 %v6151_v0, %v1185_v14  ;;  %v1735_v16 = vmul.f32 %v6151_v0, %v1252_v15  ;;  %v1091_v14 = vadd.f32 %v6312_v19, %v872_v7 }
 0x284   : > { %v5038_v17 = vpop.eup %5037  ;;  %1464 = vbcast.lane.b32.xlu0 %v6186_v33, 288  ;;  %1531 = vbcast.lane.b32.xlu1 %v6189_v34, 288  ;;  %5051 = vtanh.f32 %v1864_v9  ;;  %v6359_v15 = vrot.slane %v6088_v43, %v1579_v1 }
 0x285   : > { %v1847_v20 = vadd.f32 %v1719_v58, %v1048_v5  ;;  %4264 = vmatpush3.xpose.msra.mxu0 %v5038_v17  ;;  %4297 = vmatpush3.xpose.msra.mxu1 %v5036_v13  ;;  %v1863_v21 = vadd.f32 %v1735_v16, %v1064_v6  ;;  %v5040_v24 = vpop.eup %5039  ;;  %v1108_v6 = vadd.f32 %v6316_v23, %v889_v55 }
 0x286   : > { %v1181_v25 = vpop.permute.xlu0 %1180  ;;  %4265 = vmatprep.subr.mxu0 %v5672_v48  ;;  %4298 = vmatprep.subr.mxu1 %v5672_v48  ;;  %v1248_v60 = vpop.permute.xlu1 %1247  ;;  %v6362_v58 = vrot.slane %v6088_v43, %v1646_v2 }
 0x287   : > { %5053 = vtanh.f32 %v1847_v20  ;;  %v1718_v26 = vmul.f32 %v6151_v0, %v1181_v25  ;;  %v1734_v27 = vmul.f32 %v6151_v0, %v1248_v60 }
 0x288   : > { %v5042_v28 = vpop.eup %5041  ;;  %1460 = vbcast.lane.b32.xlu0 %v6186_v33, 280  ;;  %1527 = vbcast.lane.b32.xlu1 %v6189_v34, 280  ;;  %5055 = vtanh.f32 %v1863_v21  ;;  %v887_v21 = vld [vmem:[%s6042_s12 + $0x1d8] sm:$0xff] }
 0x289   : > { %v1846_v30 = vadd.f32 %v1718_v26, %v1047_v18  ;;  %4266 = vmatpush3.xpose.msra.mxu0 %v5042_v28  ;;  %4299 = vmatpush3.xpose.msra.mxu1 %v5040_v24  ;;  %v1862_v31 = vadd.f32 %v1734_v27, %v1063_v61  ;;  %v5044_v36 = vpop.eup %5043  ;;  %v1107_v18 = vadd.f32 %v6316_v23, %v888_v11  ;;  %v871_v61 = vld [vmem:[%s6042_s12 + $0x158] sm:$0xff]  ;;  %v6374_v26 = vld [vmem:[#allocation20] sm:$0x1] }
 0x28a   : > { %v1375_v37 = vpop.permute.xlu0 %1374  ;;  %4267 = vmatprep.subr.mxu0 %v5672_v48  ;;  %4300 = vmatprep.subr.mxu1 %v5672_v48  ;;  %v1442_v38 = vpop.permute.xlu1 %1441  ;;  %v1090_v25 = vadd.f32 %v6312_v19, %v871_v61  ;;  %v1106_v27 = vadd.f32 %v6316_v23, %v887_v21  ;;  %v870_v28 = vld [vmem:[%s6042_s12 + $0x150] sm:$0xff] }
 0x28b   : > { %5057 = vtanh.f32 %v1846_v30  ;;  %v1765_v40 = vmul.f32 %v6151_v0, %v1375_v37  ;;  %v1781_v41 = vmul.f32 %v6151_v0, %v1442_v38  ;;  %v1089_v38 = vadd.f32 %v6312_v19, %v870_v28 }
 0x28c   : > { %v5046_v45 = vpop.eup %5045  ;;  %1456 = vbcast.lane.b32.xlu0 %v6186_v33, 272  ;;  %1523 = vbcast.lane.b32.xlu1 %v6189_v34, 272  ;;  %5059 = vtanh.f32 %v1862_v31 }
 0x28d   : > { %v1893_v47 = vadd.f32 %v1765_v40, %v1094_v29  ;;  %4268 = vmatpush3.xpose.msra.mxu0 %v5046_v45  ;;  %4301 = vmatpush3.xpose.msra.mxu1 %v5044_v36  ;;  %v1909_v49 = vadd.f32 %v1781_v41, %v1110_v32  ;;  %v5048_v52 = vpop.eup %5047  ;;  %v886_v32 = vld [vmem:[%s6042_s12 + $0x1d0] sm:$0xff]  ;;  %v869_v45 = vld [vmem:[%s6042_s12 + $0x148] sm:$0xff] }
 0x28e   : > { %v1371_v53 = vpop.permute.xlu0 %1370  ;;  %4269 = vmatprep.subr.mxu0 %v5672_v48  ;;  %4302 = vmatprep.subr.mxu1 %v5672_v48  ;;  %v1438_v54 = vpop.permute.xlu1 %1437  ;;  %v1105_v41 = vadd.f32 %v6316_v23, %v886_v32 }
 0x28f   : > { %5061 = vtanh.f32 %v1893_v47  ;;  %v1764_v57 = vmul.f32 %v6151_v0, %v1371_v53  ;;  %v1780_v59 = vmul.f32 %v6151_v0, %v1438_v54  ;;  %v1088_v54 = vadd.f32 %v6312_v19, %v869_v45 }
 0x290   : > { %v5050_v62 = vpop.eup %5049  ;;  %1452 = vbcast.lane.b32.xlu0 %v6186_v33, 264  ;;  %1519 = vbcast.lane.b32.xlu1 %v6189_v34, 264  ;;  %5063 = vtanh.f32 %v1909_v49 }
 0x291   : > { %v1892_v4 = vadd.f32 %v1764_v57, %v1093_v46  ;;  %4270 = vmatpush3.xpose.msra.mxu0 %v5050_v62  ;;  %4303 = vmatpush3.xpose.msra.mxu1 %v5048_v52  ;;  %v1908_v5 = vadd.f32 %v1780_v59, %v1109_v50  ;;  %v5052_v8 = vpop.eup %5051  ;;  %v885_v50 = vld [vmem:[%s6042_s12 + $0x1c8] sm:$0xff]  ;;  %v868_v62 = vld [vmem:[%s6042_s12 + $0x140] sm:$0xff] }
 0x292   : > { %v1367_v9 = vpop.permute.xlu0 %1366  ;;  %4271 = vmatprep.subr.mxu0 %v5672_v48  ;;  %4304 = vmatprep.subr.mxu1 %v5672_v48  ;;  %v1434_v10 = vpop.permute.xlu1 %1433  ;;  %v1104_v59 = vadd.f32 %v6316_v23, %v885_v50 }
 0x293   : > { %5065 = vtanh.f32 %v1892_v4  ;;  %v1763_v42 = vmul.f32 %v6151_v0, %v1367_v9  ;;  %v1779_v12 = vmul.f32 %v6151_v0, %v1434_v10  ;;  %v884_v4 = vld [vmem:[%s6042_s12 + $0x1c0] sm:$0xff] }
 0x294   : > { %v5054_v13 = vpop.eup %5053  ;;  %1448 = vbcast.lane.b32.xlu0 %v6186_v33, 256  ;;  %1515 = vbcast.lane.b32.xlu1 %v6189_v34, 256  ;;  %5067 = vtanh.f32 %v1908_v5  ;;  %v1103_v11 = vadd.f32 %v6316_v23, %v884_v4 }
 0x295   : > { %v1891_v16 = vadd.f32 %v1763_v42, %v1092_v63  ;;  %4272 = vmatpush3.xpose.msra.mxu0 %v5054_v13  ;;  %4305 = vmatpush3.xpose.msra.mxu1 %v5052_v8  ;;  %v1907_v17 = vadd.f32 %v1779_v12, %v1108_v6  ;;  %v5056_v33 = vpop.eup %5055  ;;  %v1087_v8 = vadd.f32 %v6312_v19, %v868_v62  ;;  %v867_v42 = vld [vmem:[%s6042_s12 + $0x138] sm:$0xff] }
 0x296   : > { %v1363_v20 = vpop.permute.xlu0 %1362  ;;  %4273 = vmatprep.subr.mxu0 %v5672_v48  ;;  %4306 = vmatprep.subr.mxu1 %v5672_v48  ;;  %v1430_v34 = vpop.permute.xlu1 %1429 }
 0x297   : > { %5069 = vtanh.f32 %v1891_v16  ;;  %v1762_v43 = vmul.f32 %v6151_v0, %v1363_v20  ;;  %v1778_v22 = vmul.f32 %v6151_v0, %v1430_v34  ;;  %v883_v16 = vld [vmem:[%s6042_s12 + $0x1b8] sm:$0xff] }
 0x298   : > { %v5058_v24 = vpop.eup %5057  ;;  %1642 = vbcast.lane.b32.xlu0 %v6359_v15, 376  ;;  %1709 = vbcast.lane.b32.xlu1 %v6362_v58, 376  ;;  %5071 = vtanh.f32 %v1907_v17  ;;  %v1102_v21 = vadd.f32 %v6316_v23, %v883_v16 }
 0x299   : > { %v1890_v60 = vadd.f32 %v1762_v43, %v1091_v14  ;;  %4274 = vmatpush3.xpose.msra.mxu0 %v5058_v24  ;;  %4307 = vmatpush3.xpose.msra.mxu1 %v5056_v33  ;;  %v1906_v3 = vadd.f32 %v1778_v22, %v1107_v18  ;;  %v5060_v29 = vpop.eup %5059  ;;  %v1086_v33 = vadd.f32 %v6312_v19, %v867_v42  ;;  %v866_v43 = vld [vmem:[%s6042_s12 + $0x130] sm:$0xff]  ;;  %v5258_v42 = vld [vmem:[#allocation2] sm:$0xff] }
 0x29a   : > { %v1359_v30 = vpop.permute.xlu0 %1358  ;;  %4308 = vmatprep.subr.mxu1 %v5672_v48  ;;  %4313 = vmatprep.subr.mxu0 %v5672_v48  ;;  %v1426_v31 = vpop.permute.xlu1 %1425 }
 0x29b   : > { %5073 = vtanh.f32 %v1890_v60  ;;  %v1761_v35 = vmul.f32 %v6151_v0, %v1359_v30  ;;  %v1777_v36 = vmul.f32 %v6151_v0, %v1426_v31  ;;  %v882_v60 = vld [vmem:[%s6042_s12 + $0x1b0] sm:$0xff] }
 0x29c   : > { %v5062_v37 = vpop.eup %5061  ;;  %1638 = vbcast.lane.b32.xlu0 %v6359_v15, 368  ;;  %4276 = vmatmul.mubr.f32.vlgmr.msra.gmra.mxu0 %v6374_v26  ;;  %5075 = vtanh.f32 %v1906_v3  ;;  %v1101_v32 = vadd.f32 %v6316_v23, %v882_v60 }
 0x29d   : > { %v1889_v39 = vadd.f32 %v1761_v35, %v1090_v25  ;;  %4309 = vmatpush3.xpose.msra.mxu1 %v5060_v29  ;;  %4314 = vmatpush3.xpose.msra.mxu0 %v5062_v37  ;;  %v1905_v40 = vadd.f32 %v1777_v36, %v1106_v27  ;;  %v5064_v46 = vpop.eup %5063  ;;  %v1085_v29 = vadd.f32 %v6312_v19, %v866_v43  ;;  %v865_v35 = vld [vmem:[%s6042_s12 + $0x128] sm:$0xff] }
 0x29e   : > { %v1355_v47 = vpop.permute.xlu0 %1354  ;;  %1705 = vbcast.lane.b32.xlu1 %v6362_v58, 368  ;;  %4348 = vmatprep.subr.mxu1 %v5672_v48  ;;  %v1422_v49 = vpop.permute.xlu1 %1421 }
 0x29f   : > { %5077 = vtanh.f32 %v1889_v39  ;;  %v1760_v51 = vmul.f32 %v6151_v0, %v1355_v47  ;;  %4315 = vmatprep.subr.mxu0 %v5672_v48  ;;  %v1776_v52 = vmul.f32 %v6151_v0, %v1422_v49  ;;  %4345 = vmatprep.mubr.msk.f32.mxu0 %vm5673_vm1, %v5672_v48  ;;  %v881_v39 = vld [vmem:[%s6042_s12 + $0x1a8] sm:$0xff] }
 0x2a0   : > { %v5066_v53 = vpop.eup %5065  ;;  %4311 = vmatmul.mubr.f32.vlgmr.msra.gmra.mxu1 %v6374_v26  ;;  %1634 = vbcast.lane.b32.xlu0 %v6359_v15, 360  ;;  %5079 = vtanh.f32 %v1905_v40  ;;  %v1100_v50 = vadd.f32 %v6316_v23, %v881_v39 }
 0x2a1   : > { %v1888_v55 = vadd.f32 %v1760_v51, %v1089_v38  ;;  %4316 = vmatpush3.xpose.msra.mxu0 %v5066_v53  ;;  %4349 = vmatpush3.xpose.msra.mxu1 %v5064_v46  ;;  %v1904_v57 = vadd.f32 %v1776_v52, %v1105_v41  ;;  %v5068_v63 = vpop.eup %5067  ;;  %v1084_v46 = vadd.f32 %v6312_v19, %v865_v35  ;;  %v864_v51 = vld [vmem:[%s6042_s12 + $0x120] sm:$0xff] }
 0x2a2   : > { %v1351_v1 = vpop.permute.xlu0 %1350  ;;  %1701 = vbcast.lane.b32.xlu1 %v6362_v58, 360  ;;  %4350 = vmatprep.subr.mxu1 %v5672_v48  ;;  %v1418_v2 = vpop.permute.xlu1 %1417 }
 0x2a3   : > { %5081 = vtanh.f32 %v1888_v55  ;;  %v1759_v5 = vmul.f32 %v6151_v0, %v1351_v1  ;;  %4317 = vmatprep.subr.mxu0 %v5672_v48  ;;  %v1775_v6 = vmul.f32 %v6151_v0, %v1418_v2  ;;  %4380 = vmatprep.mubr.msk.f32.mxu1 %vm5673_vm1, %v5672_v48  ;;  %v6446_v55 = vld [vmem:[#allocation18] ss:$0 sm:$0xff] }
 0x2a4   : > { %v5070_v7 = vpop.eup %5069  ;;  %1630 = vbcast.lane.b32.xlu0 %v6359_v15, 352  ;;  %5083 = vtanh.f32 %v1904_v57 }
 0x2a5   : > { %v1887_v9 = vadd.f32 %v1759_v5, %v1088_v54  ;;  %4318 = vmatpush3.xpose.msra.mxu0 %v5070_v7  ;;  %4351 = vmatpush3.xpose.msra.mxu1 %v5068_v63  ;;  %v1903_v10 = vadd.f32 %v1775_v6, %v1104_v59  ;;  %v5072_v12 = vpop.eup %5071  ;;  %v880_v54 = vld [vmem:[%s6042_s12 + $0x1a0] sm:$0xff]  ;;  %v1083_v63 = vadd.f32 %v6312_v19, %v864_v51  ;;  %v863_v5 = vld [vmem:[%s6042_s12 + $0x118] sm:$0xff] }
 0x2a6   : > { %v1347_v13 = vpop.permute.xlu0 %1346  ;;  %1697 = vbcast.lane.b32.xlu1 %v6362_v58, 352  ;;  %4352 = vmatprep.subr.mxu1 %v5672_v48  ;;  %v1414_v14 = vpop.permute.xlu1 %1413  ;;  %v1099_v4 = vadd.f32 %v6316_v23, %v880_v54 }
 0x2a7   : > { %5085 = vtanh.f32 %v1887_v9  ;;  %v1758_v17 = vmul.f32 %v6151_v0, %v1347_v13  ;;  %4319 = vmatprep.subr.mxu0 %v5672_v48  ;;  %v1774_v18 = vmul.f32 %v6151_v0, %v1414_v14  ;;  %v879_v9 = vld [vmem:[%s6042_s12 + $0x198] sm:$0xff]  ;;  %v1082_v14 = vadd.f32 %v6312_v19, %v863_v5 }
 0x2a8   : > { %v5074_v61 = vpop.eup %5073  ;;  %1626 = vbcast.lane.b32.xlu0 %v6359_v15, 344  ;;  %5087 = vtanh.f32 %v1903_v10  ;;  %v907_v5 = vld [vmem:[%s6042_s12 + $0x278] sm:$0xff] }
 0x2a9   : > { %v1886_v20 = vadd.f32 %v1758_v17, %v1087_v8  ;;  %4320 = vmatpush3.xpose.msra.mxu0 %v5074_v61  ;;  %4353 = vmatpush3.xpose.msra.mxu1 %v5072_v12  ;;  %v1902_v34 = vadd.f32 %v1774_v18, %v1103_v11  ;;  %v5076_v22 = vpop.eup %5075  ;;  %v958_v12 = vcombine.high %v5258_v42, %v5258_v42  ;;  %v862_v61 = vld [vmem:[%s6042_s12 + $0x110] sm:$0xff] }
 0x2aa   : > { %v1343_v24 = vpop.permute.xlu0 %1342  ;;  %1693 = vbcast.lane.b32.xlu1 %v6362_v58, 344  ;;  %4354 = vmatprep.subr.mxu1 %v5672_v48  ;;  %v1410_v25 = vpop.permute.xlu1 %1409  ;;  %v1098_v18 = vadd.f32 %v6316_v23, %v879_v9  ;;  %v1081_v60 = vadd.f32 %v6312_v19, %v862_v61 }
 0x2ab   : > { %5089 = vtanh.f32 %v1886_v20  ;;  %v1757_v3 = vmul.f32 %v6151_v0, %v1343_v24  ;;  %4321 = vmatprep.subr.mxu0 %v5672_v48  ;;  %v1773_v27 = vmul.f32 %v6151_v0, %v1410_v25  ;;  %v972_v24 = vrot.slane %v958_v12, %v6130_v56 }
 0x2ac   : > { %v5078_v28 = vpop.eup %5077  ;;  %1622 = vbcast.lane.b32.xlu0 %v6359_v15, 336  ;;  %5091 = vtanh.f32 %v1902_v34 }
 0x2ad   : > { %v1885_v30 = vadd.f32 %v1757_v3, %v1086_v33  ;;  %4322 = vmatpush3.xpose.msra.mxu0 %v5078_v28  ;;  %4355 = vmatpush3.xpose.msra.mxu1 %v5076_v22  ;;  %v1901_v31 = vadd.f32 %v1773_v27, %v1102_v21  ;;  %v5080_v36 = vpop.eup %5079  ;;  %v878_v33 = vld [vmem:[%s6042_s12 + $0x190] sm:$0xff] }
 0x2ae   : > { %v1339_v37 = vpop.permute.xlu0 %1338  ;;  %1689 = vbcast.lane.b32.xlu1 %v6362_v58, 336  ;;  %4356 = vmatprep.subr.mxu1 %v5672_v48  ;;  %v1406_v38 = vpop.permute.xlu1 %1405  ;;  %v1097_v3 = vadd.f32 %v6316_v23, %v878_v33  ;;  %v922_v33 = vld [vmem:[%s6042_s12 + $0x2f0] sm:$0xff] }
 0x2af   : > { %5093 = vtanh.f32 %v1885_v30  ;;  %v1756_v40 = vmul.f32 %v6151_v0, %v1339_v37  ;;  %4323 = vmatprep.subr.mxu0 %v5672_v48  ;;  %v1772_v41 = vmul.f32 %v6151_v0, %v1406_v38  ;;  %v877_v30 = vld [vmem:[%s6042_s12 + $0x188] sm:$0xff] }
 0x2b0   : > { %v5082_v45 = vpop.eup %5081  ;;  %1618 = vbcast.lane.b32.xlu0 %v6359_v15, 328  ;;  %5095 = vtanh.f32 %v1901_v31  ;;  %v974_v31 = vcombine.high %v972_v24, %v972_v24 }
 0x2b1   : > { %v1884_v47 = vadd.f32 %v1756_v40, %v1085_v29  ;;  %4324 = vmatpush3.xpose.msra.mxu0 %v5082_v45  ;;  %4357 = vmatpush3.xpose.msra.mxu1 %v5080_v36  ;;  %v1900_v49 = vadd.f32 %v1772_v41, %v1101_v32  ;;  %v5084_v52 = vpop.eup %5083  ;;  %v861_v29 = vld [vmem:[%s6042_s12 + $0x108] sm:$0xff]  ;;  %v1096_v41 = vadd.f32 %v6316_v23, %v877_v30 }
 0x2b2   : > { %v1335_v53 = vpop.permute.xlu0 %1334  ;;  %1685 = vbcast.lane.b32.xlu1 %v6362_v58, 328  ;;  %4358 = vmatprep.subr.mxu1 %v5672_v48  ;;  %v1402_v0 = vpop.permute.xlu1 %1401  ;;  %v1080_v40 = vadd.f32 %v6312_v19, %v861_v29  ;;  %v6486_v45 = vrot.slane %v972_v24, %v6130_v56  ;;  %v6491_v51 = vrot.slane %v974_v31, %v6130_v56  ;;  %v921_v29 = vld [vmem:[%s6042_s12 + $0x2e8] sm:$0xff] }
 0x2b3   : > { %5097 = vtanh.f32 %v1884_v47  ;;  %v1755_v57 = vmul.f32 %v6446_v55, %v1335_v53  ;;  %4325 = vmatprep.subr.mxu0 %v5672_v48  ;;  %v1771_v59 = vmul.f32 %v6446_v55, %v1402_v0 }
 0x2b4   : > { %v5086_v62 = vpop.eup %5085  ;;  %1614 = vbcast.lane.b32.xlu0 %v6359_v15, 320  ;;  %5099 = vtanh.f32 %v1900_v49  ;;  %v860_v49 = vld [vmem:[%s6042_s12 + $0x100] sm:$0xff] }
 0x2b5   : > { %v1883_v1 = vadd.f32 %v1755_v57, %v1084_v46  ;;  %4326 = vmatpush3.xpose.msra.mxu0 %v5086_v62  ;;  %4359 = vmatpush3.xpose.msra.mxu1 %v5084_v52  ;;  %v1899_v2 = vadd.f32 %v1771_v59, %v1100_v50  ;;  %v5088_v6 = vpop.eup %5087  ;;  %v876_v50 = vld [vmem:[%s6042_s12 + $0x180] sm:$0xff]  ;;  %v1079_v62 = vadd.f32 %v6312_v19, %v860_v49 }
 0x2b6   : > { %v1331_v7 = vpop.permute.xlu0 %1330  ;;  %1681 = vbcast.lane.b32.xlu1 %v6362_v58, 320  ;;  %4360 = vmatprep.subr.mxu1 %v5672_v48  ;;  %v1398_v8 = vpop.permute.xlu1 %1397 }
 0x2b7   : > { %5101 = vtanh.f32 %v1883_v1  ;;  %v1754_v10 = vmul.f32 %v6446_v55, %v1331_v7  ;;  %4327 = vmatprep.subr.mxu0 %v5672_v48  ;;  %v1770_v11 = vmul.f32 %v6446_v55, %v1398_v8  ;;  %v6503_v1 = vrot.slane %v6486_v45, %v6091_v44 }
 0x2b8   : > { %v5090_v13 = vpop.eup %5089  ;;  %1610 = vbcast.lane.b32.xlu0 %v6359_v15, 312  ;;  %5103 = vtanh.f32 %v1899_v2 }
 0x2b9   : > { %v1882_v16 = vadd.f32 %v1754_v10, %v1083_v63  ;;  %4328 = vmatpush3.xpose.msra.mxu0 %v5090_v13  ;;  %4361 = vmatpush3.xpose.msra.mxu1 %v5088_v6  ;;  %v1898_v17 = vadd.f32 %v1770_v11, %v1099_v4  ;;  %v5092_v20 = vpop.eup %5091  ;;  %v1095_v63 = vadd.f32 %v6316_v23, %v876_v50  ;;  %v923_v23 = vld [vmem:[%s6042_s12 + $0x2f8] sm:$0xff] }
 0x2ba   : > { %v1327_v34 = vpop.permute.xlu0 %1326  ;;  %1677 = vbcast.lane.b32.xlu1 %v6362_v58, 312  ;;  %4362 = vmatprep.subr.mxu1 %v5672_v48  ;;  %v1394_v21 = vpop.permute.xlu1 %1393  ;;  %v6508_v6 = vrot.slane %v6491_v51, %v6091_v44  ;;  %v1126_v42 = vadd.f32 %v6503_v1, %v907_v5 }
 0x2bb   : > { %5105 = vtanh.f32 %v1882_v16  ;;  %v1753_v43 = vmul.f32 %v6446_v55, %v1327_v34  ;;  %4329 = vmatprep.subr.mxu0 %v5672_v48  ;;  %v1769_v22 = vmul.f32 %v6446_v55, %v1394_v21  ;;  %v906_v16 = vld [vmem:[%s6042_s12 + $0x270] sm:$0xff] }
 0x2bc   : > { %v5094_v25 = vpop.eup %5093  ;;  %1606 = vbcast.lane.b32.xlu0 %v6359_v15, 304  ;;  %5107 = vtanh.f32 %v1898_v17 }
 0x2bd   : > { %v1881_v27 = vadd.f32 %v1753_v43, %v1082_v14  ;;  %4330 = vmatpush3.xpose.msra.mxu0 %v5094_v25  ;;  %4363 = vmatpush3.xpose.msra.mxu1 %v5092_v20  ;;  %v1897_v28 = vadd.f32 %v1769_v22, %v1098_v18  ;;  %v5096_v32 = vpop.eup %5095  ;;  %v1142_v14 = vadd.f32 %v6508_v6, %v923_v23 }
 0x2be   : > { %v1323_v35 = vpop.permute.xlu0 %1322  ;;  %1673 = vbcast.lane.b32.xlu1 %v6362_v58, 304  ;;  %4364 = vmatprep.subr.mxu1 %v5672_v48  ;;  %v1390_v36 = vpop.permute.xlu1 %1389  ;;  %v1125_v43 = vadd.f32 %v6503_v1, %v906_v16  ;;  %v1141_v25 = vadd.f32 %v6508_v6, %v922_v33 }
 0x2bf   : > { %5109 = vtanh.f32 %v1881_v27  ;;  %v1752_v37 = vmul.f32 %v6446_v55, %v1323_v35  ;;  %4331 = vmatprep.subr.mxu0 %v5672_v48  ;;  %v1768_v38 = vmul.f32 %v6446_v55, %v1390_v36 }
 0x2c0   : > { %v5098_v39 = vpop.eup %5097  ;;  %1602 = vbcast.lane.b32.xlu0 %v6359_v15, 296  ;;  %5111 = vtanh.f32 %v1897_v28 }
 0x2c1   : > { %v1880_v46 = vadd.f32 %v1752_v37, %v1081_v60  ;;  %4332 = vmatpush3.xpose.msra.mxu0 %v5098_v39  ;;  %4365 = vmatpush3.xpose.msra.mxu1 %v5096_v32  ;;  %v1896_v47 = vadd.f32 %v1768_v38, %v1097_v3  ;;  %v5100_v52 = vpop.eup %5099  ;;  %v905_v60 = vld [vmem:[%s6042_s12 + $0x268] sm:$0xff]  ;;  %v1140_v38 = vadd.f32 %v6508_v6, %v921_v29  ;;  %v904_v39 = vld [vmem:[%s6042_s12 + $0x260] sm:$0xff] }
 0x2c2   : > { %v1319_v53 = vpop.permute.xlu0 %1318  ;;  %1669 = vbcast.lane.b32.xlu1 %v6362_v58, 296  ;;  %4366 = vmatprep.subr.mxu1 %v5672_v48  ;;  %v1386_v0 = vpop.permute.xlu1 %1385  ;;  %v1124_v35 = vadd.f32 %v6503_v1, %v905_v60 }
 0x2c3   : > { %5113 = vtanh.f32 %v1880_v46  ;;  %v1751_v54 = vmul.f32 %v6446_v55, %v1319_v53  ;;  %4333 = vmatprep.subr.mxu0 %v5672_v48  ;;  %v1767_v57 = vmul.f32 %v6446_v55, %v1386_v0  ;;  %v1123_v53 = vadd.f32 %v6503_v1, %v904_v39 }
 0x2c4   : > { %v5102_v59 = vpop.eup %5101  ;;  %1598 = vbcast.lane.b32.xlu0 %v6359_v15, 288  ;;  %5115 = vtanh.f32 %v1896_v47  ;;  %v920_v47 = vld [vmem:[%s6042_s12 + $0x2e0] sm:$0xff] }
 0x2c5   : > { %v1879_v2 = vadd.f32 %v1751_v54, %v1080_v40  ;;  %4334 = vmatpush3.xpose.msra.mxu0 %v5102_v59  ;;  %4367 = vmatpush3.xpose.msra.mxu1 %v5100_v52  ;;  %v1895_v4 = vadd.f32 %v1767_v57, %v1096_v41  ;;  %v5104_v7 = vpop.eup %5103  ;;  %v1139_v57 = vadd.f32 %v6508_v6, %v920_v47  ;;  %v903_v59 = vld [vmem:[%s6042_s12 + $0x258] sm:$0xff] }
 0x2c6   : > { %v1315_v8 = vpop.permute.xlu0 %1314  ;;  %1665 = vbcast.lane.b32.xlu1 %v6362_v58, 288  ;;  %4368 = vmatprep.subr.mxu1 %v5672_v48  ;;  %v1382_v19 = vpop.permute.xlu1 %1381  ;;  %v899_v47 = vld [vmem:[%s6042_s12 + $0x238] sm:$0xff] }
 0x2c7   : > { %5117 = vtanh.f32 %v1879_v2  ;;  %v1750_v9 = vmul.f32 %v6446_v55, %v1315_v8  ;;  %4335 = vmatprep.subr.mxu0 %v5672_v48  ;;  %v1766_v10 = vmul.f32 %v6446_v55, %v1382_v19  ;;  %v1122_v8 = vadd.f32 %v6503_v1, %v903_v59 }
 0x2c8   : > { %v5106_v11 = vpop.eup %5105  ;;  %1594 = vbcast.lane.b32.xlu0 %v6359_v15, 280  ;;  %5119 = vtanh.f32 %v1895_v4  ;;  %v919_v4 = vld [vmem:[%s6042_s12 + $0x2d8] sm:$0xff]  ;;  %v1118_v59 = vadd.f32 %v6503_v1, %v899_v47 }
 0x2c9   : > { %v1878_v12 = vadd.f32 %v1750_v9, %v1079_v62  ;;  %4336 = vmatpush3.xpose.msra.mxu0 %v5106_v11  ;;  %4369 = vmatpush3.xpose.msra.mxu1 %v5104_v7  ;;  %v1894_v13 = vadd.f32 %v1766_v10, %v1095_v63  ;;  %v5108_v17 = vpop.eup %5107  ;;  %v1138_v23 = vadd.f32 %v6508_v6, %v919_v4  ;;  %v902_v9 = vld [vmem:[%s6042_s12 + $0x250] sm:$0xff] }
 0x2ca   : > { %v1509_v18 = vpop.permute.xlu0 %1508  ;;  %1661 = vbcast.lane.b32.xlu1 %v6362_v58, 280  ;;  %4370 = vmatprep.subr.mxu1 %v5672_v48  ;;  %v1576_v61 = vpop.permute.xlu1 %1575  ;;  %v898_v4 = vld [vmem:[%s6042_s12 + $0x230] sm:$0xff] }
 0x2cb   : > { %5121 = vtanh.f32 %v1878_v12  ;;  %v1797_v20 = vmul.f32 %v6446_v55, %v1509_v18  ;;  %4337 = vmatprep.subr.mxu0 %v5672_v48  ;;  %v1813_v34 = vmul.f32 %v6446_v55, %v1576_v61  ;;  %v918_v12 = vld [vmem:[%s6042_s12 + $0x2d0] sm:$0xff] }
 0x2cc   : > { %v5110_v21 = vpop.eup %5109  ;;  %1590 = vbcast.lane.b32.xlu0 %v6359_v15, 272  ;;  %5123 = vtanh.f32 %v1894_v13  ;;  %v1137_v33 = vadd.f32 %v6508_v6, %v918_v12  ;;  %v897_v12 = vld [vmem:[%s6042_s12 + $0x228] sm:$0xff] }
 0x2cd   : > { %v1925_v22 = vadd.f32 %v1797_v20, %v1126_v42  ;;  %4338 = vmatpush3.xpose.msra.mxu0 %v5110_v21  ;;  %4371 = vmatpush3.xpose.msra.mxu1 %v5108_v17  ;;  %v1941_v24 = vadd.f32 %v1813_v34, %v1142_v14  ;;  %v5112_v3 = vpop.eup %5111  ;;  %v1121_v17 = vadd.f32 %v6503_v1, %v902_v9  ;;  %v901_v20 = vld [vmem:[%s6042_s12 + $0x248] sm:$0xff] }
 0x2ce   : > { %v1505_v27 = vpop.permute.xlu0 %1504  ;;  %1657 = vbcast.lane.b32.xlu1 %v6362_v58, 272  ;;  %4372 = vmatprep.subr.mxu1 %v5672_v48  ;;  %v1572_v28 = vpop.permute.xlu1 %1571  ;;  %v1117_v9 = vadd.f32 %v6503_v1, %v898_v4 }
 0x2cf   : > { %5125 = vtanh.f32 %v1925_v22  ;;  %v1796_v30 = vmul.f32 %v6446_v55, %v1505_v27  ;;  %4339 = vmatprep.subr.mxu0 %v5672_v48  ;;  %v1812_v31 = vmul.f32 %v6446_v55, %v1572_v28  ;;  %v917_v22 = vld [vmem:[%s6042_s12 + $0x2c8] sm:$0xff] }
 0x2d0   : > { %v5114_v32 = vpop.eup %5113  ;;  %1586 = vbcast.lane.b32.xlu0 %v6359_v15, 264  ;;  %5127 = vtanh.f32 %v1941_v24  ;;  %v1136_v29 = vadd.f32 %v6508_v6, %v917_v22  ;;  %v896_v22 = vld [vmem:[%s6042_s12 + $0x220] sm:$0xff] }
 0x2d1   : > { %v1924_v36 = vadd.f32 %v1796_v30, %v1125_v43  ;;  %4340 = vmatpush3.xpose.msra.mxu0 %v5114_v32  ;;  %4373 = vmatpush3.xpose.msra.mxu1 %v5112_v3  ;;  %v1940_v37 = vadd.f32 %v1812_v31, %v1141_v25  ;;  %v5116_v40 = vpop.eup %5115  ;;  %v1120_v3 = vadd.f32 %v6503_v1, %v901_v20  ;;  %v900_v30 = vld [vmem:[%s6042_s12 + $0x240] sm:$0xff] }
 0x2d2   : > { %v1501_v41 = vpop.permute.xlu0 %1500  ;;  %1653 = vbcast.lane.b32.xlu1 %v6362_v58, 264  ;;  %4374 = vmatprep.subr.mxu1 %v5672_v48  ;;  %v1568_v46 = vpop.permute.xlu1 %1567  ;;  %v1119_v39 = vadd.f32 %v6503_v1, %v900_v30  ;;  %v1116_v20 = vadd.f32 %v6503_v1, %v897_v12  ;;  %v1115_v30 = vadd.f32 %v6503_v1, %v896_v22 }
 0x2d3   : > { %5129 = vtanh.f32 %v1924_v36  ;;  %v1795_v49 = vmul.f32 %v6446_v55, %v1501_v41  ;;  %4341 = vmatprep.subr.mxu0 %v5672_v48  ;;  %v1811_v50 = vmul.f32 %v6446_v55, %v1568_v46  ;;  %v916_v36 = vld [vmem:[%s6042_s12 + $0x2c0] sm:$0xff] }
 0x2d4   : > { %v5118_v52 = vpop.eup %5117  ;;  %1582 = vbcast.lane.b32.xlu0 %v6359_v15, 256  ;;  %5131 = vtanh.f32 %v1940_v37  ;;  %v1135_v46 = vadd.f32 %v6508_v6, %v916_v36  ;;  %v895_v36 = vld [vmem:[%s6042_s12 + $0x218] sm:$0xff] }
 0x2d5   : > { %v1923_v0 = vadd.f32 %v1795_v49, %v1124_v35  ;;  %4342 = vmatpush3.xpose.msra.mxu0 %v5118_v52  ;;  %4375 = vmatpush3.xpose.msra.mxu1 %v5116_v40  ;;  %v1939_v54 = vadd.f32 %v1811_v50, %v1140_v38  ;;  %v5120_v62 = vpop.eup %5119  ;;  %v1114_v47 = vadd.f32 %v6503_v1, %v895_v36 }
 0x2d6   : > { %v1497_v63 = vpop.permute.xlu0 %1496  ;;  %1649 = vbcast.lane.b32.xlu1 %v6362_v58, 256  ;;  %4343 = vmatprep.subr.mxu0 %v5672_v48  ;;  %v1564_v2 = vpop.permute.xlu1 %1563 }
 0x2d7   : > { %5133 = vtanh.f32 %v1923_v0  ;;  %v1794_v15 = vmul.f32 %v6446_v55, %v1497_v63  ;;  %4376 = vmatprep.subr.mxu1 %v5672_v48  ;;  %v1810_v5 = vmul.f32 %v6446_v55, %v1564_v2 }
 0x2d8   : > { %v5122_v7 = vpop.eup %5121  ;;  %5135 = vtanh.f32 %v1939_v54 }
 0x2d9   : > { %v1922_v19 = vadd.f32 %v1794_v15, %v1123_v53  ;;  %4344 = vmatpush3.xpose.msra.mxu0 %v5122_v7  ;;  %4377 = vmatpush3.xpose.msra.mxu1 %v5120_v62  ;;  %v1938_v58 = vadd.f32 %v1810_v5, %v1139_v57  ;;  %v5124_v10 = vpop.eup %5123  ;;  %v915_v53 = vld [vmem:[%s6042_s12 + $0x2b8] sm:$0xff] }
 0x2da   : > { %v1493_v11 = vpop.permute.xlu0 %1492  ;;  %4378 = vmatprep.subr.mxu1 %v5672_v48  ;;  %4383 = vmatprep.subr.mxu0 %v5672_v48  ;;  %v1560_v42 = vpop.permute.xlu1 %1559  ;;  %v1134_v2 = vadd.f32 %v6508_v6, %v915_v53  ;;  %v894_v53 = vld [vmem:[%s6042_s12 + $0x210] sm:$0xff] }
 0x2db   : > { %5137 = vtanh.f32 %v1922_v19  ;;  %v1793_v13 = vmul.f32 %v6446_v55, %v1493_v11  ;;  %v1809_v14 = vmul.f32 %v6446_v55, %v1560_v42  ;;  %v1113_v4 = vadd.f32 %v6503_v1, %v894_v53 }
 0x2dc   : > { %v5126_v16 = vpop.eup %5125  ;;  %4346 = vmatmul.mubr.f32.vlgmr.msra.gmra.mxu0 %v6374_v26  ;;  %5139 = vtanh.f32 %v1938_v58 }
 0x2dd   : > { %v1921_v18 = vadd.f32 %v1793_v13, %v1122_v8  ;;  %4379 = vmatpush3.xpose.msra.mxu1 %v5124_v10  ;;  %4384 = vmatpush3.xpose.msra.mxu0 %v5126_v16  ;;  %v1937_v61 = vadd.f32 %v1809_v14, %v1138_v23  ;;  %v5128_v34 = vpop.eup %5127  ;;  %v914_v8 = vld [vmem:[%s6042_s12 + $0x2b0] sm:$0xff] }
 0x2de   : > { %v1489_v21 = vpop.permute.xlu0 %1488  ;;  %4385 = vmatprep.subr.mxu0 %v5672_v48  ;;  %4418 = vmatprep.subr.mxu1 %v5672_v48  ;;  %v1556_v43 = vpop.permute.xlu1 %1555  ;;  %v1133_v42 = vadd.f32 %v6508_v6, %v914_v8  ;;  %v893_v8 = vld [vmem:[%s6042_s12 + $0x208] sm:$0xff] }
 0x2df   : > { %5141 = vtanh.f32 %v1921_v18  ;;  %v1792_v24 = vmul.f32 %v6446_v55, %v1489_v21  ;;  %v1808_v25 = vmul.f32 %v6446_v55, %v1556_v43  ;;  %4415 = vmatprep.mubr.msk.f32.mxu0 %vm5673_vm1, %v5672_v48  ;;  %v1112_v12 = vadd.f32 %v6503_v1, %v893_v8 }
 0x2e0   : > { %v5130_v60 = vpop.eup %5129  ;;  %4381 = vmatmul.mubr.f32.vlgmr.msra.gmra.mxu1 %v6374_v26  ;;  %5143 = vtanh.f32 %v1937_v61 }
 0x2e1   : > { %v1920_v27 = vadd.f32 %v1792_v24, %v1121_v17  ;;  %4386 = vmatpush3.xpose.msra.mxu0 %v5130_v60  ;;  %4419 = vmatpush3.xpose.msra.mxu1 %v5128_v34  ;;  %v1936_v28 = vadd.f32 %v1808_v25, %v1137_v33  ;;  %v5132_v31 = vpop.eup %5131  ;;  %v913_v17 = vld [vmem:[%s6042_s12 + $0x2a8] sm:$0xff] }
 0x2e2   : > { %v1485_v32 = vpop.permute.xlu0 %1484  ;;  %4387 = vmatprep.subr.mxu0 %v5672_v48  ;;  %4420 = vmatprep.subr.mxu1 %v5672_v48  ;;  %v1552_v35 = vpop.permute.xlu1 %1551  ;;  %v1132_v43 = vadd.f32 %v6508_v6, %v913_v17 }
 0x2e3   : > { %5145 = vtanh.f32 %v1920_v27  ;;  %v1791_v26 = vmul.f32 %v6446_v55, %v1485_v32  ;;  %v1807_v37 = vmul.f32 %v6446_v55, %v1552_v35  ;;  %4450 = vmatprep.mubr.msk.f32.mxu1 %vm5673_vm1, %v5672_v48 }
 0x2e4   : > { %v5134_v38 = vpop.eup %5133  ;;  %5147 = vtanh.f32 %v1936_v28 }
 0x2e5   : > { %v1919_v40 = vadd.f32 %v1791_v26, %v1120_v3  ;;  %4388 = vmatpush3.xpose.msra.mxu0 %v5134_v38  ;;  %4421 = vmatpush3.xpose.msra.mxu1 %v5132_v31  ;;  %v1935_v41 = vadd.f32 %v1807_v37, %v1136_v29  ;;  %v5136_v49 = vpop.eup %5135  ;;  %v912_v3 = vld [vmem:[%s6042_s12 + $0x2a0] sm:$0xff] }
 0x2e6   : > { %v1481_v50 = vpop.permute.xlu0 %1480  ;;  %4389 = vmatprep.subr.mxu0 %v5672_v48  ;;  %4422 = vmatprep.subr.mxu1 %v5672_v48  ;;  %v1548_v52 = vpop.permute.xlu1 %1547  ;;  %v1131_v35 = vadd.f32 %v6508_v6, %v912_v3 }
 0x2e7   : > { %5149 = vtanh.f32 %v1919_v40  ;;  %v1790_v0 = vmul.f32 %v6446_v55, %v1481_v50  ;;  %v1806_v54 = vmul.f32 %v6446_v55, %v1548_v52 }
 0x2e8   : > { %v5138_v57 = vpop.eup %5137  ;;  %5151 = vtanh.f32 %v1935_v41 }
 0x2e9   : > { %v1918_v62 = vadd.f32 %v1790_v0, %v1119_v39  ;;  %4390 = vmatpush3.xpose.msra.mxu0 %v5138_v57  ;;  %4423 = vmatpush3.xpose.msra.mxu1 %v5136_v49  ;;  %v1934_v63 = vadd.f32 %v1806_v54, %v1135_v46  ;;  %v5140_v15 = vpop.eup %5139  ;;  %v911_v39 = vld [vmem:[%s6042_s12 + $0x298] sm:$0xff] }
 0x2ea   : > { %v1477_v5 = vpop.permute.xlu0 %1476  ;;  %4391 = vmatprep.subr.mxu0 %v5672_v48  ;;  %4424 = vmatprep.subr.mxu1 %v5672_v48  ;;  %v1544_v7 = vpop.permute.xlu1 %1543  ;;  %v1130_v52 = vadd.f32 %v6508_v6, %v911_v39 }
 0x2eb   : > { %5153 = vtanh.f32 %v1918_v62  ;;  %v1789_v19 = vmul.f32 %v6446_v55, %v1477_v5  ;;  %v1805_v58 = vmul.f32 %v6446_v55, %v1544_v7 }
 0x2ec   : > { %v5142_v23 = vpop.eup %5141  ;;  %5155 = vtanh.f32 %v1934_v63 }
 0x2ed   : > { %v1917_v10 = vadd.f32 %v1789_v19, %v1118_v59  ;;  %4392 = vmatpush3.xpose.msra.mxu0 %v5142_v23  ;;  %4425 = vmatpush3.xpose.msra.mxu1 %v5140_v15  ;;  %v1933_v11 = vadd.f32 %v1805_v58, %v1134_v2  ;;  %v5144_v13 = vpop.eup %5143  ;;  %v910_v59 = vld [vmem:[%s6042_s12 + $0x290] sm:$0xff]  ;;  %v909_v19 = vld [vmem:[%s6042_s12 + $0x288] sm:$0xff] }
 0x2ee   : > { %v1473_v14 = vpop.permute.xlu0 %1472  ;;  %4393 = vmatprep.subr.mxu0 %v5672_v48  ;;  %4426 = vmatprep.subr.mxu1 %v5672_v48  ;;  %v1540_v16 = vpop.permute.xlu1 %1539  ;;  %v1129_v7 = vadd.f32 %v6508_v6, %v910_v59  ;;  %v937_v59 = vld [vmem:[%s6042_s12 + $0x368] sm:$0xff] }
 0x2ef   : > { %5157 = vtanh.f32 %v1917_v10  ;;  %v1788_v18 = vmul.f32 %v6446_v55, %v1473_v14  ;;  %v1804_v61 = vmul.f32 %v6446_v55, %v1540_v16  ;;  %v1004_v14 = vcombine.high %v6486_v45, %v6486_v45 }
 0x2f0   : > { %v5146_v33 = vpop.eup %5145  ;;  %5159 = vtanh.f32 %v1933_v11 }
 0x2f1   : > { %v1916_v34 = vadd.f32 %v1788_v18, %v1117_v9  ;;  %4394 = vmatpush3.xpose.msra.mxu0 %v5146_v33  ;;  %4427 = vmatpush3.xpose.msra.mxu1 %v5144_v13  ;;  %v1932_v21 = vadd.f32 %v1804_v61, %v1133_v42  ;;  %v5148_v24 = vpop.eup %5147  ;;  %v1128_v13 = vadd.f32 %v6508_v6, %v909_v19  ;;  %v892_v18 = vld [vmem:[%s6042_s12 + $0x200] sm:$0xff] }
 0x2f2   : > { %v1469_v25 = vpop.permute.xlu0 %1468  ;;  %4395 = vmatprep.subr.mxu0 %v5672_v48  ;;  %4428 = vmatprep.subr.mxu1 %v5672_v48  ;;  %v1536_v60 = vpop.permute.xlu1 %1535  ;;  %v908_v61 = vld [vmem:[%s6042_s12 + $0x280] sm:$0xff]  ;;  %v1006_v33 = vcombine.high %v6491_v51, %v6491_v51  ;;  %v6657_v51 = vrot.slane %v1004_v14, %v6091_v44 }
 0x2f3   : > { %5161 = vtanh.f32 %v1916_v34  ;;  %v1787_v27 = vmul.f32 %v6446_v55, %v1469_v25  ;;  %v1803_v28 = vmul.f32 %v6446_v55, %v1536_v60  ;;  %v1127_v25 = vadd.f32 %v6508_v6, %v908_v61  ;;  %v955_v6 = vld [vmem:[%s6042_s12 + $0x3f8] sm:$0xff] }
 0x2f4   : > { %v5150_v29 = vpop.eup %5149  ;;  %5163 = vtanh.f32 %v1932_v21  ;;  %v1156_v8 = vadd.f32 %v6657_v51, %v937_v59 }
 0x2f5   : > { %v1915_v31 = vadd.f32 %v1787_v27, %v1116_v20  ;;  %4396 = vmatpush3.xpose.msra.mxu0 %v5150_v29  ;;  %4429 = vmatpush3.xpose.msra.mxu1 %v5148_v24  ;;  %v1931_v32 = vadd.f32 %v1803_v28, %v1132_v43  ;;  %v5152_v26 = vpop.eup %5151  ;;  %v1111_v24 = vadd.f32 %v6503_v1, %v892_v18  ;;  %v939_v27 = vld [vmem:[%s6042_s12 + $0x378] sm:$0xff] }
 0x2f6   : > { %v1465_v37 = vpop.permute.xlu0 %1464  ;;  %4397 = vmatprep.subr.mxu0 %v5672_v48  ;;  %4430 = vmatprep.subr.mxu1 %v5672_v48  ;;  %v1532_v38 = vpop.permute.xlu1 %1531  ;;  %v6661_v28 = vrot.slane %v1006_v33, %v6091_v44  ;;  %v1158_v36 = vadd.f32 %v6657_v51, %v939_v27  ;;  %v935_v33 = vld [vmem:[%s6042_s12 + $0x358] sm:$0xff] }
 0x2f7   : > { %5165 = vtanh.f32 %v1915_v31  ;;  %v1786_v40 = vmul.f32 %v6446_v55, %v1465_v37  ;;  %v1802_v41 = vmul.f32 %v6446_v55, %v1532_v38 }
 0x2f8   : > { %v5154_v46 = vpop.eup %5153  ;;  %5167 = vtanh.f32 %v1931_v32  ;;  %v1174_v37 = vadd.f32 %v6661_v28, %v955_v6 }
 0x2f9   : > { %v1914_v49 = vadd.f32 %v1786_v40, %v1115_v30  ;;  %4398 = vmatpush3.xpose.msra.mxu0 %v5154_v46  ;;  %4431 = vmatpush3.xpose.msra.mxu1 %v5152_v26  ;;  %v1930_v50 = vadd.f32 %v1802_v41, %v1131_v35  ;;  %v5156_v0 = vpop.eup %5155  ;;  %v938_v41 = vld [vmem:[%s6042_s12 + $0x370] sm:$0xff] }
 0x2fa   : > { %v1461_v54 = vpop.permute.xlu0 %1460  ;;  %4399 = vmatprep.subr.mxu0 %v5672_v48  ;;  %4432 = vmatprep.subr.mxu1 %v5672_v48  ;;  %v1528_v57 = vpop.permute.xlu1 %1527 }
 0x2fb   : > { %5169 = vtanh.f32 %v1914_v49  ;;  %v1785_v62 = vmul.f32 %v6446_v55, %v1461_v54  ;;  %v1801_v63 = vmul.f32 %v6446_v55, %v1528_v57 }
 0x2fc   : > { %v5158_v2 = vpop.eup %5157  ;;  %5171 = vtanh.f32 %v1930_v50  ;;  %v954_v50 = vld [vmem:[%s6042_s12 + $0x3f0] sm:$0xff] }
 0x2fd   : > { %v1913_v15 = vadd.f32 %v1785_v62, %v1114_v47  ;;  %4400 = vmatpush3.xpose.msra.mxu0 %v5158_v2  ;;  %4433 = vmatpush3.xpose.msra.mxu1 %v5156_v0  ;;  %v1929_v5 = vadd.f32 %v1801_v63, %v1130_v52  ;;  %v5160_v58 = vpop.eup %5159  ;;  %v1157_v0 = vadd.f32 %v6657_v51, %v938_v41 }
 0x2fe   : > { %v1457_v23 = vpop.permute.xlu0 %1456  ;;  %4401 = vmatprep.subr.mxu0 %v5672_v48  ;;  %4434 = vmatprep.subr.mxu1 %v5672_v48  ;;  %v1524_v9 = vpop.permute.xlu1 %1523  ;;  %v1173_v63 = vadd.f32 %v6661_v28, %v954_v50 }
 0x2ff   : > { %5173 = vtanh.f32 %v1913_v15  ;;  %v1784_v10 = vmul.f32 %v6446_v55, %v1457_v23  ;;  %v1800_v11 = vmul.f32 %v6446_v55, %v1524_v9  ;;  %v953_v15 = vld [vmem:[%s6042_s12 + $0x3e8] sm:$0xff]  ;;  %v936_v23 = vld [vmem:[%s6042_s12 + $0x360] sm:$0xff] }
 0x300   : > { %v5162_v42 = vpop.eup %5161  ;;  %5175 = vtanh.f32 %v1929_v5 }
 0x301   : > { %v1912_v16 = vadd.f32 %v1784_v10, %v1113_v4  ;;  %4402 = vmatpush3.xpose.msra.mxu0 %v5162_v42  ;;  %4435 = vmatpush3.xpose.msra.mxu1 %v5160_v58  ;;  %v1928_v17 = vadd.f32 %v1800_v11, %v1129_v7  ;;  %v5164_v20 = vpop.eup %5163  ;;  %v1172_v11 = vadd.f32 %v6661_v28, %v953_v15 }
 0x302   : > { %v1453_v34 = vpop.permute.xlu0 %1452  ;;  %4403 = vmatprep.subr.mxu0 %v5672_v48  ;;  %4436 = vmatprep.subr.mxu1 %v5672_v48  ;;  %v1520_v21 = vpop.permute.xlu1 %1519 }
 0x303   : > { %5177 = vtanh.f32 %v1912_v16  ;;  %v1783_v45 = vmul.f32 %v6446_v55, %v1453_v34  ;;  %v1799_v43 = vmul.f32 %v6446_v55, %v1520_v21 }
 0x304   : > { %v5166_v22 = vpop.eup %5165  ;;  %5179 = vtanh.f32 %v1928_v17  ;;  %v1155_v17 = vadd.f32 %v6657_v51, %v936_v23 }
 0x305   : > { %v1911_v60 = vadd.f32 %v1783_v45, %v1112_v12  ;;  %4404 = vmatpush3.xpose.msra.mxu0 %v5166_v22  ;;  %4437 = vmatpush3.xpose.msra.mxu1 %v5164_v20  ;;  %v1927_v3 = vadd.f32 %v1799_v43, %v1128_v13  ;;  %v5168_v29 = vpop.eup %5167  ;;  %v952_v13 = vld [vmem:[%s6042_s12 + $0x3e0] sm:$0xff]  ;;  %v951_v22 = vld [vmem:[%s6042_s12 + $0x3d8] sm:$0xff] }
 0x306   : > { %v1449_v30 = vpop.permute.xlu0 %1448  ;;  %4405 = vmatprep.subr.mxu0 %v5672_v48  ;;  %4438 = vmatprep.subr.mxu1 %v5672_v48  ;;  %v1516_v1 = vpop.permute.xlu1 %1515  ;;  %v1171_v21 = vadd.f32 %v6661_v28, %v952_v13  ;;  %v1170_v6 = vadd.f32 %v6661_v28, %v951_v22 }
 0x307   : > { %5181 = vtanh.f32 %v1911_v60  ;;  %v1782_v31 = vmul.f32 %v6446_v55, %v1449_v30  ;;  %v1798_v32 = vmul.f32 %v6446_v55, %v1516_v1  ;;  %v1154_v60 = vadd.f32 %v6657_v51, %v935_v33 }
 0x308   : > { %v5170_v35 = vpop.eup %5169  ;;  %5183 = vtanh.f32 %v1927_v3 }
 0x309   : > { %v1910_v44 = vadd.f32 %v1782_v31, %v1111_v24  ;;  %4406 = vmatpush3.xpose.msra.mxu0 %v5170_v35  ;;  %4439 = vmatpush3.xpose.msra.mxu1 %v5168_v29  ;;  %v1926_v26 = vadd.f32 %v1798_v32, %v1127_v25  ;;  %v5172_v38 = vpop.eup %5171  ;;  %v934_v29 = vld [vmem:[%s6042_s12 + $0x350] sm:$0xff] }
 0x30a   : > { %v1643_v39 = vpop.permute.xlu0 %1642  ;;  %4407 = vmatprep.subr.mxu0 %v5672_v48  ;;  %4440 = vmatprep.subr.mxu1 %v5672_v48  ;;  %v1710_v40 = vpop.permute.xlu1 %1709  ;;  %v6706_v32 = vld [vmem:[#allocation20] sm:$0x1] }
 0x30b   : > { %5185 = vtanh.f32 %v1910_v44  ;;  %v1829_v46 = vmul.f32 %v6446_v55, %v1643_v39  ;;  %v1845_v47 = vmul.f32 %v6446_v55, %v1710_v40  ;;  %v933_v40 = vld [vmem:[%s6042_s12 + $0x348] sm:$0xff] }
 0x30c   : > { %v5174_v49 = vpop.eup %5173  ;;  %5187 = vtanh.f32 %v1926_v26 }
 0x30d   : > { %v1957_v52 = vadd.f32 %v1829_v46, %v1158_v36  ;;  %4408 = vmatpush3.xpose.msra.mxu0 %v5174_v49  ;;  %4441 = vmatpush3.xpose.msra.mxu1 %v5172_v38  ;;  %v1973_v53 = vadd.f32 %v1845_v47, %v1174_v37  ;;  %v5176_v54 = vpop.eup %5175  ;;  %v950_v36 = vld [vmem:[%s6042_s12 + $0x3d0] sm:$0xff]  ;;  %v1153_v37 = vadd.f32 %v6657_v51, %v934_v29 }
 0x30e   : > { %v1639_v57 = vpop.permute.xlu0 %1638  ;;  %4409 = vmatprep.subr.mxu0 %v5672_v48  ;;  %4442 = vmatprep.subr.mxu1 %v5672_v48  ;;  %v6715_v46 = vld [vmem:[#allocation18] ss:$0 sm:$0xff]  ;;  %v1169_v49 = vadd.f32 %v6661_v28, %v950_v36 }
 0x30f   : > { %5189 = vtanh.f32 %v1957_v52  ;;  %v1828_v62 = vmul.f32 %v6446_v55, %v1639_v57  ;;  %v949_v52 = vld [vmem:[%s6042_s12 + $0x3c8] sm:$0xff] }
 0x310   : > { %v5178_v2 = vpop.eup %5177  ;;  %v1706_v4 = vpop.permute.xlu1 %1705  ;;  %5191 = vtanh.f32 %v1973_v53 }
 0x311   : > { %v1956_v5 = vadd.f32 %v1828_v62, %v1157_v0  ;;  %4410 = vmatpush3.xpose.msra.mxu0 %v5178_v2  ;;  %4443 = vmatpush3.xpose.msra.mxu1 %v5176_v54  ;;  %v1844_v7 = vmul.f32 %v6446_v55, %v1706_v4  ;;  %v5180_v19 = vpop.eup %5179  ;;  %v1152_v54 = vadd.f32 %v6657_v51, %v933_v40  ;;  %v932_v62 = vld [vmem:[%s6042_s12 + $0x340] sm:$0xff] }
 0x312   : > { %v1635_v58 = vpop.permute.xlu0 %1634  ;;  %4411 = vmatprep.subr.mxu0 %v5672_v48  ;;  %4444 = vmatprep.subr.mxu1 %v5672_v48  ;;  %v1168_v4 = vadd.f32 %v6661_v28, %v949_v52 }
 0x313   : > { %5193 = vtanh.f32 %v1956_v5  ;;  %v1972_v9 = vadd.f32 %v1844_v7, %v1173_v63  ;;  %v1827_v10 = vmul.f32 %v6446_v55, %v1635_v58  ;;  %v948_v7 = vld [vmem:[%s6042_s12 + $0x3c0] sm:$0xff]  ;;  %v1151_v58 = vadd.f32 %v6657_v51, %v932_v62 }
 0x314   : > { %v5182_v42 = vpop.eup %5181  ;;  %v1702_v12 = vpop.permute.xlu1 %1701 }
 0x315   : > { %5195 = vtanh.f32 %v1972_v9  ;;  %v1955_v14 = vadd.f32 %v1827_v10, %v1156_v8  ;;  %4412 = vmatpush3.xpose.msra.mxu0 %v5182_v42  ;;  %4445 = vmatpush3.xpose.msra.mxu1 %v5180_v19  ;;  %v1843_v16 = vmul.f32 %v6446_v55, %v1702_v12  ;;  %v5184_v18 = vpop.eup %5183  ;;  %v931_v10 = vld [vmem:[%s6042_s12 + $0x338] sm:$0xff]  ;;  %v1167_v12 = vadd.f32 %v6661_v28, %v948_v7 }
 0x316   : > { %v1631_v61 = vpop.permute.xlu0 %1630  ;;  %4413 = vmatprep.subr.mxu0 %v5672_v48  ;;  %4446 = vmatprep.subr.mxu1 %v5672_v48 }
 0x317   : > { %5197 = vtanh.f32 %v1955_v14  ;;  %v1971_v20 = vadd.f32 %v1843_v16, %v1172_v11  ;;  %v1826_v34 = vmul.f32 %v6446_v55, %v1631_v61  ;;  %v947_v16 = vld [vmem:[%s6042_s12 + $0x3b8] sm:$0xff]  ;;  %v1150_v61 = vadd.f32 %v6657_v51, %v931_v10 }
 0x318   : > { %v5186_v45 = vpop.eup %5185  ;;  %v1698_v43 = vpop.permute.xlu1 %1697 }
 0x319   : > { %5199 = vtanh.f32 %v1971_v20  ;;  %v1954_v24 = vadd.f32 %v1826_v34, %v1155_v17  ;;  %4414 = vmatpush3.xpose.msra.mxu0 %v5186_v45  ;;  %4447 = vmatpush3.xpose.msra.mxu1 %v5184_v18  ;;  %v1842_v25 = vmul.f32 %v6446_v55, %v1698_v43  ;;  %v5188_v3 = vpop.eup %5187  ;;  %v930_v34 = vld [vmem:[%s6042_s12 + $0x330] sm:$0xff]  ;;  %v1166_v43 = vadd.f32 %v6661_v28, %v947_v16 }
 0x31a   : > { %v1627_v27 = vpop.permute.xlu0 %1626  ;;  %4448 = vmatprep.subr.mxu1 %v5672_v48  ;;  %4453 = vmatprep.subr.mxu0 %v5672_v48 }
 0x31b   : > { %5201 = vtanh.f32 %v1954_v24  ;;  %v1970_v30 = vadd.f32 %v1842_v25, %v1171_v21  ;;  %v1825_v1 = vmul.f32 %v6446_v55, %v1627_v27  ;;  %v946_v25 = vld [vmem:[%s6042_s12 + $0x3b0] sm:$0xff]  ;;  %v1149_v27 = vadd.f32 %v6657_v51, %v930_v34 }
 0x31c   : > { %v5190_v31 = vpop.eup %5189  ;;  %4416 = vmatmul.mubr.f32.vlgmr.msra.gmra.mxu0 %v6706_v32  ;;  %v1694_v35 = vpop.permute.xlu1 %1693 }
 0x31d   : > { %5203 = vtanh.f32 %v1970_v30  ;;  %v1953_v44 = vadd.f32 %v1825_v1, %v1154_v60  ;;  %4449 = vmatpush3.xpose.msra.mxu1 %v5188_v3  ;;  %4454 = vmatpush3.xpose.msra.mxu0 %v5190_v31  ;;  %v1841_v26 = vmul.f32 %v6446_v55, %v1694_v35  ;;  %v5192_v38 = vpop.eup %5191  ;;  %v929_v1 = vld [vmem:[%s6042_s12 + $0x328] sm:$0xff]  ;;  %v1165_v35 = vadd.f32 %v6661_v28, %v946_v25 }
 0x31e   : > { %v1623_v39 = vpop.permute.xlu0 %1622  ;;  %4455 = vmatprep.subr.mxu0 %v5672_v48  ;;  %4488 = vmatprep.subr.mxu1 %v5672_v48 }
 0x31f   : > { %5205 = vtanh.f32 %v1953_v44  ;;  %v1969_v41 = vadd.f32 %v1841_v26, %v1170_v6  ;;  %v1824_v47 = vmul.f32 %v6715_v46, %v1623_v39  ;;  %4485 = vmatprep.mubr.msk.f32.mxu0 %vm5673_vm1, %v5672_v48  ;;  %v945_v26 = vld [vmem:[%s6042_s12 + $0x3a8] sm:$0xff]  ;;  %v1148_v39 = vadd.f32 %v6657_v51, %v929_v1 }
 0x320   : > { %v5194_v55 = vpop.eup %5193  ;;  %4451 = vmatmul.mubr.f32.vlgmr.msra.gmra.mxu1 %v6706_v32  ;;  %v1690_v50 = vpop.permute.xlu1 %1689 }
 0x321   : > { %5207 = vtanh.f32 %v1969_v41  ;;  %v1952_v53 = vadd.f32 %v1824_v47, %v1153_v37  ;;  %4456 = vmatpush3.xpose.msra.mxu0 %v5194_v55  ;;  %4489 = vmatpush3.xpose.msra.mxu1 %v5192_v38  ;;  %v1840_v0 = vmul.f32 %v6715_v46, %v1690_v50  ;;  %v928_v47 = vld [vmem:[%s6042_s12 + $0x320] sm:$0xff]  ;;  %v1164_v50 = vadd.f32 %v6661_v28, %v945_v26 }
 0x322   : > { %v5196_v57 = vpop.eup %5195  ;;  %v1619_v59 = vpop.permute.xlu0 %1618  ;;  %4457 = vmatprep.subr.mxu0 %v5672_v48  ;;  %4490 = vmatprep.subr.mxu1 %v5672_v48 }
 0x323   : > { %5209 = vtanh.f32 %v1952_v53  ;;  %v1968_v63 = vadd.f32 %v1840_v0, %v1169_v49  ;;  %v1823_v2 = vmul.f32 %v6715_v46, %v1619_v59  ;;  %4520 = vmatprep.mubr.msk.f32.mxu1 %vm5673_vm1, %v5672_v48  ;;  %v944_v0 = vld [vmem:[%s6042_s12 + $0x3a0] sm:$0xff]  ;;  %v1147_v59 = vadd.f32 %v6657_v51, %v928_v47 }
 0x324   : > { %v5198_v15 = vpop.eup %5197  ;;  %v1686_v5 = vpop.permute.xlu1 %1685 }
 0x325   : > { %5211 = vtanh.f32 %v1968_v63  ;;  %v1951_v8 = vadd.f32 %v1823_v2, %v1152_v54  ;;  %4458 = vmatpush3.xpose.msra.mxu0 %v5198_v15  ;;  %4491 = vmatpush3.xpose.msra.mxu1 %v5196_v57  ;;  %v1839_v19 = vmul.f32 %v6715_v46, %v1686_v5  ;;  %v927_v2 = vld [vmem:[%s6042_s12 + $0x318] sm:$0xff]  ;;  %v1163_v5 = vadd.f32 %v6661_v28, %v944_v0 }
 0x326   : > { %v5200_v23 = vpop.eup %5199  ;;  %v1615_v9 = vpop.permute.xlu0 %1614  ;;  %4459 = vmatprep.subr.mxu0 %v5672_v48  ;;  %4492 = vmatprep.subr.mxu1 %v5672_v48 }
 0x327   : > { %5213 = vtanh.f32 %v1951_v8  ;;  %v1967_v11 = vadd.f32 %v1839_v19, %v1168_v4  ;;  %v1822_v42 = vmul.f32 %v6715_v46, %v1615_v9  ;;  %v943_v19 = vld [vmem:[%s6042_s12 + $0x398] sm:$0xff]  ;;  %v1146_v9 = vadd.f32 %v6657_v51, %v927_v2 }
 0x328   : > { %v5202_v13 = vpop.eup %5201  ;;  %v1682_v14 = vpop.permute.xlu1 %1681 }
 0x329   : > { %5215 = vtanh.f32 %v1967_v11  ;;  %v1950_v17 = vadd.f32 %v1822_v42, %v1151_v58  ;;  %4460 = vmatpush3.xpose.msra.mxu0 %v5202_v13  ;;  %4493 = vmatpush3.xpose.msra.mxu1 %v5200_v23  ;;  %v1838_v18 = vmul.f32 %v6715_v46, %v1682_v14  ;;  %v926_v42 = vld [vmem:[%s6042_s12 + $0x310] sm:$0xff]  ;;  %v1162_v14 = vadd.f32 %v6661_v28, %v943_v19 }
 0x32a   : > { %v5204_v33 = vpop.eup %5203  ;;  %v1611_v20 = vpop.permute.xlu0 %1610  ;;  %4461 = vmatprep.subr.mxu0 %v5672_v48  ;;  %4494 = vmatprep.subr.mxu1 %v5672_v48 }
 0x32b   : > { %5217 = vtanh.f32 %v1950_v17  ;;  %v1966_v21 = vadd.f32 %v1838_v18, %v1167_v12  ;;  %v1821_v45 = vmul.f32 %v6715_v46, %v1611_v20  ;;  %v942_v18 = vld [vmem:[%s6042_s12 + $0x390] sm:$0xff]  ;;  %v1145_v20 = vadd.f32 %v6657_v51, %v926_v42 }
 0x32c   : > { %v5206_v22 = vpop.eup %5205  ;;  %v1678_v24 = vpop.permute.xlu1 %1677 }
 0x32d   : > { %5219 = vtanh.f32 %v1966_v21  ;;  %v1949_v60 = vadd.f32 %v1821_v45, %v1150_v61  ;;  %4462 = vmatpush3.xpose.msra.mxu0 %v5206_v22  ;;  %4495 = vmatpush3.xpose.msra.mxu1 %v5204_v33  ;;  %v1837_v3 = vmul.f32 %v6715_v46, %v1678_v24  ;;  %v925_v45 = vld [vmem:[%s6042_s12 + $0x308] sm:$0xff]  ;;  %v1161_v24 = vadd.f32 %v6661_v28, %v942_v18 }
 0x32e   : > { %v5208_v29 = vpop.eup %5207  ;;  %v1607_v30 = vpop.permute.xlu0 %1606  ;;  %4463 = vmatprep.subr.mxu0 %v5672_v48  ;;  %4496 = vmatprep.subr.mxu1 %v5672_v48 }
 0x32f   : > { %5221 = vtanh.f32 %v1949_v60  ;;  %v1965_v6 = vadd.f32 %v1837_v3, %v1166_v43  ;;  %v1820_v31 = vmul.f32 %v6715_v46, %v1607_v30  ;;  %v941_v3 = vld [vmem:[%s6042_s12 + $0x388] sm:$0xff]  ;;  %v1144_v30 = vadd.f32 %v6657_v51, %v925_v45 }
 0x330   : > { %v5210_v36 = vpop.eup %5209  ;;  %v1674_v44 = vpop.permute.xlu1 %1673 }
 0x331   : > { %5223 = vtanh.f32 %v1965_v6  ;;  %v1948_v37 = vadd.f32 %v1820_v31, %v1149_v27  ;;  %4464 = vmatpush3.xpose.msra.mxu0 %v5210_v36  ;;  %4497 = vmatpush3.xpose.msra.mxu1 %v5208_v29  ;;  %v1836_v38 = vmul.f32 %v6715_v46, %v1674_v44  ;;  %v924_v31 = vld [vmem:[%s6042_s12 + $0x300] sm:$0xff]  ;;  %v1160_v44 = vadd.f32 %v6661_v28, %v941_v3 }
 0x332   : > { %v5212_v40 = vpop.eup %5211  ;;  %v1603_v41 = vpop.permute.xlu0 %1602  ;;  %4465 = vmatprep.subr.mxu0 %v5672_v48  ;;  %4498 = vmatprep.subr.mxu1 %v5672_v48 }
 0x333   : > { %5225 = vtanh.f32 %v1948_v37  ;;  %v1964_v49 = vadd.f32 %v1836_v38, %v1165_v35  ;;  %v1819_v55 = vmul.f32 %v6715_v46, %v1603_v41  ;;  %v940_v38 = vld [vmem:[%s6042_s12 + $0x380] sm:$0xff]  ;;  %v1143_v41 = vadd.f32 %v6657_v51, %v924_v31  ;;  %v2794_v31 = vld [vmem:[%s6034_s17 + $0x78] sm:$0xff] }
 0x334   : > { %v5214_v52 = vpop.eup %5213  ;;  %v1670_v53 = vpop.permute.xlu1 %1669 }
 0x335   : > { %5227 = vtanh.f32 %v1964_v49  ;;  %v1947_v54 = vadd.f32 %v1819_v55, %v1148_v39  ;;  %4466 = vmatpush3.xpose.msra.mxu0 %v5214_v52  ;;  %4499 = vmatpush3.xpose.msra.mxu1 %v5212_v40  ;;  %v1835_v57 = vmul.f32 %v6715_v46, %v1670_v53  ;;  %v1159_v52 = vadd.f32 %v6661_v28, %v940_v38  ;;  %v2791_v38 = vld [vmem:[%s6034_s17 + $0x60] sm:$0xff] }
 0x336   : > { %v5216_v62 = vpop.eup %5215  ;;  %v1599_v63 = vpop.permute.xlu0 %1598  ;;  %4467 = vmatprep.subr.mxu0 %v5672_v48  ;;  %4500 = vmatprep.subr.mxu1 %v5672_v48 }
 0x337   : > { %5229 = vtanh.f32 %v1947_v54  ;;  %v1963_v4 = vadd.f32 %v1835_v57, %v1164_v50  ;;  %v1818_v15 = vmul.f32 %v6715_v46, %v1599_v63 }
 0x338   : > { %v5218_v7 = vpop.eup %5217  ;;  %v1666_v8 = vpop.permute.xlu1 %1665 }
 0x339   : > { %5231 = vtanh.f32 %v1963_v4  ;;  %v1946_v58 = vadd.f32 %v1818_v15, %v1147_v59  ;;  %4468 = vmatpush3.xpose.msra.mxu0 %v5218_v7  ;;  %4501 = vmatpush3.xpose.msra.mxu1 %v5216_v62  ;;  %v1834_v23 = vmul.f32 %v6715_v46, %v1666_v8 }
 0x33a   : > { %v5220_v10 = vpop.eup %5219  ;;  %v1595_v11 = vpop.permute.xlu0 %1594  ;;  %4469 = vmatprep.subr.mxu0 %v5672_v48  ;;  %4502 = vmatprep.subr.mxu1 %v5672_v48 }
 0x33b   : > { %5233 = vtanh.f32 %v1946_v58  ;;  %v1962_v12 = vadd.f32 %v1834_v23, %v1163_v5  ;;  %v1817_v13 = vmul.f32 %v6715_v46, %v1595_v11 }
 0x33c   : > { %v5222_v16 = vpop.eup %5221  ;;  %v1662_v17 = vpop.permute.xlu1 %1661 }
 0x33d   : > { %5235 = vtanh.f32 %v1962_v12  ;;  %v1945_v61 = vadd.f32 %v1817_v13, %v1146_v9  ;;  %4470 = vmatpush3.xpose.msra.mxu0 %v5222_v16  ;;  %4503 = vmatpush3.xpose.msra.mxu1 %v5220_v10  ;;  %v1833_v33 = vmul.f32 %v6715_v46, %v1662_v17 }
 0x33e   : > { %v5224_v34 = vpop.eup %5223  ;;  %v1591_v21 = vpop.permute.xlu0 %1590  ;;  %4471 = vmatprep.subr.mxu0 %v5672_v48  ;;  %4504 = vmatprep.subr.mxu1 %v5672_v48 }
 0x33f   : > { %5237 = vtanh.f32 %v1945_v61  ;;  %v1961_v43 = vadd.f32 %v1833_v33, %v1162_v14  ;;  %v1816_v22 = vmul.f32 %v6715_v46, %v1591_v21 }
 0x340   : > { %v5226_v25 = vpop.eup %5225  ;;  %v1658_v60 = vpop.permute.xlu1 %1657 }
 0x341   : > { %5239 = vtanh.f32 %v1961_v43  ;;  %v1944_v27 = vadd.f32 %v1816_v22, %v1145_v20  ;;  %4472 = vmatpush3.xpose.msra.mxu0 %v5226_v25  ;;  %4505 = vmatpush3.xpose.msra.mxu1 %v5224_v34  ;;  %v1832_v29 = vmul.f32 %v6715_v46, %v1658_v60 }
 0x342   : > { %v5228_v1 = vpop.eup %5227  ;;  %v1587_v6 = vpop.permute.xlu0 %1586  ;;  %4473 = vmatprep.subr.mxu0 %v5672_v48  ;;  %4506 = vmatprep.subr.mxu1 %v5672_v48 }
 0x343   : > { %5241 = vtanh.f32 %v1944_v27  ;;  %v1960_v35 = vadd.f32 %v1832_v29, %v1161_v24  ;;  %v1815_v36 = vmul.f32 %v6715_v46, %v1587_v6  ;;  %v2663_v24 = vld [vmem:[%s604_s30] sm:$0xff]  ;;  %v5675_v6 = vmov 0  }
 0x344   : > { %v5230_v26 = vpop.eup %5229  ;;  %v1654_v37 = vpop.permute.xlu1 %1653  ;;  %vm2664_vm9 = vcmp.gt.f32.partialorder %v2663_v24, 0.5  ;;  %4994 = vset.pattern.permute.xlu1 %v5675_v6  ;;  %4995 = vset.pattern.permute.xlu0 %v5675_v6  ;;  %v2822_v24 = vld [vmem:[%s6034_s17 + $0x158] sm:$0xff] }
 0x345   : > { %5243 = vtanh.f32 %v1960_v35  ;;  %v1943_v39 = vadd.f32 %v1815_v36, %v1144_v30  ;;  %4474 = vmatpush3.xpose.msra.mxu0 %v5230_v26  ;;  %4507 = vmatpush3.xpose.msra.mxu1 %v5228_v1  ;;  %v1831_v40 = vmul.f32 %v6715_v46, %v1654_v37  ;;  %v2793_v35 = vld [vmem:[%s6034_s17 + $0x70] sm:$0xff]  ;;  %v2810_v36 = vld [vmem:[%s6034_s17 + $0xf8] sm:$0xff]  ;;  %v2792_v26 = vld [vmem:[%s6034_s17 + $0x68] sm:$0xff] }
 0x346   : > { %v5232_v47 = vpop.eup %5231  ;;  %v1583_v49 = vpop.permute.xlu0 %1582  ;;  %4475 = vmatprep.subr.mxu0 %v5672_v48  ;;  %4508 = vmatprep.subr.mxu1 %v5672_v48  ;;  %v2808_v37 = vld [vmem:[%s6034_s17 + $0xe8] sm:$0xff]  ;;  %v2818_v6 = vld [vmem:[%s6034_s17 + $0x138] sm:$0xff] }
 0x347   : > { %5245 = vtanh.f32 %v1943_v39  ;;  %v1959_v55 = vadd.f32 %v1831_v40, %v1160_v44  ;;  %v1814_v50 = vmul.f32 %v6715_v46, %v1583_v49  ;;  %v2809_v44 = vld [vmem:[%s6034_s17 + $0xf0] sm:$0xff]  ;;  %v2807_v39 = vld [vmem:[%s6034_s17 + $0xe0] sm:$0xff]  ;;  %v2790_v40 = vld [vmem:[%s6034_s17 + $0x58] sm:$0xff] }
 0x348   : > { %v5234_v53 = vpop.eup %5233  ;;  %v1650_v0 = vpop.permute.xlu1 %1649  ;;  %v2806_v49 = vld [vmem:[%s6034_s17 + $0xd8] sm:$0xff] }
 0x349   : > { %5247 = vtanh.f32 %v1959_v55  ;;  %v1942_v54 = vadd.f32 %v1814_v50, %v1143_v41  ;;  %4476 = vmatpush3.xpose.msra.mxu0 %v5234_v53  ;;  %4509 = vmatpush3.xpose.msra.mxu1 %v5232_v47  ;;  %v1830_v51 = vmul.f32 %v6715_v46, %v1650_v0  ;;  %v2699_v41 = vld [vmem:[#allocation3] sm:$0xff]  ;;  %v2789_v47 = vld [vmem:[%s6034_s17 + $0x50] sm:$0xff]  ;;  %v2787_v0 = vld [vmem:[%s6034_s17 + $0x40] sm:$0xff] }
 0x34a   : > { %v5236_v57 = vpop.eup %5235  ;;  %4477 = vmatprep.subr.mxu0 %v5672_v48  ;;  %4510 = vmatprep.subr.mxu1 %v5672_v48  ;;  %v2788_v50 = vld [vmem:[%s6034_s17 + $0x48] sm:$0xff] }
 0x34b   : > { %5249 = vtanh.f32 %v1942_v54  ;;  %v1958_v59 = vadd.f32 %v1830_v51, %v1159_v52  ;;  %v2805_v52 = vld [vmem:[%s6034_s17 + $0xd0] sm:$0xff]  ;;  %v2804_v54 = vld [vmem:[%s6034_s17 + $0xc8] sm:$0xff] }
 0x34c   : > { %v5238_v62 = vpop.eup %5237 }
 0x34d   : > { %5251 = vtanh.f32 %v1958_v59  ;;  %4478 = vmatpush3.xpose.msra.mxu0 %v5238_v62  ;;  %4511 = vmatpush3.xpose.msra.mxu1 %v5236_v57  ;;  %v2786_v57 = vld [vmem:[%s6034_s17 + $0x38] sm:$0xff]  ;;  %v2803_v59 = vld [vmem:[%s6034_s17 + $0xc0] sm:$0xff]  ;;  %v2785_v62 = vld [vmem:[%s6034_s17 + $0x30] sm:$0xff] }
 0x34e   : > { %v5240_v28 = vpop.eup %5239  ;;  %4479 = vmatprep.subr.mxu0 %v5672_v48  ;;  %4512 = vmatprep.subr.mxu1 %v5672_v48 }
 0x350   : > { %v5242_v63 = vpop.eup %5241 }
 0x351   : > { %4480 = vmatpush3.xpose.msra.mxu0 %v5242_v63  ;;  %4513 = vmatpush3.xpose.msra.mxu1 %v5240_v28  ;;  %v2802_v63 = vld [vmem:[%s6034_s17 + $0xb8] sm:$0xff] }
 0x352   : > { %v5244_v46 = vpop.eup %5243  ;;  %4481 = vmatprep.subr.mxu0 %v5672_v48  ;;  %4514 = vmatprep.subr.mxu1 %v5672_v48 }
 0x354   : > { %v5246_v2 = vpop.eup %5245 }
 0x355   : > { %4482 = vmatpush3.xpose.msra.mxu0 %v5246_v2  ;;  %4515 = vmatpush3.xpose.msra.mxu1 %v5244_v46  ;;  %v2784_v46 = vld [vmem:[%s6034_s17 + $0x28] sm:$0xff]  ;;  %v2801_v2 = vld [vmem:[%s6034_s17 + $0xb0] sm:$0xff] }
 0x356   : > { %v5248_v4 = vpop.eup %5247  ;;  %4483 = vmatprep.subr.mxu0 %v5672_v48  ;;  %4516 = vmatprep.subr.mxu1 %v5672_v48 }
 0x358   : > { %v5250_v15 = vpop.eup %5249 }
 0x359   : > { %4484 = vmatpush3.xpose.msra.mxu0 %v5250_v15  ;;  %4517 = vmatpush3.xpose.msra.mxu1 %v5248_v4  ;;  %v2783_v4 = vld [vmem:[%s6034_s17 + $0x20] sm:$0xff]  ;;  %v2800_v15 = vld [vmem:[%s6034_s17 + $0xa8] sm:$0xff] }
 0x35a   : > { %v5252_v5 = vpop.eup %5251  ;;  %4518 = vmatprep.subr.mxu1 %v5672_v48  ;;  %4523 = vmatprep.subr.mxu0 %v5672_v48 }
 0x35c   : > { %4486 = vmatmul.mubr.f32.vlgmr.msra.gmra.mxu0 %v6706_v32  ;;  %v2169_v7 = vpop.f32.mrf.mxu0 }
 0x35d   : > { %4519 = vmatpush3.xpose.msra.mxu1 %v5252_v5  ;;  %4555 = vmatprep.mubr.msk.f32.mxu0 %vm5673_vm1, %v5672_v48  ;;  %v2782_v5 = vld [vmem:[%s6034_s17 + $0x18] sm:$0xff] }
 0x35e   : > { %v4277_v8 = vpop.f32.mrf.mxu0  ;;  %4558 = vmatprep.subr.mxu1 %v5672_v48  ;;  %4524 = vmatpush3.msra.mxu0 %v2794_v31  ;;  %v2835_v31 = vld [vmem:[%s6034_s17 + $0x1c0] sm:$0xff] }
 0x35f   : > { %4525 = vmatprep.subr.mxu0 %v5672_v48  ;;  %v2781_v8 = vld [vmem:[%s6034_s17 + $0x10] sm:$0xff] }
 0x360   : > { %v2239_v19 = vpop.f32.mrf.mxu1  ;;  %4521 = vmatmul.mubr.f32.vlgmr.msra.gmra.mxu1 %v6706_v32  ;;  %4526 = vmatpush3.msra.mxu0 %v2793_v35  ;;  %v2817_v35 = vld [vmem:[%s6034_s17 + $0x130] sm:$0xff] }
 0x361   : > { %v2673_v58 = vrot.slane %v2239_v19, 7  ;;  %4590 = vmatprep.mubr.msk.f32.mxu1 %vm5673_vm1, %v5672_v48  ;;  %4559 = vmatpush3.msra.mxu1 %v2810_v36  ;;  %v2798_v19 = vld [vmem:[%s6034_s17 + $0x98] sm:$0xff] }
 0x362   : > { %v4312_v23 = vpop.f32.mrf.mxu1  ;;  %4560 = vmatprep.subr.mxu1 %v5672_v48  ;;  %4527 = vmatprep.subr.mxu0 %v5672_v48  ;;  %v2834_v36 = vld [vmem:[%s6034_s17 + $0x1b8] sm:$0xff] }
 0x363   : > { %v2675_v9 = vsel %vm2674_vm2, %v2673_v58, %v2169_v7  ;;  %4561 = vmatpush3.msra.mxu1 %v2809_v44  ;;  %4528 = vmatpush3.msra.mxu0 %v2792_v26  ;;  %v2799_v7 = vld [vmem:[%s6034_s17 + $0xa0] sm:$0xff]  ;;  %v2780_v58 = vld [vmem:[%s6034_s17 + $0x8] sm:$0xff]  ;;  %v2797_v23 = vld [vmem:[%s6034_s17 + $0x90] sm:$0xff] }
 0x364   : > { %4562 = vmatprep.subr.mxu1 %v5672_v48  ;;  %4529 = vmatprep.subr.mxu0 %v5672_v48  ;;  %v2816_v44 = vld [vmem:[%s6034_s17 + $0x128] sm:$0xff]  ;;  %v2833_v26 = vld [vmem:[%s6034_s17 + $0x1b0] sm:$0xff] }
 0x365   : > { %4563 = vmatpush3.msra.mxu1 %v2808_v37  ;;  %4530 = vmatpush3.msra.mxu0 %v2791_v38  ;;  %v2815_v37 = vld [vmem:[%s6034_s17 + $0x120] sm:$0xff]  ;;  %v2832_v38 = vld [vmem:[%s6034_s17 + $0x1a8] sm:$0xff] }
 0x366   : > { %4564 = vmatprep.subr.mxu1 %v5672_v48  ;;  %4531 = vmatprep.subr.mxu0 %v5672_v48 }
 0x367   : > { %4565 = vmatpush3.msra.mxu1 %v2807_v39  ;;  %4532 = vmatpush3.msra.mxu0 %v2790_v40  ;;  %v2814_v39 = vld [vmem:[%s6034_s17 + $0x118] sm:$0xff]  ;;  %v2831_v40 = vld [vmem:[%s6034_s17 + $0x1a0] sm:$0xff] }
 0x368   : > { %4566 = vmatprep.subr.mxu1 %v5672_v48  ;;  %4533 = vmatprep.subr.mxu0 %v5672_v48 }
 0x369   : > { %4534 = vmatpush3.msra.mxu0 %v2789_v47  ;;  %4567 = vmatpush3.msra.mxu1 %v2806_v49  ;;  %v2830_v47 = vld [vmem:[%s6034_s17 + $0x198] sm:$0xff]  ;;  %v2812_v49 = vld [vmem:[%s6034_s17 + $0x108] sm:$0xff] }
 0x36a   : > { %4535 = vmatprep.subr.mxu0 %v5672_v48  ;;  %4568 = vmatprep.subr.mxu1 %v5672_v48 }
 0x36b   : > { %4536 = vmatpush3.msra.mxu0 %v2788_v50  ;;  %4569 = vmatpush3.msra.mxu1 %v2805_v52  ;;  %v2811_v50 = vld [vmem:[%s6034_s17 + $0x100] sm:$0xff]  ;;  %v2828_v52 = vld [vmem:[%s6034_s17 + $0x188] sm:$0xff] }
 0x36c   : > { %4537 = vmatprep.subr.mxu0 %v5672_v48  ;;  %4570 = vmatprep.subr.mxu1 %v5672_v48 }
 0x36d   : > { %4538 = vmatpush3.msra.mxu0 %v2787_v0  ;;  %4571 = vmatpush3.msra.mxu1 %v2804_v54  ;;  %v2827_v0 = vld [vmem:[%s6034_s17 + $0x180] sm:$0xff]  ;;  %v2858_v54 = vld [vmem:[%s6034_s17 + $0x278] sm:$0xff] }
 0x36e   : > { %4539 = vmatprep.subr.mxu0 %v5672_v48  ;;  %4572 = vmatprep.subr.mxu1 %v5672_v48 }
 0x36f   : > { %4540 = vmatpush3.msra.mxu0 %v2786_v57  ;;  %4573 = vmatpush3.msra.mxu1 %v2803_v59  ;;  %v2857_v57 = vld [vmem:[%s6034_s17 + $0x270] sm:$0xff]  ;;  %v2874_v59 = vld [vmem:[%s6034_s17 + $0x2f8] sm:$0xff] }
 0x370   : > { %4541 = vmatprep.subr.mxu0 %v5672_v48  ;;  %4574 = vmatprep.subr.mxu1 %v5672_v48 }
 0x371   : > { %4542 = vmatpush3.msra.mxu0 %v2785_v62  ;;  %4575 = vmatpush3.msra.mxu1 %v2802_v63  ;;  %v2856_v62 = vld [vmem:[%s6034_s17 + $0x268] sm:$0xff]  ;;  %v2855_v63 = vld [vmem:[%s6034_s17 + $0x260] sm:$0xff] }
 0x372   : > { %4543 = vmatprep.subr.mxu0 %v5672_v48  ;;  %4576 = vmatprep.subr.mxu1 %v5672_v48 }
 0x373   : > { %4544 = vmatpush3.msra.mxu0 %v2784_v46  ;;  %4577 = vmatpush3.msra.mxu1 %v2801_v2  ;;  %v2872_v46 = vld [vmem:[%s6034_s17 + $0x2e8] sm:$0xff]  ;;  %v2854_v2 = vld [vmem:[%s6034_s17 + $0x258] sm:$0xff] }
 0x374   : > { %4545 = vmatprep.subr.mxu0 %v5672_v48  ;;  %4578 = vmatprep.subr.mxu1 %v5672_v48 }
 0x375   : > { %4546 = vmatpush3.msra.mxu0 %v2783_v4  ;;  %4579 = vmatpush3.msra.mxu1 %v2800_v15  ;;  %v2871_v4 = vld [vmem:[%s6034_s17 + $0x2e0] sm:$0xff]  ;;  %v2853_v15 = vld [vmem:[%s6034_s17 + $0x250] sm:$0xff] }
 0x376   : > { %4547 = vmatprep.subr.mxu0 %v5672_v48  ;;  %4580 = vmatprep.subr.mxu1 %v5672_v48 }
 0x377   : > { %4548 = vmatpush3.msra.mxu0 %v2782_v5  ;;  %4581 = vmatpush3.msra.mxu1 %v2799_v7  ;;  %v2870_v5 = vld [vmem:[%s6034_s17 + $0x2d8] sm:$0xff]  ;;  %v2852_v7 = vld [vmem:[%s6034_s17 + $0x248] sm:$0xff] }
 0x378   : > { %4549 = vmatprep.subr.mxu0 %v5672_v48  ;;  %4582 = vmatprep.subr.mxu1 %v5672_v48 }
 0x379   : > { %4550 = vmatpush3.msra.mxu0 %v2781_v8  ;;  %4583 = vmatpush3.msra.mxu1 %v2798_v19  ;;  %v2869_v8 = vld [vmem:[%s6034_s17 + $0x2d0] sm:$0xff]  ;;  %v2851_v19 = vld [vmem:[%s6034_s17 + $0x240] sm:$0xff] }
 0x37a   : > { %4551 = vmatprep.subr.mxu0 %v5672_v48  ;;  %4584 = vmatprep.subr.mxu1 %v5672_v48 }
 0x37b   : > { %4552 = vmatpush3.msra.mxu0 %v2780_v58  ;;  %4585 = vmatpush3.msra.mxu1 %v2797_v23  ;;  %v2868_v58 = vld [vmem:[%s6034_s17 + $0x2c8] sm:$0xff]  ;;  %v2850_v23 = vld [vmem:[%s6034_s17 + $0x238] sm:$0xff] }
 0x37c   : > { %4553 = vmatprep.subr.mxu0 %v5672_v48  ;;  %4586 = vmatprep.subr.mxu1 %v5672_v48 }
 0x39c   : > { %v2309_v10 = vpop.f32.mrf.mxu0 }
 0x39d   : > { %v2676_v11 = vrot.slane %v2309_v10, 6  ;;  %v2796_v10 = vld [vmem:[%s6034_s17 + $0x88] sm:$0xff] }
 0x39e   : > { %v4347_v42 = vpop.f32.mrf.mxu0  ;;  %4587 = vmatpush3.msra.mxu1 %v2796_v10  ;;  %v2849_v10 = vld [vmem:[%s6034_s17 + $0x230] sm:$0xff] }
 0x39f   : > { %v2678_v12 = vsel %vm2677_vm3, %v2676_v11, %v2675_v9  ;;  %v2779_v9 = vld [vmem:[%s6034_s17] sm:$0xff]  ;;  %4588 = vmatprep.subr.mxu1 %v5672_v48 }
 0x3a0   : > { %v2379_v13 = vpop.f32.mrf.mxu1  ;;  %4554 = vmatpush3.msra.mxu0 %v2779_v9  ;;  %v2795_v42 = vld [vmem:[%s6034_s17 + $0x80] sm:$0xff] }
 0x3a1   : > { %v2679_v14 = vrot.slane %v2379_v13, 5  ;;  %4593 = vmatprep.subr.mxu0 %v5672_v48  ;;  %4589 = vmatpush3.msra.mxu1 %v2795_v42  ;;  %v2867_v9 = vld [vmem:[%s6034_s17 + $0x2c0] sm:$0xff]  ;;  %v2866_v42 = vld [vmem:[%s6034_s17 + $0x2b8] sm:$0xff] }
 0x3a2   : > { %v4382_v16 = vpop.f32.mrf.mxu1  ;;  %4628 = vmatprep.subr.mxu1 %v5672_v48 }
 0x3a3   : > { %v2681_v32 = vsel %vm2680_vm4, %v2679_v14, %v2678_v12 }
 0x3dc   : > { %v2449_v17 = vpop.f32.mrf.mxu0 }
 0x3dd   : > { %v2682_v18 = vrot.slane %v2449_v17, 4 }
 0x3de   : > { %v4417_v61 = vpop.f32.mrf.mxu0 }
 0x3df   : > { %v2684_v33 = vsel %vm2683_vm5, %v2682_v18, %v2681_v32  ;;  %v2826_v18 = vld [vmem:[%s6034_s17 + $0x178] sm:$0xff] }
 0x3e0   : > { %v2519_v20 = vpop.f32.mrf.mxu1 }
 0x3e1   : > { %v2685_v45 = vrot.slane %v2519_v20, 3  ;;  %v2825_v20 = vld [vmem:[%s6034_s17 + $0x170] sm:$0xff] }
 0x3e2   : > { %v4452_v34 = vpop.f32.mrf.mxu1 }
 0x3e3   : > { %v2687_v60 = vsel %vm2686_vm6, %v2685_v45, %v2684_v33  ;;  %v2842_v34 = vld [vmem:[%s6034_s17 + $0x1f8] sm:$0xff]  ;;  %v2841_v45 = vld [vmem:[%s6034_s17 + $0x1f0] sm:$0xff] }
 0x41c   : > { %v2589_v21 = vpop.f32.mrf.mxu0 }
 0x41d   : > { %v2688_v43 = vrot.slane %v2589_v21, 2  ;;  %v2824_v21 = vld [vmem:[%s6034_s17 + $0x168] sm:$0xff] }
 0x41e   : > { %v4487_v22 = vpop.f32.mrf.mxu0 }
 0x41f   : > { %v2690_v29 = vsel %vm2689_vm7, %v2688_v43, %v2687_v60  ;;  %v2823_v43 = vld [vmem:[%s6034_s17 + $0x160] sm:$0xff]  ;;  %v2840_v22 = vld [vmem:[%s6034_s17 + $0x1e8] sm:$0xff]  ;;  %v2821_v60 = vld [vmem:[%s6034_s17 + $0x150] sm:$0xff] }
 0x420   : > { %v2659_v25 = vpop.f32.mrf.mxu1 }
 0x421   : > { %v2691_v3 = vrot.slane %v2659_v25, 1  ;;  %v2839_v25 = vld [vmem:[%s6034_s17 + $0x1e0] sm:$0xff] }
 0x422   : > { %v4522_v27 = vpop.f32.mrf.mxu1 }
 0x423   : > { %v2693_v30 = vsel %vm2692_vm8, %v2691_v3, %v2690_v29  ;;  %v2838_v3 = vld [vmem:[%s6034_s17 + $0x1d8] sm:$0xff]  ;;  %v2820_v27 = vld [vmem:[%s6034_s17 + $0x148] sm:$0xff]  ;;  %v2837_v29 = vld [vmem:[%s6034_s17 + $0x1d0] sm:$0xff] }
 0x424   : > { %v6833_v1 = vsel %vm2664_vm9, -1e+30, %v2693_v30  ;;  %v2819_v30 = vld [vmem:[%s6034_s17 + $0x140] sm:$0xff] }
 0x425   : > { %2700 = vmax.xlane.f32.xlu0 %v6833_v1  ;;  %2698 = vst [vmem:[%s2697_s14] sm:$0xff] %v6833_v1 }
 0x4ae   : > { %v2701_v55 = vpop.xlane.xlu0 %2700 }
 0x4af   : > { %v2702_v53 = vmax.f32 %v2699_v41, %v2701_v55  ;;  %v2829_v55 = vld [vmem:[%s6034_s17 + $0x190] sm:$0xff] }
 0x4b1   : > { %v2703_v51 = vsub.f32 %v2699_v41, %v2702_v53  ;;  %3499 = vst.msk [vmem:[#allocation3] sm:$0xff] %vm2719_vm10, %v2702_v53  ;;  %2708 = vperm.xlu1 %4994, %v2702_v53   ;;  %v2813_v41 = vld [vmem:[%s6034_s17 + $0x110] sm:$0xff] }
 0x4b3   : > { %v2704_v28 = vmul.f32 1.442695, %v2703_v51 }
 0x4b5   : > { %5253 = vpow2.f32 %v2704_v28  ;;  %v2873_v28 = vld [vmem:[%s6034_s17 + $0x2f0] sm:$0xff] }
 0x4c2   : > { %v6898_v11 = vpop.eup %5253 }
 0x4c3   : > { %3470 = vperm.xlu0 %4995, %v6898_v11  }
 0x52c   : > { %v2709_v12 = vpop.permute.xlu1 %2708 }
 0x52d   : > { %v2711_v13 = vsub.f32 %v6833_v1, %v2709_v12  ;;  %v2836_v1 = vld [vmem:[%s6034_s17 + $0x1c8] sm:$0xff] }
 0x52e   : > { %v2848_v12 = vld [vmem:[%s6034_s17 + $0x228] sm:$0xff] }
 0x52f   : > { %v2712_v14 = vmul.f32 1.442695, %v2711_v13  ;;  %v2865_v13 = vld [vmem:[%s6034_s17 + $0x2b0] sm:$0xff] }
 0x531   : > { %5255 = vpow2.f32 %v2712_v14  ;;  %v2847_v14 = vld [vmem:[%s6034_s17 + $0x220] sm:$0xff] }
 0x53e   : > { %v6906_v16 = vpop.eup %5255 }
 0x53f   : > { %2716 = vadd.xlane.f32.xlu1 %v6906_v16  ;;  %v2729_v32 = vrot.slane %v6906_v16, %v6130_v56 }
 0x541   : > { %v6912_v17 = vrot.slane %v2729_v32, %v6130_v56  ;;  %v2737_v61 = vcombine.high %v2729_v32, %v2729_v32  ;;  %v2864_v32 = vld [vmem:[%s6034_s17 + $0x2a8] sm:$0xff] }
 0x543   : > { %4556 = vmatmul.mubr.f32.vlgmr.msra.gmra.mxu0 %v6912_v17  ;;  %v6917_v33 = vrot.slane %v2737_v61, %v6130_v56  ;;  %v2767_v53 = vcombine.high %v6912_v17, %v6912_v17  ;;  %v2846_v17 = vld [vmem:[%s6034_s17 + $0x218] sm:$0xff]  ;;  %v2863_v61 = vld [vmem:[%s6034_s17 + $0x2a0] sm:$0xff] }
 0x544   : > { %4594 = vmatpush3.msra.mxu0 %v2826_v18  ;;  %4625 = vmatprep.mubr.msk.f32.mxu0 %vm5673_vm1, %v5672_v48  ;;  %v2722_v18 = vcombine.high %v6906_v16, %v6906_v16 }
 0x545   : > { %4595 = vmatprep.subr.mxu0 %v5672_v48  ;;  %4591 = vmatmul.mubr.f32.vlgmr.msra.gmra.mxu1 %v6917_v33  ;;  %v2769_v51 = vcombine.high %v6917_v33, %v6917_v33  ;;  %v2845_v33 = vld [vmem:[%s6034_s17 + $0x210] sm:$0xff] }
 0x546   : > { %4596 = vmatpush3.msra.mxu0 %v2825_v20  ;;  %4629 = vmatpush3.msra.mxu1 %v2842_v34  ;;  %v2862_v20 = vld [vmem:[%s6034_s17 + $0x298] sm:$0xff]  ;;  %v2844_v34 = vld [vmem:[%s6034_s17 + $0x208] sm:$0xff]  ;;  %v2736_v16 = vrot.slane %v2722_v18, %v6130_v56 }
 0x547   : > { %4597 = vmatprep.subr.mxu0 %v5672_v48  ;;  %4630 = vmatprep.subr.mxu1 %v5672_v48 }
 0x548   : > { %4598 = vmatpush3.msra.mxu0 %v2824_v21  ;;  %4631 = vmatpush3.msra.mxu1 %v2841_v45  ;;  %v2861_v21 = vld [vmem:[%s6034_s17 + $0x290] sm:$0xff]  ;;  %v2843_v45 = vld [vmem:[%s6034_s17 + $0x200] sm:$0xff] }
 0x549   : > { %4599 = vmatprep.subr.mxu0 %v5672_v48  ;;  %4632 = vmatprep.subr.mxu1 %v5672_v48 }
 0x54a   : > { %4600 = vmatpush3.msra.mxu0 %v2823_v43  ;;  %4633 = vmatpush3.msra.mxu1 %v2840_v22  ;;  %v2860_v43 = vld [vmem:[%s6034_s17 + $0x288] sm:$0xff]  ;;  %v2738_v22 = vcombine.high %v2736_v16, %v2736_v16 }
 0x54b   : > { %4601 = vmatprep.subr.mxu0 %v5672_v48  ;;  %4634 = vmatprep.subr.mxu1 %v5672_v48 }
 0x54c   : > { %4602 = vmatpush3.msra.mxu0 %v2822_v24  ;;  %4635 = vmatpush3.msra.mxu1 %v2839_v25  ;;  %v7055_v24 = vrot.slane %v2736_v16, %v6130_v56  ;;  %v2859_v25 = vld [vmem:[%s6034_s17 + $0x280] sm:$0xff] }
 0x54d   : > { %4603 = vmatprep.subr.mxu0 %v5672_v48  ;;  %4636 = vmatprep.subr.mxu1 %v5672_v48 }
 0x54e   : > { %4604 = vmatpush3.msra.mxu0 %v2821_v60  ;;  %4637 = vmatpush3.msra.mxu1 %v2838_v3  ;;  %v2890_v60 = vld [vmem:[%s6034_s17 + $0x378] sm:$0xff]  ;;  %v7065_v3 = vrot.slane %v2738_v22, %v6130_v56  ;;  %v2905_v56 = vld [vmem:[%s6034_s17 + $0x3f0] sm:$0xff] }
 0x54f   : > { %4605 = vmatprep.subr.mxu0 %v5672_v48  ;;  %4638 = vmatprep.subr.mxu1 %v5672_v48  ;;  %v3467_v22 = vld [vmem:[#allocation5] sm:$0xff] }
 0x550   : > { %4606 = vmatpush3.msra.mxu0 %v2820_v27  ;;  %4639 = vmatpush3.msra.mxu1 %v2837_v29  ;;  %v2889_v27 = vld [vmem:[%s6034_s17 + $0x370] sm:$0xff]  ;;  %v2906_v29 = vld [vmem:[%s6034_s17 + $0x3f8] sm:$0xff] }
 0x551   : > { %4607 = vmatprep.subr.mxu0 %v5672_v48  ;;  %4640 = vmatprep.subr.mxu1 %v5672_v48 }
 0x552   : > { %4608 = vmatpush3.msra.mxu0 %v2819_v30  ;;  %4641 = vmatpush3.msra.mxu1 %v2836_v1  ;;  %v2888_v30 = vld [vmem:[%s6034_s17 + $0x368] sm:$0xff]  ;;  %v2887_v1 = vld [vmem:[%s6034_s17 + $0x360] sm:$0xff] }
 0x553   : > { %4609 = vmatprep.subr.mxu0 %v5672_v48  ;;  %4642 = vmatprep.subr.mxu1 %v5672_v48 }
 0x554   : > { %4610 = vmatpush3.msra.mxu0 %v2818_v6  ;;  %4643 = vmatpush3.msra.mxu1 %v2835_v31  ;;  %v2904_v6 = vld [vmem:[%s6034_s17 + $0x3e8] sm:$0xff]  ;;  %v2886_v31 = vld [vmem:[%s6034_s17 + $0x358] sm:$0xff] }
 0x555   : > { %4611 = vmatprep.subr.mxu0 %v5672_v48  ;;  %4644 = vmatprep.subr.mxu1 %v5672_v48 }
 0x556   : > { %4612 = vmatpush3.msra.mxu0 %v2817_v35  ;;  %4645 = vmatpush3.msra.mxu1 %v2834_v36  ;;  %v2903_v35 = vld [vmem:[%s6034_s17 + $0x3e0] sm:$0xff]  ;;  %v2885_v36 = vld [vmem:[%s6034_s17 + $0x350] sm:$0xff] }
 0x557   : > { %4613 = vmatprep.subr.mxu0 %v5672_v48  ;;  %4646 = vmatprep.subr.mxu1 %v5672_v48 }
 0x558   : > { %4614 = vmatpush3.msra.mxu0 %v2816_v44  ;;  %4647 = vmatpush3.msra.mxu1 %v2833_v26  ;;  %v2902_v44 = vld [vmem:[%s6034_s17 + $0x3d8] sm:$0xff]  ;;  %v2884_v26 = vld [vmem:[%s6034_s17 + $0x348] sm:$0xff] }
 0x559   : > { %4615 = vmatprep.subr.mxu0 %v5672_v48  ;;  %4648 = vmatprep.subr.mxu1 %v5672_v48 }
 0x55a   : > { %4616 = vmatpush3.msra.mxu0 %v2815_v37  ;;  %4649 = vmatpush3.msra.mxu1 %v2832_v38  ;;  %v2901_v37 = vld [vmem:[%s6034_s17 + $0x3d0] sm:$0xff]  ;;  %v2883_v38 = vld [vmem:[%s6034_s17 + $0x340] sm:$0xff] }
 0x55b   : > { %4617 = vmatprep.subr.mxu0 %v5672_v48  ;;  %4650 = vmatprep.subr.mxu1 %v5672_v48 }
 0x55c   : > { %4618 = vmatpush3.msra.mxu0 %v2814_v39  ;;  %4651 = vmatpush3.msra.mxu1 %v2831_v40  ;;  %v2900_v39 = vld [vmem:[%s6034_s17 + $0x3c8] sm:$0xff]  ;;  %v2882_v40 = vld [vmem:[%s6034_s17 + $0x338] sm:$0xff] }
 0x55d   : > { %4619 = vmatprep.subr.mxu0 %v5672_v48  ;;  %4652 = vmatprep.subr.mxu1 %v5672_v48 }
 0x55e   : > { %4620 = vmatpush3.msra.mxu0 %v2813_v41  ;;  %4653 = vmatpush3.msra.mxu1 %v2830_v47  ;;  %v2899_v41 = vld [vmem:[%s6034_s17 + $0x3c0] sm:$0xff]  ;;  %v2881_v47 = vld [vmem:[%s6034_s17 + $0x330] sm:$0xff] }
 0x55f   : > { %4621 = vmatprep.subr.mxu0 %v5672_v48  ;;  %4654 = vmatprep.subr.mxu1 %v5672_v48 }
 0x560   : > { %4622 = vmatpush3.msra.mxu0 %v2812_v49  ;;  %4655 = vmatpush3.msra.mxu1 %v2829_v55  ;;  %v2898_v49 = vld [vmem:[%s6034_s17 + $0x3b8] sm:$0xff]  ;;  %v2880_v55 = vld [vmem:[%s6034_s17 + $0x328] sm:$0xff] }
 0x561   : > { %4623 = vmatprep.subr.mxu0 %v5672_v48  ;;  %4656 = vmatprep.subr.mxu1 %v5672_v48 }
 0x562   : > { %4624 = vmatpush3.msra.mxu0 %v2811_v50  ;;  %4657 = vmatpush3.msra.mxu1 %v2828_v52  ;;  %v2897_v50 = vld [vmem:[%s6034_s17 + $0x3b0] sm:$0xff]  ;;  %v2879_v52 = vld [vmem:[%s6034_s17 + $0x320] sm:$0xff] }
 0x563   : > { %4626 = vmatmul.mubr.f32.vlgmr.msra.gmra.mxu0 %v2767_v53  ;;  %4658 = vmatprep.subr.mxu1 %v5672_v48  ;;  %v2896_v53 = vld [vmem:[%s6034_s17 + $0x3a8] sm:$0xff] }
 0x564   : > { %4663 = vmatprep.subr.mxu0 %v5672_v48  ;;  %4659 = vmatpush3.msra.mxu1 %v2827_v0  ;;  %v2878_v0 = vld [vmem:[%s6034_s17 + $0x318] sm:$0xff] }
 0x565   : > { %4660 = vmatprep.mubr.msk.f32.mxu1 %vm5673_vm1, %v5672_v48  ;;  %4664 = vmatpush3.msra.mxu0 %v2858_v54  ;;  %v2895_v54 = vld [vmem:[%s6034_s17 + $0x3a0] sm:$0xff] }
 0x566   : > { %4661 = vmatmul.mubr.f32.vlgmr.msra.gmra.mxu1 %v2769_v51  ;;  %4665 = vmatprep.subr.mxu0 %v5672_v48  ;;  %v2877_v51 = vld [vmem:[%s6034_s17 + $0x310] sm:$0xff] }
 0x567   : > { %4698 = vmatprep.subr.mxu1 %v5672_v48  ;;  %4666 = vmatpush3.msra.mxu0 %v2857_v57  ;;  %v2894_v57 = vld [vmem:[%s6034_s17 + $0x398] sm:$0xff] }
 0x568   : > { %4699 = vmatpush3.msra.mxu1 %v2874_v59  ;;  %4667 = vmatprep.subr.mxu0 %v5672_v48  ;;  %v2876_v59 = vld [vmem:[%s6034_s17 + $0x308] sm:$0xff] }
 0x569   : > { %4700 = vmatprep.subr.mxu1 %v5672_v48  ;;  %4668 = vmatpush3.msra.mxu0 %v2856_v62  ;;  %v2893_v62 = vld [vmem:[%s6034_s17 + $0x390] sm:$0xff] }
 0x56a   : > { %4701 = vmatpush3.msra.mxu1 %v2873_v28  ;;  %4669 = vmatprep.subr.mxu0 %v5672_v48  ;;  %v2875_v28 = vld [vmem:[%s6034_s17 + $0x300] sm:$0xff] }
 0x56b   : > { %4702 = vmatprep.subr.mxu1 %v5672_v48  ;;  %4670 = vmatpush3.msra.mxu0 %v2855_v63  ;;  %v2892_v63 = vld [vmem:[%s6034_s17 + $0x388] sm:$0xff] }
 0x56c   : > { %4703 = vmatpush3.msra.mxu1 %v2872_v46  ;;  %4671 = vmatprep.subr.mxu0 %v5672_v48  ;;  %v2768_v46 = vcombine.high %v7055_v24, %v7055_v24 }
 0x56d   : > { %4704 = vmatprep.subr.mxu1 %v5672_v48  ;;  %4672 = vmatpush3.msra.mxu0 %v2854_v2  ;;  %v2891_v2 = vld [vmem:[%s6034_s17 + $0x380] sm:$0xff] }
 0x56e   : > { %4705 = vmatpush3.msra.mxu1 %v2871_v4  ;;  %4673 = vmatprep.subr.mxu0 %v5672_v48  ;;  %v2770_v4 = vcombine.high %v7065_v3, %v7065_v3 }
 0x56f   : > { %4706 = vmatprep.subr.mxu1 %v5672_v48  ;;  %4674 = vmatpush3.msra.mxu0 %v2853_v15  ;;  %v2714_v15 = vld [vmem:[#allocation4] sm:$0xff] }
 0x570   : > { %4707 = vmatpush3.msra.mxu1 %v2870_v5  ;;  %4675 = vmatprep.subr.mxu0 %v5672_v48  ;;  %v2715_v5 = vmul.f32 %v6898_v11, %v2714_v15 }
 0x571   : > { %4708 = vmatprep.subr.mxu1 %v5672_v48  ;;  %4676 = vmatpush3.msra.mxu0 %v2852_v7 }
 0x572   : > { %4709 = vmatpush3.msra.mxu1 %v2869_v8  ;;  %4677 = vmatprep.subr.mxu0 %v5672_v48 }
 0x573   : > { %4710 = vmatprep.subr.mxu1 %v5672_v48  ;;  %4678 = vmatpush3.msra.mxu0 %v2851_v19 }
 0x574   : > { %4711 = vmatpush3.msra.mxu1 %v2868_v58  ;;  %4679 = vmatprep.subr.mxu0 %v5672_v48 }
 0x575   : > { %4712 = vmatprep.subr.mxu1 %v5672_v48  ;;  %4680 = vmatpush3.msra.mxu0 %v2850_v23 }
 0x576   : > { %4713 = vmatpush3.msra.mxu1 %v2867_v9  ;;  %4681 = vmatprep.subr.mxu0 %v5672_v48 }
 0x577   : > { %4714 = vmatprep.subr.mxu1 %v5672_v48  ;;  %4682 = vmatpush3.msra.mxu0 %v2849_v10 }
 0x578   : > { %4715 = vmatpush3.msra.mxu1 %v2866_v42  ;;  %4683 = vmatprep.subr.mxu0 %v5672_v48 }
 0x579   : > { %4716 = vmatprep.subr.mxu1 %v5672_v48  ;;  %4684 = vmatpush3.msra.mxu0 %v2848_v12 }
 0x57a   : > { %4717 = vmatpush3.msra.mxu1 %v2865_v13  ;;  %4685 = vmatprep.subr.mxu0 %v5672_v48 }
 0x57b   : > { %4718 = vmatprep.subr.mxu1 %v5672_v48  ;;  %4686 = vmatpush3.msra.mxu0 %v2847_v14 }
 0x57c   : > { %4719 = vmatpush3.msra.mxu1 %v2864_v32  ;;  %4687 = vmatprep.subr.mxu0 %v5672_v48 }
 0x57d   : > { %4720 = vmatprep.subr.mxu1 %v5672_v48  ;;  %4688 = vmatpush3.msra.mxu0 %v2846_v17 }
 0x57e   : > { %4721 = vmatpush3.msra.mxu1 %v2863_v61  ;;  %4689 = vmatprep.subr.mxu0 %v5672_v48 }
 0x57f   : > { %4722 = vmatprep.subr.mxu1 %v5672_v48  ;;  %4690 = vmatpush3.msra.mxu0 %v2845_v33 }
 0x580   : > { %4723 = vmatpush3.msra.mxu1 %v2862_v20  ;;  %4691 = vmatprep.subr.mxu0 %v5672_v48 }
 0x581   : > { %4724 = vmatprep.subr.mxu1 %v5672_v48  ;;  %4692 = vmatpush3.msra.mxu0 %v2844_v34 }
 0x582   : > { %4725 = vmatpush3.msra.mxu1 %v2861_v21  ;;  %4693 = vmatprep.subr.mxu0 %v5672_v48 }
 0x583   : > { %4726 = vmatprep.subr.mxu1 %v5672_v48  ;;  %4694 = vmatpush3.msra.mxu0 %v2843_v45 }
 0x584   : > { %4695 = vmatprep.mubr.msk.f32.mxu0 %vm5673_vm1, %v5672_v48  ;;  %4727 = vmatpush3.msra.mxu1 %v2860_v43 }
 0x585   : > { %4696 = vmatmul.mubr.f32.vlgmr.msra.gmra.mxu0 %v7055_v24  ;;  %4728 = vmatprep.subr.mxu1 %v5672_v48  ;;  %v3471_v24 = vpop.permute.xlu0 %3470 }
 0x586   : > { %4733 = vmatprep.subr.mxu0 %v5672_v48  ;;  %4729 = vmatpush3.msra.mxu1 %v2859_v25 }
 0x587   : > { %4730 = vmatprep.mubr.msk.f32.mxu1 %vm5673_vm1, %v5672_v48  ;;  %4734 = vmatpush3.msra.mxu0 %v2890_v60 }
 0x588   : > { %4731 = vmatmul.mubr.f32.vlgmr.msra.gmra.mxu1 %v7065_v3  ;;  %4735 = vmatprep.subr.mxu0 %v5672_v48 }
 0x589   : > { %4768 = vmatprep.subr.mxu1 %v5672_v48  ;;  %4736 = vmatpush3.msra.mxu0 %v2889_v27 }
 0x58a   : > { %4769 = vmatpush3.msra.mxu1 %v2906_v29  ;;  %4737 = vmatprep.subr.mxu0 %v5672_v48 }
 0x58b   : > { %4770 = vmatprep.subr.mxu1 %v5672_v48  ;;  %4738 = vmatpush3.msra.mxu0 %v2888_v30 }
 0x58c   : > { %4771 = vmatpush3.msra.mxu1 %v2905_v56  ;;  %4739 = vmatprep.subr.mxu0 %v5672_v48  ;;  %v3473_v56 = vmul.f32 %v3471_v24, %v3467_v22 }
 0x58d   : > { %4772 = vmatprep.subr.mxu1 %v5672_v48  ;;  %4740 = vmatpush3.msra.mxu0 %v2887_v1 }
 0x58e   : > { %4773 = vmatpush3.msra.mxu1 %v2904_v6  ;;  %4741 = vmatprep.subr.mxu0 %v5672_v48 }
 0x58f   : > { %4774 = vmatprep.subr.mxu1 %v5672_v48  ;;  %4742 = vmatpush3.msra.mxu0 %v2886_v31 }
 0x590   : > { %4775 = vmatpush3.msra.mxu1 %v2903_v35  ;;  %4743 = vmatprep.subr.mxu0 %v5672_v48 }
 0x591   : > { %4776 = vmatprep.subr.mxu1 %v5672_v48  ;;  %4744 = vmatpush3.msra.mxu0 %v2885_v36 }
 0x592   : > { %4777 = vmatpush3.msra.mxu1 %v2902_v44  ;;  %4745 = vmatprep.subr.mxu0 %v5672_v48 }
 0x593   : > { %4778 = vmatprep.subr.mxu1 %v5672_v48  ;;  %4746 = vmatpush3.msra.mxu0 %v2884_v26 }
 0x594   : > { %4779 = vmatpush3.msra.mxu1 %v2901_v37  ;;  %4747 = vmatprep.subr.mxu0 %v5672_v48 }
 0x595   : > { %4780 = vmatprep.subr.mxu1 %v5672_v48  ;;  %4748 = vmatpush3.msra.mxu0 %v2883_v38 }
 0x596   : > { %4781 = vmatpush3.msra.mxu1 %v2900_v39  ;;  %4749 = vmatprep.subr.mxu0 %v5672_v48 }
 0x597   : > { %4782 = vmatprep.subr.mxu1 %v5672_v48  ;;  %4750 = vmatpush3.msra.mxu0 %v2882_v40 }
 0x598   : > { %4783 = vmatpush3.msra.mxu1 %v2899_v41  ;;  %4751 = vmatprep.subr.mxu0 %v5672_v48 }
 0x599   : > { %4784 = vmatprep.subr.mxu1 %v5672_v48  ;;  %4752 = vmatpush3.msra.mxu0 %v2881_v47 }
 0x59a   : > { %4785 = vmatpush3.msra.mxu1 %v2898_v49  ;;  %4753 = vmatprep.subr.mxu0 %v5672_v48 }
 0x59b   : > { %4786 = vmatprep.subr.mxu1 %v5672_v48  ;;  %4754 = vmatpush3.msra.mxu0 %v2880_v55 }
 0x59c   : > { %4787 = vmatpush3.msra.mxu1 %v2897_v50  ;;  %4755 = vmatprep.subr.mxu0 %v5672_v48 }
 0x59d   : > { %4788 = vmatprep.subr.mxu1 %v5672_v48  ;;  %4756 = vmatpush3.msra.mxu0 %v2879_v52 }
 0x59e   : > { %4789 = vmatpush3.msra.mxu1 %v2896_v53  ;;  %4757 = vmatprep.subr.mxu0 %v5672_v48 }
 0x59f   : > { %4790 = vmatprep.subr.mxu1 %v5672_v48  ;;  %4758 = vmatpush3.msra.mxu0 %v2878_v0 }
 0x5a0   : > { %4791 = vmatpush3.msra.mxu1 %v2895_v54  ;;  %4759 = vmatprep.subr.mxu0 %v5672_v48 }
 0x5a1   : > { %4792 = vmatprep.subr.mxu1 %v5672_v48  ;;  %4760 = vmatpush3.msra.mxu0 %v2877_v51 }
 0x5a2   : > { %4793 = vmatpush3.msra.mxu1 %v2894_v57  ;;  %4761 = vmatprep.subr.mxu0 %v5672_v48 }
 0x5a3   : > { %4794 = vmatprep.subr.mxu1 %v5672_v48  ;;  %4762 = vmatpush3.msra.mxu0 %v2876_v59 }
 0x5a4   : > { %4795 = vmatpush3.msra.mxu1 %v2893_v62  ;;  %4763 = vmatprep.subr.mxu0 %v5672_v48 }
 0x5a5   : > { %4796 = vmatprep.subr.mxu1 %v5672_v48  ;;  %4764 = vmatpush3.msra.mxu0 %v2875_v28 }
 0x5a6   : > { %4765 = vmatprep.mubr.msk.f32.mxu0 %vm5673_vm1, %v5672_v48  ;;  %4797 = vmatpush3.msra.mxu1 %v2892_v63 }
 0x5a7   : > { %4766 = vmatmul.mubr.f32.vlgmr.msra.gmra.mxu0 %v2768_v46  ;;  %4798 = vmatprep.subr.mxu1 %v5672_v48 }
 0x5a8   : > { %4799 = vmatpush3.msra.mxu1 %v2891_v2  ;;  %4800 = vmatprep.mubr.msk.f32.mxu1 %vm5673_vm1, %v5672_v48 }
 0x5a9   : > { %4801 = vmatmul.mubr.f32.vlgmr.msra.gmra.mxu1 %v2770_v4 }
 0x5c8   : > { %v2717_v7 = vpop.xlane.xlu1 %2716 }
 0x5c9   : > { %v2718_v8 = vadd.f32 %v2717_v7, %v2715_v5 }
 0x5cb   : > { %2720 = vst.msk [vmem:[#allocation4] sm:$0xff] %vm2719_vm10, %v2718_v8 }
 0x603   : > { %v2973_v19 = vpop.f32.mrf.mxu0 }
 0x605   : > { %v4557_v58 = vpop.f32.mrf.mxu0  ;;  %v3043_v23 = vpop.f32.mrf.mxu1 }
 0x606   : > { %v3482_v9 = vrot.slane %v3043_v23, 7 }
 0x607   : > { %v4592_v10 = vpop.f32.mrf.mxu1 }
 0x608   : > { %v3483_v42 = vsel %vm2674_vm2, %v3482_v9, %v2973_v19 }
 0x623   : > { %v3113_v12 = vpop.f32.mrf.mxu0 }
 0x624   : > { %v3484_v13 = vrot.slane %v3113_v12, 6 }
 0x625   : > { %v4627_v14 = vpop.f32.mrf.mxu0 }
 0x626   : > { %v3485_v48 = vsel %vm2677_vm3, %v3484_v13, %v3483_v42  ;;  %v3183_v32 = vpop.f32.mrf.mxu1 }
 0x627   : > { %v3486_v20 = vrot.slane %v3183_v32, 5 }
 0x628   : > { %v4662_v17 = vpop.f32.mrf.mxu1 }
 0x629   : > { %v3487_v16 = vsel %vm2680_vm4, %v3486_v20, %v3485_v48 }
 0x645   : > { %v3253_v18 = vpop.f32.mrf.mxu0 }
 0x646   : > { %v3488_v34 = vrot.slane %v3253_v18, 4 }
 0x647   : > { %v4697_v11 = vpop.f32.mrf.mxu0 }
 0x648   : > { %v3323_v61 = vpop.f32.mrf.mxu1  ;;  %v3489_v45 = vsel %vm2683_vm5, %v3488_v34, %v3487_v16 }
 0x649   : > { %v3490_v21 = vrot.slane %v3323_v61, 3 }
 0x64a   : > { %v4732_v33 = vpop.f32.mrf.mxu1 }
 0x64b   : > { %v3491_v60 = vsel %vm2686_vm6, %v3490_v21, %v3489_v45 }
 0x667   : > { %v3393_v43 = vpop.f32.mrf.mxu0 }
 0x668   : > { %v3492_v25 = vrot.slane %v3393_v43, 2 }
 0x669   : > { %v4767_v3 = vpop.f32.mrf.mxu0  ;;  %v3463_v27 = vpop.f32.mrf.mxu1 }
 0x66a   : > { %v3493_v29 = vsel %vm2689_vm7, %v3492_v25, %v3491_v60  ;;  %v3494_v30 = vrot.slane %v3463_v27, 1 }
 0x66b   : > { %v4802_v1 = vpop.f32.mrf.mxu1  ;;  %3503 = sbr.rel (%p3919_p5) target bundleno = 1798 (0x706), region = 100 }
 0x66c   : > { %v3495_v6 = vsel %vm2692_vm8, %v3494_v30, %v3493_v29 }
 0x66d   : > { %v3497_v31 = vadd.f32 %v3495_v6, %v3473_v56 }
 0x66f   : > { %3498 = vst [vmem:[#allocation5] sm:$0xff] %v3497_v31 }
 0x670   : > { %v3517_v35 = vld [vmem:[#allocation3] sm:$0xff]  ;;  %v3504_v36 = vld [vmem:[#allocation4] sm:$0xff]  ;;  %v5676_v44 = vmov 0  }
 0x671   : > { %5261 = vset.pattern.permute.xlu0 %v5676_v44  ;;  %5262 = vrcp.f32 %v3504_v36  ;;  %v3515_v37 = vld [vmem:[%s6069_s29] sm:$0xff]  ;;  %v3516_v38 = vld [vmem:[%s6069_s29 + $0x8] sm:$0xff]  ;;  %v3534_v51 = vld [vmem:[%s6051_s6 + $0x8] sm:$0xff] }
 0x672   : > { %3520 = vperm.xlu0 %5261, %v3517_v35   ;;  %v3533_v0 = vld [vmem:[%s6051_s6] sm:$0xff] }
 0x676   : > { %v3507_v55 = vld [vmem:[#allocation5] sm:$0xff] }
 0x67e   : > { %v5263_v26 = vpop.eup %5262 }
 0x67f   : > { %3510 = vperm.xlu0 %5261, %v5263_v26  }
 0x6ed   : > { %v3521_v39 = vpop.permute.xlu0 %3520 }
 0x6ee   : > { %v3523_v40 = vsub.f32 %v3515_v37, %v3521_v39  ;;  %v3524_v41 = vsub.f32 %v3516_v38, %v3521_v39 }
 0x6f0   : > { %v3525_v47 = vmul.f32 1.442695, %v3523_v40  ;;  %v3527_v49 = vmul.f32 1.442695, %v3524_v41 }
 0x6f2   : > { %5264 = vpow2.f32 %v3525_v47 }
 0x6f3   : > { %5266 = vpow2.f32 %v3527_v49 }
 0x6fa   : > { %v3511_v50 = vpop.permute.xlu0 %3510 }
 0x6fb   : > { %v3513_v52 = vmul.f32 %v3511_v50, %v3507_v55 }
 0x6fd   : > { %3514 = vst [vmem:[%s6066_s0] sm:$0xff] %v3513_v52 }
 0x6ff   : > { %v5265_v53 = vpop.eup %5264 }
 0x700   : > { %v5267_v54 = vpop.eup %5266  ;;  %v3529_v57 = vmul.f32 %v5265_v53, %v3511_v50 }
 0x701   : > { %v3530_v59 = vmul.f32 %v5267_v54, %v3511_v50 }
 0x702   : > { %3531 = vst [vmem:[%s6069_s29] sm:$0xff] %v3529_v57  ;;  %v3535_v62 = vadd.f32 %v3533_v0, %v3529_v57 }
 0x703   : > { %3532 = vst [vmem:[%s6069_s29 + $0x8] sm:$0xff] %v3530_v59  ;;  %v3536_v28 = vadd.f32 %v3534_v51, %v3530_v59 }
 0x704   : > { %3537 = vst [vmem:[%s6072_s22] sm:$0xff] %v3535_v62 }
 0x705   : > { %3538 = vst [vmem:[%s6072_s22 + $0x8] sm:$0xff] %v3536_v28 }
 0x706 PF: > { %s7347_s13 = sld [smem:[#allocation43_spill]]  ;;  %s3577_s24 = sshll.u32 %s6069_s29, 4  ;;  %s3578_s24 = int_to_ptr.vmem [resolvable:$true] %s3577_s24 }
 0x707   : > { %s7348_s23 = sld [smem:[#allocation50_spill]]  ;;  %s3545_s30 = scalar_lea.sflag [#allocation23], %s6030_s28 }
 0x708   : > { %s7349_s10 = sld [smem:[#allocation59_spill]]  ;;  %s5451_s6 = scalar_lea.vmem %s3578_s24, 256 }
 0x709   : > { %p5452_p8 = scmp.ne.s32.totalorder %s3578_s24, %s5451_s6  ;;  %s5677_s20 = smov [#allocation22]  }
 0x70a   : > { %s5455_s7 = sshll.u32 %s5677_s20, 4  ;;  %s5456_s7 = int_to_ptr.vmem [resolvable:$false] %s5455_s7 }
 0x70b   : > { %s5457_s9 = scalar_lea.vmem %s5456_s7, 512  ;;  %p5458_p12 = scmp.lt.s32.totalorder %s3578_s24, %s5456_s7 }
 0x70c   : > { %s3934_s18 = sshll.u32 %s7347_s13, 8  ;;  %p5459_p2 = scmp.lt.s32.totalorder %s5457_s9, %s5451_s6 }
 0x70d   : > { %p7350_p6 = scmp.ne.s32.totalorder %s7348_s23, 0 }
 0x70e   : > { %s3575_s12 = scalar_lea.hbm %s7349_s10, %s3934_s18  ;;  %p5460_p7 = por %p5459_p2, %p5458_p12 }
 0x70f   : > { %p5453_p10 = pnand %p5452_p8, %p7350_p6 }
 0x711   : > { %p5454_p11 = pneg %p5453_p10 }
 0x713   : > { %p5461_p3 = pnand %p5460_p7, %p5454_p11 }
 0x715   : > { %5464 = shalt.err (!%p5461_p3)
}
 0x716   : > { %s5465_s16 = scalar_lea.hbm %s3575_s12, 256  ;;  %s5469_s15 = scalar_lea.hbm %s7349_s10, 512 }
 0x717   : > { %p5466_p9 = scmp.ne.s32.totalorder %s3575_s12, %s5465_s16  ;;  %p5470_p4 = scmp.lt.s32.totalorder %s3575_s12, %s7349_s10 }
 0x718   : > { %p5471_p13 = scmp.lt.s32.totalorder %s5469_s15, %s5465_s16 }
 0x719   : > { %p5467_p0 = pnand %p5466_p9, %p7350_p6 }
 0x71a   : > { %p5472_p5 = por %p5471_p13, %p5470_p4 }
 0x71b   : > { %p5468_p1 = pneg %p5467_p0 }
 0x71d   : > { %p5473_p8 = pnand %p5472_p5, %p5468_p1 }
 0x71f   : > { %5476 = shalt.err (!%p5473_p8)
}
 0x720   : > { %4844 = dma.vmem_to_hbm [thread:$0]  (%p7350_p6), %s3578_s24, 256, %s3575_s12, %s3545_s30  }
 0x721   : > { %s3923_s5 = sshll.u32 %s7347_s13, 7  ;;  %s3563_s17 = sshll.u32 %s6066_s0, 4  ;;  %s3564_s17 = int_to_ptr.vmem [resolvable:$true] %s3563_s17 }
 0x722   : > { %s7351_s7 = sld [smem:[#allocation58_spill]]  ;;  %s3540_s16 = scalar_lea.sflag [#allocation8], %s6018_s11 }
 0x723   : > { %s5477_s29 = scalar_lea.vmem %s3564_s17, 128  ;;  %s5678_s8 = smov [#allocation21]  }
 0x724   : > { %p5478_p10 = scmp.ne.s32.totalorder %s3564_s17, %s5477_s29  ;;  %s5481_s15 = sshll.u32 %s5678_s8, 4  ;;  %s5482_s15 = int_to_ptr.vmem [resolvable:$false] %s5481_s15 }
 0x725   : > { %s5483_s1 = scalar_lea.vmem %s5482_s15, 256  ;;  %p5484_p2 = scmp.lt.s32.totalorder %s3564_s17, %s5482_s15 }
 0x726   : > { %p5479_p11 = pnand %p5478_p10, %p7350_p6  ;;  %p5485_p7 = scmp.lt.s32.totalorder %s5483_s1, %s5477_s29 }
 0x728   : > { %s3561_s9 = scalar_lea.hbm %s7351_s7, %s3923_s5  ;;  %p5480_p12 = pneg %p5479_p11 }
 0x729   : > { %p5486_p3 = por %p5485_p7, %p5484_p2 }
 0x72b   : > { %p5487_p9 = pnand %p5486_p3, %p5480_p12 }
 0x72d   : > { %5490 = shalt.err (!%p5487_p9)
}
 0x72e   : > { %s5491_s0 = scalar_lea.hbm %s3561_s9, 128  ;;  %s5495_s24 = scalar_lea.hbm %s7351_s7, 256 }
 0x72f   : > { %p5492_p0 = scmp.ne.s32.totalorder %s3561_s9, %s5491_s0  ;;  %p5496_p13 = scmp.lt.s32.totalorder %s3561_s9, %s7351_s7 }
 0x730   : > { %p5497_p5 = scmp.lt.s32.totalorder %s5495_s24, %s5491_s0 }
 0x731   : > { %p5493_p1 = pnand %p5492_p0, %p7350_p6 }
 0x732   : > { %p5498_p8 = por %p5497_p5, %p5496_p13 }
 0x733   : > { %p5494_p4 = pneg %p5493_p1 }
 0x735   : > { %p5499_p10 = pnand %p5498_p8, %p5494_p4 }
 0x737   : > { %5502 = shalt.err (!%p5499_p10)
}
 0x738   : > { %4843 = dma.vmem_to_hbm [thread:$0]  (%p7350_p6), %s3564_s17, 128, %s3561_s9, %s3540_s16  }
 0x739   : > { %s7352_s29 = sld [smem:[#allocation60_spill]]  ;;  %s3591_s15 = sshll.u32 %s6072_s22, 4  ;;  %s3592_s15 = int_to_ptr.vmem [resolvable:$true] %s3591_s15 }
 0x73a   : > { %s5503_s1 = scalar_lea.vmem %s3592_s15, 256  ;;  %s5679_s0 = smov [#allocation24]  }
 0x73b   : > { %p5504_p11 = scmp.ne.s32.totalorder %s3592_s15, %s5503_s1  ;;  %s5507_s11 = sshll.u32 %s5679_s0, 4  ;;  %s5508_s11 = int_to_ptr.vmem [resolvable:$false] %s5507_s11 }
 0x73c   : > { %s5509_s12 = scalar_lea.vmem %s5508_s11, 512  ;;  %p5510_p7 = scmp.lt.s32.totalorder %s3592_s15, %s5508_s11 }
 0x73d   : > { %p5505_p12 = pnand %p5504_p11, %p7350_p6  ;;  %p5511_p3 = scmp.lt.s32.totalorder %s5509_s12, %s5503_s1 }
 0x73f   : > { %s3589_s8 = scalar_lea.hbm %s7352_s29, %s3934_s18  ;;  %p5506_p2 = pneg %p5505_p12 }
 0x740   : > { %p5512_p9 = por %p5511_p3, %p5510_p7 }
 0x742   : > { %p5513_p0 = pnand %p5512_p9, %p5506_p2 }
 0x744   : > { %5516 = shalt.err (!%p5513_p0)
}
 0x745   : > { %s5517_s13 = scalar_lea.hbm %s3589_s8, 256  ;;  %s5521_s17 = scalar_lea.hbm %s7352_s29, 512 }
 0x746   : > { %p5518_p1 = scmp.ne.s32.totalorder %s3589_s8, %s5517_s13  ;;  %p5522_p5 = scmp.lt.s32.totalorder %s3589_s8, %s7352_s29 }
 0x747   : > { %p5523_p8 = scmp.lt.s32.totalorder %s5521_s17, %s5517_s13 }
 0x748   : > { %p5519_p4 = pnand %p5518_p1, %p7350_p6 }
 0x749   : > { %p5524_p10 = por %p5523_p8, %p5522_p5 }
 0x74a   : > { %p5520_p13 = pneg %p5519_p4 }
 0x74c   : > { %p5525_p11 = pnand %p5524_p10, %p5520_p13 }
 0x74e   : > { %5528 = shalt.err (!%p5525_p11)
}
 0x74f   : > { %4845 = dma.vmem_to_hbm [thread:$0]  (%p7350_p6), %s3592_s15, 256, %s3589_s8, %s3545_s30  }
 0x750 PF: > { %s7353_s24 = sld [smem:[#allocation40_spill]]  ;;  %p4880_p12 = scmp.ge.s32.totalorder %s5647_s27, 2 }
 0x751   : > { %s7354_s14 = sld [smem:[#allocation51_spill]] }
 0x756   : > { %s3603_s5 = sand.u32 1, %s7353_s24  }
 0x757   : > { %p7355_p2 = scmp.ne.s32.totalorder %s7354_s14, 0  ;;  %s3604_s6 = scalar_lea.sflag [#allocation8], %s3603_s5 }
 0x759   : > { %p4863_p7 = pnand %p4880_p12, %p7355_p2 }
 0x75b   : > { %p4864_p3 = pneg %p4863_p7 }
 0x75d   : > { %5598 = dma.done.wait (%p4864_p3), %s3604_s6, 128  }
 0x75e   : > { %5600 = vsyncadd (%p4864_p3), %s3604_s6, 4294967168  ;;  %s7356_s20 = sadd.s32 4294967294, %s5647_s27  }
 0x75f   : > { %s3612_s1 = sand.u32 1, %s7356_s20  }
 0x760   : > { %s3613_s0 = scalar_lea.sflag [#allocation23], %s3612_s1 }
 0x761   : > { %5602 = dma.done.wait (%p4864_p3), %s3613_s0, 512  }
 0x762   : > { %5604 = vsyncadd (%p4864_p3), %s3613_s0, 4294966784  ;;  %s39_s27 = sadd.s32 1, %s5647_s27   ;;  %s7357_s17 = sld [smem:[#allocation39_spill]] }
 0x763   : > { %p36_p6 = scmp.ge.s32.totalorder %s39_s27, 6   ;;  %s7358_s28 = sld [smem:[#allocation48_spill]] }
 0x764   : > { %s7359_s23 = sld [smem:[#allocation41_spill]]  ;;  %s7363_s18 = smov %s5615_s19 }
 0x765   : > { %s7360_s22 = sld [smem:[#allocation47_spill]]  ;;  %s7365_s20 = smov %s5623_s21 }
 0x766   : > { %s7361_s30 = sld [smem:[#allocation45_spill]]  ;;  %s7368_s24 = smov %s5643_s26 }
 0x767   : > { %s7362_s8 = sld [smem:[#allocation46_spill]] }
 0x769   : > { %s7364_s19 = smov %s7358_s28  ;;  %38 = sbr.rel (!%p36_p6) target bundleno = 27 (0x1b), region = 217 }
 0x76a   : > { %s7366_s21 = smov %s7359_s23  ;;  %s7367_s23 = smov %s5639_s25 }
 0x76c   : > { %s7369_s25 = smov %s7361_s30 }
 0x76d   : > { %s7370_s26 = smov %s7362_s8 }
 0x76e   :  { %3627 = vsyncpa [#allocation7], 1 }
 0x76f   :  { %3629 = vsyncpa [#allocation7 + $0x1], 1 }
 0x770   :  { %3630 = vsyncpa [#allocation10], 1 }
 0x771   :  { %3632 = vsyncpa [#allocation10 + $0x1], 1 }
 0x772   :  { %3633 = vsyncpa [#allocation13], 1 }
 0x773   :  { %3635 = vsyncpa [#allocation13 + $0x1], 1 }
 0x774   :  { %3636 = vsyncpa [#allocation16], 1 }
 0x775   :  { %3637 = vsyncpa [#allocation19], 1 }
 0x776   :  { %3638 = vsyncpa [#allocation8], 1 }
 0x777   :  { %3640 = vsyncpa [#allocation8 + $0x1], 1 }
 0x778   :  { %3641 = vsyncpa [#allocation23], 1 }
 0x779   :  { %3643 = vsyncpa [#allocation23 + $0x1], 1 }

</bundles_post_ra>
